<compile_context>
chip_gen: v7x
topology: tpu7x:2x2x1
jax: 0.10.0
libtpu: 0.0.40
codegen_flags: <defaults>
</compile_context>

<pallas_src>
import jax
import jax.numpy as jnp
from jax import lax
from jax.experimental import pallas as pl
from jax.experimental.pallas import tpu as pltpu
import numpy as np

N_NODES = 12            # n*32 must equal 384 for the Conv1d(384, ...) head -> n = 12
N_HEADS = 4
C_IN = 2
C_HID = 32
FEAT = N_NODES * C_HID  # 384
C_CONV = 128
N_CLS = 10


# -----------------------------------------------------------------------------
# Kernel: batched GCN (2 layers + residual) + fused 4-head graph attention
#         + per-node 1x1 conv + eval-BN + ReLU.   One grid step = G graphs,
#         rows packed node-major:  row = node * G + graph_local.
# -----------------------------------------------------------------------------
def gcn_attn_conv_kernel(xg1_ref, xres_ref, adjbd_ref, attb_ref,
                         wgc2_ref, scale1_ref, shift1_ref, biasg_ref,
                         watt_ref, a1m_ref, a2m_ref, wval_ref, woutg_ref,
                         wconv_ref, bn2s_ref, bn2b_ref,
                         z_ref):
    f32 = jnp.float32
    bf16 = jnp.bfloat16
    GN = xg1_ref.shape[0]
    G = GN // N_NODES

    def dot32(a, b):
        return jnp.dot(a, b, preferred_element_type=f32)

    adjbd = adjbd_ref[...]                              # (GN, GN) bf16, kron(adj, I_G)

    # ---- GCN layer 1 (x @ Wgc1 prefolded in wrapper); eval-BN folded into scale/shift
    h = dot32(adjbd, xg1_ref[...])                      # bf16 x bf16 -> f32 (GN, 32)
    h = jnp.maximum(h * scale1_ref[...] + shift1_ref[...], 0.0)   # dropout = identity

    # ---- GCN layer 2 + residual (x @ Wres prefolded) ----
    hw = dot32(h, wgc2_ref[...])                        # (GN, 32) f32
    g = dot32(adjbd, hw.astype(bf16)) + xres_ref[...] + biasg_ref[...]

    # ---- multi-head graph attention: fused score projections for all 4 heads ----
    wh = dot32(g, watt_ref[...])                        # (GN, 128) = [Wh_0 .. Wh_3]
    f1_all = dot32(wh, a1m_ref[...])                    # (GN, 4):  Wh_k . a1_k
    f2_all = lax.dot_general(a2m_ref[...], wh, (((1,), (1,)), ((), ())),
                             preferred_element_type=f32)            # (4, GN)
    attb = attb_ref[...]                                # 0 within a graph, -1e30 across

    out = dot32(g, woutg_ref[...])                      # (GN, 32): the "[g, ...]" block
    for k in range(N_HEADS):
        e = f1_all[:, k:k + 1] + f2_all[k:k + 1, :]     # (GN, GN) scores
        e = jnp.where(e > 0, e, 0.01 * e)               # leaky_relu
        e = e + attb                                    # restrict softmax to own graph
        e = e - jnp.max(e, axis=-1, keepdims=True)
        pexp = jnp.exp(e)
        attn = pexp * pl.reciprocal(jnp.sum(pexp, axis=-1, keepdims=True))
        wv_k = dot32(g, wval_ref[k])                    # (GN, 32) head-k values (Wout folded)
        out = out + dot32(attn.astype(bf16), wv_k.astype(bf16))

    # ---- flatten(node, ch) + 1x1 conv + eval-BN + ReLU via 12 per-node matmuls ----
    z = jnp.zeros((G, C_CONV), dtype=f32)
    for n in range(N_NODES):
        z = z + dot32(out[n * G:(n + 1) * G, :], wconv_ref[n])      # (G, 128)
    z_ref[...] = jnp.maximum(z * bn2s_ref[...] + bn2b_ref[...], 0.0)


# -----------------------------------------------------------------------------
# Wrapper
# -----------------------------------------------------------------------------
def _graphs_per_step(B):
    """Graphs per grid step.  Prefer small G (GN = 12*G <= 128 is one MXU pass on every
    generation) with >= 2 steps so v7x's two cores both get work; G must be a multiple
    of 8 to keep the (G, 128) output block sublane-aligned, else fall back to G = B."""
    for g in (8, 16, 24, 32):
        if B % g == 0 and B // g >= 2:
            return g
    for g in (8, 16, 24, 32):
        if B % g == 0:
            return g
    return B


def auwgcn_forward(x, p):
    b, t, n, c = x.shape
    assert n == N_NODES and c == C_IN
    f32, bf16 = jnp.float32, jnp.bfloat16
    B = b * t
    G = _graphs_per_step(B)
    steps = B // G
    GN = G * N_NODES

    xr = x.astype(f32).reshape(B, N_NODES, C_IN)

    # ---- prefold the K=2 input matmuls (cheap XLA) and reorder rows node-major ----
    xg1 = xr @ p['wgc1']                                 # (B, 12, 32)
    xres = xr @ p['wres']                                # (B, 12, 32)

    def node_major(a):
        return (a.reshape(steps, G, N_NODES, C_HID)
                 .transpose(0, 2, 1, 3)
                 .reshape(steps * GN, C_HID))

    xg1 = node_major(xg1).astype(bf16)                   # feeds the bf16 adjacency matmul
    xres = node_major(xres)                              # added directly into g: keep f32

    # ---- fold biases / eval-BN (grid-invariant) ----
    scale1 = p['bn1s']
    shift1 = p['bgc1'] * p['bn1s'] + p['bn1b']
    biasg = p['bres'] + p['bgc2']

    # node-major stacked adjacency: kron(adj, I_G), bf16 operand of the big matmuls
    adjbd = jnp.kron(p['adj'].astype(f32), jnp.eye(G, dtype=f32)).astype(bf16)

    # attention weights: all heads fused into 128 lanes; out-projection folded per head
    watt_cat = jnp.transpose(p['watt'], (1, 0, 2)).reshape(C_HID, N_HEADS * C_HID)
    wout_g = p['wout'][:C_HID]                                       # (32, 32)
    wout_h = p['wout'][C_HID:].reshape(N_HEADS, C_HID, C_HID)
    wval = jnp.einsum('kcd,kde->kce', p['watt'], wout_h)             # (4, 32, 32)

    a1m = jnp.zeros((N_HEADS * C_HID, N_HEADS), f32)
    a2m = jnp.zeros((N_HEADS, N_HEADS * C_HID), f32)
    for k in range(N_HEADS):
        a1m = a1m.at[k * C_HID:(k + 1) * C_HID, k].set(p['a1'][k, 0])
        a2m = a2m.at[k, k * C_HID:(k + 1) * C_HID].set(p['a2'][k, 0])

    wconv = p['wconv'].reshape(N_NODES, C_HID, C_CONV)               # (12, 32, 128)

    # additive attention mask: rows/cols in the same graph iff equal modulo G
    rr = np.arange(GN)
    att_bias = jnp.asarray(
        np.where(rr[:, None] % G == rr[None, :] % G, 0.0, -1e30), dtype=f32)

    full2 = lambda i: (0, 0)
    full3 = lambda i: (0, 0, 0)

    z = pl.pallas_call(
        gcn_attn_conv_kernel,
        out_shape=jax.ShapeDtypeStruct((B, C_CONV), f32),
        grid=(steps,),
        in_specs=[
            pl.BlockSpec((GN, C_HID), lambda i: (i, 0)),       # x @ Wgc1   (bf16)
            pl.BlockSpec((GN, C_HID), lambda i: (i, 0)),       # x @ Wres   (f32)
            pl.BlockSpec((GN, GN), full2),                     # kron(adj, I_G)  (bf16)
            pl.BlockSpec((GN, GN), full2),                     # attention -inf bias
            pl.BlockSpec((C_HID, C_HID), full2),               # Wgc2
            pl.BlockSpec((1, C_HID), full2),                   # BN1 scale
            pl.BlockSpec((1, C_HID), full2),                   # BN1 shift (+ gc1 bias)
            pl.BlockSpec((1, C_HID), full2),                   # gc2 + residual bias
            pl.BlockSpec((C_HID, N_HEADS * C_HID), full2),     # Watt, heads fused
            pl.BlockSpec((N_HEADS * C_HID, N_HEADS), full2),   # a1 placement (128, 4)
            pl.BlockSpec((N_HEADS, N_HEADS * C_HID), full2),   # a2 placement (4, 128)
            pl.BlockSpec((N_HEADS, C_HID, C_HID), full3),      # Watt @ Wout per head
            pl.BlockSpec((C_HID, C_HID), full2),               # Wout block for g
            pl.BlockSpec((N_NODES, C_HID, C_CONV), full3),     # conv weight per node
            pl.BlockSpec((1, C_CONV), full2),                  # BN2 scale
            pl.BlockSpec((1, C_CONV), full2),                  # BN2 shift
        ],
        out_specs=pl.BlockSpec((G, C_CONV), lambda i: (i, 0)),
        compiler_params=pltpu.CompilerParams(dimension_semantics=("parallel",)),
    )(xg1, xres, adjbd, att_bias, p['wgc2'], scale1, shift1, biasg,
      watt_cat, a1m, a2m, wval, wout_g, wconv, p['bn2s'], p['bn2b'])

    # classifier is a few kFLOP: time-mean + Linear(128, 10) in plain XLA
    zm = jnp.mean(z.reshape(b, t, C_CONV), axis=1)
    return zm @ p['wlin'] + p['blin']


# -----------------------------------------------------------------------------
# Pure-JAX reference (same eval-mode semantics) for correctness checking.
# -----------------------------------------------------------------------------
def reference_forward(x, p):
    b, t, n, c = x.shape
    xr = x.reshape(b * t, n, c).astype(jnp.float32)
    res = xr @ p['wres'] + p['bres']
    h = jnp.einsum('ij,bjd->bid', p['adj'], xr @ p['wgc1']) + p['bgc1']
    h = jnp.maximum(h * p['bn1s'] + p['bn1b'], 0.0)
    g = jnp.einsum('ij,bjd->bid', p['adj'], h @ p['wgc2']) + p['bgc2'] + res
    heads = [g]
    for k in range(N_HEADS):
        Wh = g @ p['watt'][k]
        f1 = jnp.einsum('bnd,d->bn', Wh, p['a1'][k, 0])
        f2 = jnp.einsum('bnd,d->bn', Wh, p['a2'][k, 0])
        e = f1[:, :, None] + f2[:, None, :]
        e = jnp.where(e > 0, e, 0.01 * e)
        attn = jax.nn.softmax(e, axis=-1)
        heads.append(jnp.einsum('bij,bjd->bid', attn, Wh))
    out = jnp.concatenate(heads, axis=-1) @ p['wout']
    feat = out.reshape(b, t, n * C_HID)
    z = jnp.maximum((feat @ p['wconv']) * p['bn2s'] + p['bn2b'], 0.0)
    zm = jnp.mean(z, axis=1)
    return zm @ p['wlin'] + p['blin']


# -----------------------------------------------------------------------------
# Deterministic parameter construction (synthetic; no checkpoint / .npy load).
# -----------------------------------------------------------------------------
def make_params(key):
    ks = jax.random.split(key, 20)
    f32 = jnp.float32

    def rn(k, shape, scale=0.1):
        return (scale * jax.random.normal(k, shape)).astype(f32)

    def bn_affine(k, dim, eps=1e-5):
        k1, k2, k3, k4 = jax.random.split(k, 4)
        gamma = 1.0 + 0.1 * jax.random.normal(k1, (dim,))
        beta = 0.1 * jax.random.normal(k2, (dim,))
        mean = 0.1 * jax.random.normal(k3, (dim,))
        var = 1.0 + 0.1 * jnp.abs(jax.random.normal(k4, (dim,)))
        scale = gamma / jnp.sqrt(var + eps)
        shift = beta - mean * scale
        return scale.reshape(1, dim).astype(f32), shift.reshape(1, dim).astype(f32)

    adj_raw = jnp.abs(jax.random.normal(ks[0], (N_NODES, N_NODES))) + jnp.eye(N_NODES)
    adj = (adj_raw / jnp.sum(adj_raw, axis=1, keepdims=True)).astype(f32)

    bn1s, bn1b = bn_affine(ks[9], C_HID)
    bn2s, bn2b = bn_affine(ks[10], C_CONV)

    return dict(
        adj=adj,
        wres=rn(ks[1], (C_IN, C_HID)),      bres=rn(ks[2], (1, C_HID), 0.05),
        wgc1=rn(ks[3], (C_IN, C_HID)),      bgc1=rn(ks[4], (1, C_HID), 0.05),
        wgc2=rn(ks[5], (C_HID, C_HID)),     bgc2=rn(ks[6], (1, C_HID), 0.05),
        bn1s=bn1s, bn1b=bn1b,
        watt=rn(ks[7], (N_HEADS, C_HID, C_HID)),
        a1=rn(ks[8], (N_HEADS, 1, C_HID)),
        a2=rn(ks[11], (N_HEADS, 1, C_HID)),
        wout=rn(ks[12], (N_HEADS * C_HID + C_HID, C_HID)),   # torch: (160, 32)
        wconv=rn(ks[13], (FEAT, C_CONV)),
        bn2s=bn2s, bn2b=bn2b,
        wlin=rn(ks[14], (C_CONV, N_CLS)),   blin=rn(ks[15], (1, N_CLS), 0.05),
    )


if __name__ == "__main__":
    b, t = 2, 8
    x = jax.random.normal(jax.random.PRNGKey(0), (b, t, N_NODES, C_IN),
                          dtype=jnp.float32)
    params = make_params(jax.random.PRNGKey(42))

    fwd = jax.jit(auwgcn_forward)
    out = jax.block_until_ready(fwd(x, params))
    assert out.shape == (b, N_CLS)

    ref = reference_forward(x, params)
    np.testing.assert_allclose(np.asarray(out), np.asarray(ref),
                               rtol=1e-2, atol=1e-2)
    print("KERNEL_OK")
</pallas_src>

<mosaic_0001>
module attributes {stable_mosaic.version = 11 : i64} {
  func.func @gcn_attn_conv_kernel(%arg0: i32, %arg1: memref<96x32xbf16, #tpu.memory_space<vmem>>, %arg2: memref<96x32xf32, #tpu.memory_space<vmem>>, %arg3: memref<96x96xbf16, #tpu.memory_space<vmem>>, %arg4: memref<96x96xf32, #tpu.memory_space<vmem>>, %arg5: memref<32x32xf32, #tpu.memory_space<vmem>>, %arg6: memref<1x32xf32, #tpu.memory_space<vmem>>, %arg7: memref<1x32xf32, #tpu.memory_space<vmem>>, %arg8: memref<1x32xf32, #tpu.memory_space<vmem>>, %arg9: memref<32x128xf32, #tpu.memory_space<vmem>>, %arg10: memref<128x4xf32, #tpu.memory_space<vmem>>, %arg11: memref<4x128xf32, #tpu.memory_space<vmem>>, %arg12: memref<4x32x32xf32, #tpu.memory_space<vmem>>, %arg13: memref<32x32xf32, #tpu.memory_space<vmem>>, %arg14: memref<12x32x128xf32, #tpu.memory_space<vmem>>, %arg15: memref<1x128xf32, #tpu.memory_space<vmem>>, %arg16: memref<1x128xf32, #tpu.memory_space<vmem>>, %arg17: memref<8x128xf32, #tpu.memory_space<vmem>>) attributes {dimension_semantics = [#tpu.dimension_semantics<parallel>], iteration_bounds = array<i64: 2>, scalar_prefetch = 0 : i64, scratch_operands = 0 : i64, tpu.core_type = #tpu.core_type<tc>, window_params = [{transform_indices = @transform_0, window_bounds = array<i64: 96, 32>}, {transform_indices = @transform_1, window_bounds = array<i64: 96, 32>}, {pipeline_mode = #tpu.pipeline_mode<synchronous>, transform_indices = @transform_2, window_bounds = array<i64: 96, 96>}, {pipeline_mode = #tpu.pipeline_mode<synchronous>, transform_indices = @transform_3, window_bounds = array<i64: 96, 96>}, {pipeline_mode = #tpu.pipeline_mode<synchronous>, transform_indices = @transform_4, window_bounds = array<i64: 32, 32>}, {pipeline_mode = #tpu.pipeline_mode<synchronous>, transform_indices = @transform_5, window_bounds = array<i64: 1, 32>}, {pipeline_mode = #tpu.pipeline_mode<synchronous>, transform_indices = @transform_6, window_bounds = array<i64: 1, 32>}, {pipeline_mode = #tpu.pipeline_mode<synchronous>, transform_indices = @transform_7, window_bounds = array<i64: 1, 32>}, {pipeline_mode = #tpu.pipeline_mode<synchronous>, transform_indices = @transform_8, window_bounds = array<i64: 32, 128>}, {pipeline_mode = #tpu.pipeline_mode<synchronous>, transform_indices = @transform_9, window_bounds = array<i64: 128, 4>}, {pipeline_mode = #tpu.pipeline_mode<synchronous>, transform_indices = @transform_10, window_bounds = array<i64: 4, 128>}, {pipeline_mode = #tpu.pipeline_mode<synchronous>, transform_indices = @transform_11, window_bounds = array<i64: 4, 32, 32>}, {pipeline_mode = #tpu.pipeline_mode<synchronous>, transform_indices = @transform_12, window_bounds = array<i64: 32, 32>}, {pipeline_mode = #tpu.pipeline_mode<synchronous>, transform_indices = @transform_13, window_bounds = array<i64: 12, 32, 128>}, {pipeline_mode = #tpu.pipeline_mode<synchronous>, transform_indices = @transform_14, window_bounds = array<i64: 1, 128>}, {pipeline_mode = #tpu.pipeline_mode<synchronous>, transform_indices = @transform_15, window_bounds = array<i64: 1, 128>}, {transform_indices = @transform_16, window_bounds = array<i64: 8, 128>}]} {
    %c0 = arith.constant 0 : index
    %c0_0 = arith.constant 0 : index
    %0 = vector.load %arg3[%c0, %c0_0] : memref<96x96xbf16, #tpu.memory_space<vmem>>, vector<96x96xbf16>
    %c0_1 = arith.constant 0 : index
    %c0_2 = arith.constant 0 : index
    %1 = vector.load %arg1[%c0_1, %c0_2] : memref<96x32xbf16, #tpu.memory_space<vmem>>, vector<96x32xbf16>
    %cst = arith.constant dense<0.000000e+00> : vector<96x32xf32>
    %2 = tpu.matmul %0, %1, %cst {dimension_numbers = #tpu.dot_dimension_numbers<[1], [0], [0], [1], [0, 0, 1, 1], [], []>} : vector<96x96xbf16>, vector<96x32xbf16>, vector<96x32xf32> -> vector<96x32xf32>
    %c0_3 = arith.constant 0 : index
    %c0_4 = arith.constant 0 : index
    %3 = vector.load %arg6[%c0_3, %c0_4] : memref<1x32xf32, #tpu.memory_space<vmem>>, vector<1x32xf32>
    %4 = vector.broadcast %3 : vector<1x32xf32> to vector<96x32xf32>
    %5 = arith.mulf %2, %4 : vector<96x32xf32>
    %c0_5 = arith.constant 0 : index
    %c0_6 = arith.constant 0 : index
    %6 = vector.load %arg7[%c0_5, %c0_6] : memref<1x32xf32, #tpu.memory_space<vmem>>, vector<1x32xf32>
    %7 = vector.broadcast %6 : vector<1x32xf32> to vector<96x32xf32>
    %8 = arith.addf %5, %7 : vector<96x32xf32>
    %cst_7 = arith.constant 0.000000e+00 : f32
    %9 = vector.broadcast %cst_7 : f32 to vector<96x32xf32>
    %10 = arith.maximumf %8, %9 : vector<96x32xf32>
    %c0_8 = arith.constant 0 : index
    %c0_9 = arith.constant 0 : index
    %11 = vector.load %arg5[%c0_8, %c0_9] : memref<32x32xf32, #tpu.memory_space<vmem>>, vector<32x32xf32>
    %cst_10 = arith.constant dense<0.000000e+00> : vector<96x32xf32>
    %12 = tpu.matmul %10, %11, %cst_10 {dimension_numbers = #tpu.dot_dimension_numbers<[1], [0], [0], [1], [0, 0, 1, 1], [], []>} : vector<96x32xf32>, vector<32x32xf32>, vector<96x32xf32> -> vector<96x32xf32>
    %13 = arith.truncf %12 : vector<96x32xf32> to vector<96x32xbf16>
    %cst_11 = arith.constant dense<0.000000e+00> : vector<96x32xf32>
    %14 = tpu.matmul %0, %13, %cst_11 {dimension_numbers = #tpu.dot_dimension_numbers<[1], [0], [0], [1], [0, 0, 1, 1], [], []>} : vector<96x96xbf16>, vector<96x32xbf16>, vector<96x32xf32> -> vector<96x32xf32>
    %c0_12 = arith.constant 0 : index
    %c0_13 = arith.constant 0 : index
    %15 = vector.load %arg2[%c0_12, %c0_13] : memref<96x32xf32, #tpu.memory_space<vmem>>, vector<96x32xf32>
    %16 = arith.addf %14, %15 : vector<96x32xf32>
    %c0_14 = arith.constant 0 : index
    %c0_15 = arith.constant 0 : index
    %17 = vector.load %arg8[%c0_14, %c0_15] : memref<1x32xf32, #tpu.memory_space<vmem>>, vector<1x32xf32>
    %18 = vector.broadcast %17 : vector<1x32xf32> to vector<96x32xf32>
    %19 = arith.addf %16, %18 : vector<96x32xf32>
    %c0_16 = arith.constant 0 : index
    %c0_17 = arith.constant 0 : index
    %20 = vector.load %arg9[%c0_16, %c0_17] : memref<32x128xf32, #tpu.memory_space<vmem>>, vector<32x128xf32>
    %cst_18 = arith.constant dense<0.000000e+00> : vector<96x128xf32>
    %21 = tpu.matmul %19, %20, %cst_18 {dimension_numbers = #tpu.dot_dimension_numbers<[1], [0], [0], [1], [0, 0, 1, 1], [], []>} : vector<96x32xf32>, vector<32x128xf32>, vector<96x128xf32> -> vector<96x128xf32>
    %c0_19 = arith.constant 0 : index
    %c0_20 = arith.constant 0 : index
    %22 = vector.load %arg10[%c0_19, %c0_20] : memref<128x4xf32, #tpu.memory_space<vmem>>, vector<128x4xf32>
    %cst_21 = arith.constant dense<0.000000e+00> : vector<96x4xf32>
    %23 = tpu.matmul %21, %22, %cst_21 {dimension_numbers = #tpu.dot_dimension_numbers<[1], [0], [0], [1], [0, 0, 1, 1], [], []>} : vector<96x128xf32>, vector<128x4xf32>, vector<96x4xf32> -> vector<96x4xf32>
    %c0_22 = arith.constant 0 : index
    %c0_23 = arith.constant 0 : index
    %24 = vector.load %arg11[%c0_22, %c0_23] : memref<4x128xf32, #tpu.memory_space<vmem>>, vector<4x128xf32>
    %cst_24 = arith.constant dense<0.000000e+00> : vector<4x96xf32>
    %25 = tpu.matmul %24, %21, %cst_24 {dimension_numbers = #tpu.dot_dimension_numbers<[1], [1], [0], [0], [0, 0, 1, 0], [], []>} : vector<4x128xf32>, vector<96x128xf32>, vector<4x96xf32> -> vector<4x96xf32>
    %c0_25 = arith.constant 0 : index
    %c0_26 = arith.constant 0 : index
    %26 = vector.load %arg4[%c0_25, %c0_26] : memref<96x96xf32, #tpu.memory_space<vmem>>, vector<96x96xf32>
    %c0_27 = arith.constant 0 : index
    %c0_28 = arith.constant 0 : index
    %27 = vector.load %arg13[%c0_27, %c0_28] : memref<32x32xf32, #tpu.memory_space<vmem>>, vector<32x32xf32>
    %cst_29 = arith.constant dense<0.000000e+00> : vector<96x32xf32>
    %28 = tpu.matmul %19, %27, %cst_29 {dimension_numbers = #tpu.dot_dimension_numbers<[1], [0], [0], [1], [0, 0, 1, 1], [], []>} : vector<96x32xf32>, vector<32x32xf32>, vector<96x32xf32> -> vector<96x32xf32>
    %29 = vector.extract_strided_slice %23 {offsets = [0, 0], sizes = [96, 1], strides = [1, 1]} : vector<96x4xf32> to vector<96x1xf32>
    %30 = vector.extract_strided_slice %25 {offsets = [0, 0], sizes = [1, 96], strides = [1, 1]} : vector<4x96xf32> to vector<1x96xf32>
    %31 = vector.broadcast %29 : vector<96x1xf32> to vector<96x96xf32>
    %32 = vector.broadcast %30 : vector<1x96xf32> to vector<96x96xf32>
    %33 = arith.addf %31, %32 : vector<96x96xf32>
    %cst_30 = arith.constant 0.000000e+00 : f32
    %34 = vector.broadcast %cst_30 : f32 to vector<96x96xf32>
    %35 = arith.cmpf ogt, %33, %34 : vector<96x96xf32>
    %cst_31 = arith.constant 0.00999999977 : f32
    %36 = vector.broadcast %cst_31 : f32 to vector<96x96xf32>
    %37 = arith.mulf %36, %33 : vector<96x96xf32>
    %38 = arith.select %35, %33, %37 : vector<96x96xi1>, vector<96x96xf32>
    %39 = arith.addf %38, %26 : vector<96x96xf32>
    %cst_32 = arith.constant dense<0xFF800000> : vector<96xf32>
    %40 = vector.multi_reduction <maximumf>, %39, %cst_32 [1] : vector<96x96xf32> to vector<96xf32>
    %41 = vector.shape_cast %40 : vector<96xf32> to vector<96x1xf32>
    %42 = vector.broadcast %41 : vector<96x1xf32> to vector<96x96xf32>
    %43 = arith.subf %39, %42 : vector<96x96xf32>
    %44 = math.exp %43 : vector<96x96xf32>
    %cst_33 = arith.constant dense<0.000000e+00> : vector<96xf32>
    %45 = vector.multi_reduction <add>, %44, %cst_33 [1] : vector<96x96xf32> to vector<96xf32>
    %46 = vector.shape_cast %45 : vector<96xf32> to vector<96x1xf32>
    %47 = tpu.reciprocal %46 : vector<96x1xf32> -> vector<96x1xf32>
    %48 = vector.broadcast %47 : vector<96x1xf32> to vector<96x96xf32>
    %49 = arith.mulf %44, %48 : vector<96x96xf32>
    %c0_34 = arith.constant 0 : index
    %c0_35 = arith.constant 0 : index
    %c0_36 = arith.constant 0 : index
    %50 = vector.load %arg12[%c0_34, %c0_35, %c0_36] : memref<4x32x32xf32, #tpu.memory_space<vmem>>, vector<1x32x32xf32>
    %51 = vector.shape_cast %50 : vector<1x32x32xf32> to vector<32x32xf32>
    %cst_37 = arith.constant dense<0.000000e+00> : vector<96x32xf32>
    %52 = tpu.matmul %19, %51, %cst_37 {dimension_numbers = #tpu.dot_dimension_numbers<[1], [0], [0], [1], [0, 0, 1, 1], [], []>} : vector<96x32xf32>, vector<32x32xf32>, vector<96x32xf32> -> vector<96x32xf32>
    %53 = arith.truncf %49 : vector<96x96xf32> to vector<96x96xbf16>
    %54 = arith.truncf %52 : vector<96x32xf32> to vector<96x32xbf16>
    %cst_38 = arith.constant dense<0.000000e+00> : vector<96x32xf32>
    %55 = tpu.matmul %53, %54, %cst_38 {dimension_numbers = #tpu.dot_dimension_numbers<[1], [0], [0], [1], [0, 0, 1, 1], [], []>} : vector<96x96xbf16>, vector<96x32xbf16>, vector<96x32xf32> -> vector<96x32xf32>
    %56 = arith.addf %28, %55 : vector<96x32xf32>
    %57 = vector.extract_strided_slice %23 {offsets = [0, 1], sizes = [96, 1], strides = [1, 1]} : vector<96x4xf32> to vector<96x1xf32>
    %58 = vector.extract_strided_slice %25 {offsets = [1, 0], sizes = [1, 96], strides = [1, 1]} : vector<4x96xf32> to vector<1x96xf32>
    %59 = vector.broadcast %57 : vector<96x1xf32> to vector<96x96xf32>
    %60 = vector.broadcast %58 : vector<1x96xf32> to vector<96x96xf32>
    %61 = arith.addf %59, %60 : vector<96x96xf32>
    %cst_39 = arith.constant 0.000000e+00 : f32
    %62 = vector.broadcast %cst_39 : f32 to vector<96x96xf32>
    %63 = arith.cmpf ogt, %61, %62 : vector<96x96xf32>
    %cst_40 = arith.constant 0.00999999977 : f32
    %64 = vector.broadcast %cst_40 : f32 to vector<96x96xf32>
    %65 = arith.mulf %64, %61 : vector<96x96xf32>
    %66 = arith.select %63, %61, %65 : vector<96x96xi1>, vector<96x96xf32>
    %67 = arith.addf %66, %26 : vector<96x96xf32>
    %cst_41 = arith.constant dense<0xFF800000> : vector<96xf32>
    %68 = vector.multi_reduction <maximumf>, %67, %cst_41 [1] : vector<96x96xf32> to vector<96xf32>
    %69 = vector.shape_cast %68 : vector<96xf32> to vector<96x1xf32>
    %70 = vector.broadcast %69 : vector<96x1xf32> to vector<96x96xf32>
    %71 = arith.subf %67, %70 : vector<96x96xf32>
    %72 = math.exp %71 : vector<96x96xf32>
    %cst_42 = arith.constant dense<0.000000e+00> : vector<96xf32>
    %73 = vector.multi_reduction <add>, %72, %cst_42 [1] : vector<96x96xf32> to vector<96xf32>
    %74 = vector.shape_cast %73 : vector<96xf32> to vector<96x1xf32>
    %75 = tpu.reciprocal %74 : vector<96x1xf32> -> vector<96x1xf32>
    %76 = vector.broadcast %75 : vector<96x1xf32> to vector<96x96xf32>
    %77 = arith.mulf %72, %76 : vector<96x96xf32>
    %c1 = arith.constant 1 : index
    %c0_43 = arith.constant 0 : index
    %c0_44 = arith.constant 0 : index
    %78 = vector.load %arg12[%c1, %c0_43, %c0_44] : memref<4x32x32xf32, #tpu.memory_space<vmem>>, vector<1x32x32xf32>
    %79 = vector.shape_cast %78 : vector<1x32x32xf32> to vector<32x32xf32>
    %cst_45 = arith.constant dense<0.000000e+00> : vector<96x32xf32>
    %80 = tpu.matmul %19, %79, %cst_45 {dimension_numbers = #tpu.dot_dimension_numbers<[1], [0], [0], [1], [0, 0, 1, 1], [], []>} : vector<96x32xf32>, vector<32x32xf32>, vector<96x32xf32> -> vector<96x32xf32>
    %81 = arith.truncf %77 : vector<96x96xf32> to vector<96x96xbf16>
    %82 = arith.truncf %80 : vector<96x32xf32> to vector<96x32xbf16>
    %cst_46 = arith.constant dense<0.000000e+00> : vector<96x32xf32>
    %83 = tpu.matmul %81, %82, %cst_46 {dimension_numbers = #tpu.dot_dimension_numbers<[1], [0], [0], [1], [0, 0, 1, 1], [], []>} : vector<96x96xbf16>, vector<96x32xbf16>, vector<96x32xf32> -> vector<96x32xf32>
    %84 = arith.addf %56, %83 : vector<96x32xf32>
    %85 = vector.extract_strided_slice %23 {offsets = [0, 2], sizes = [96, 1], strides = [1, 1]} : vector<96x4xf32> to vector<96x1xf32>
    %86 = vector.extract_strided_slice %25 {offsets = [2, 0], sizes = [1, 96], strides = [1, 1]} : vector<4x96xf32> to vector<1x96xf32>
    %87 = vector.broadcast %85 : vector<96x1xf32> to vector<96x96xf32>
    %88 = vector.broadcast %86 : vector<1x96xf32> to vector<96x96xf32>
    %89 = arith.addf %87, %88 : vector<96x96xf32>
    %cst_47 = arith.constant 0.000000e+00 : f32
    %90 = vector.broadcast %cst_47 : f32 to vector<96x96xf32>
    %91 = arith.cmpf ogt, %89, %90 : vector<96x96xf32>
    %cst_48 = arith.constant 0.00999999977 : f32
    %92 = vector.broadcast %cst_48 : f32 to vector<96x96xf32>
    %93 = arith.mulf %92, %89 : vector<96x96xf32>
    %94 = arith.select %91, %89, %93 : vector<96x96xi1>, vector<96x96xf32>
    %95 = arith.addf %94, %26 : vector<96x96xf32>
    %cst_49 = arith.constant dense<0xFF800000> : vector<96xf32>
    %96 = vector.multi_reduction <maximumf>, %95, %cst_49 [1] : vector<96x96xf32> to vector<96xf32>
    %97 = vector.shape_cast %96 : vector<96xf32> to vector<96x1xf32>
    %98 = vector.broadcast %97 : vector<96x1xf32> to vector<96x96xf32>
    %99 = arith.subf %95, %98 : vector<96x96xf32>
    %100 = math.exp %99 : vector<96x96xf32>
    %cst_50 = arith.constant dense<0.000000e+00> : vector<96xf32>
    %101 = vector.multi_reduction <add>, %100, %cst_50 [1] : vector<96x96xf32> to vector<96xf32>
    %102 = vector.shape_cast %101 : vector<96xf32> to vector<96x1xf32>
    %103 = tpu.reciprocal %102 : vector<96x1xf32> -> vector<96x1xf32>
    %104 = vector.broadcast %103 : vector<96x1xf32> to vector<96x96xf32>
    %105 = arith.mulf %100, %104 : vector<96x96xf32>
    %c2 = arith.constant 2 : index
    %c0_51 = arith.constant 0 : index
    %c0_52 = arith.constant 0 : index
    %106 = vector.load %arg12[%c2, %c0_51, %c0_52] : memref<4x32x32xf32, #tpu.memory_space<vmem>>, vector<1x32x32xf32>
    %107 = vector.shape_cast %106 : vector<1x32x32xf32> to vector<32x32xf32>
    %cst_53 = arith.constant dense<0.000000e+00> : vector<96x32xf32>
    %108 = tpu.matmul %19, %107, %cst_53 {dimension_numbers = #tpu.dot_dimension_numbers<[1], [0], [0], [1], [0, 0, 1, 1], [], []>} : vector<96x32xf32>, vector<32x32xf32>, vector<96x32xf32> -> vector<96x32xf32>
    %109 = arith.truncf %105 : vector<96x96xf32> to vector<96x96xbf16>
    %110 = arith.truncf %108 : vector<96x32xf32> to vector<96x32xbf16>
    %cst_54 = arith.constant dense<0.000000e+00> : vector<96x32xf32>
    %111 = tpu.matmul %109, %110, %cst_54 {dimension_numbers = #tpu.dot_dimension_numbers<[1], [0], [0], [1], [0, 0, 1, 1], [], []>} : vector<96x96xbf16>, vector<96x32xbf16>, vector<96x32xf32> -> vector<96x32xf32>
    %112 = arith.addf %84, %111 : vector<96x32xf32>
    %113 = vector.extract_strided_slice %23 {offsets = [0, 3], sizes = [96, 1], strides = [1, 1]} : vector<96x4xf32> to vector<96x1xf32>
    %114 = vector.extract_strided_slice %25 {offsets = [3, 0], sizes = [1, 96], strides = [1, 1]} : vector<4x96xf32> to vector<1x96xf32>
    %115 = vector.broadcast %113 : vector<96x1xf32> to vector<96x96xf32>
    %116 = vector.broadcast %114 : vector<1x96xf32> to vector<96x96xf32>
    %117 = arith.addf %115, %116 : vector<96x96xf32>
    %cst_55 = arith.constant 0.000000e+00 : f32
    %118 = vector.broadcast %cst_55 : f32 to vector<96x96xf32>
    %119 = arith.cmpf ogt, %117, %118 : vector<96x96xf32>
    %cst_56 = arith.constant 0.00999999977 : f32
    %120 = vector.broadcast %cst_56 : f32 to vector<96x96xf32>
    %121 = arith.mulf %120, %117 : vector<96x96xf32>
    %122 = arith.select %119, %117, %121 : vector<96x96xi1>, vector<96x96xf32>
    %123 = arith.addf %122, %26 : vector<96x96xf32>
    %cst_57 = arith.constant dense<0xFF800000> : vector<96xf32>
    %124 = vector.multi_reduction <maximumf>, %123, %cst_57 [1] : vector<96x96xf32> to vector<96xf32>
    %125 = vector.shape_cast %124 : vector<96xf32> to vector<96x1xf32>
    %126 = vector.broadcast %125 : vector<96x1xf32> to vector<96x96xf32>
    %127 = arith.subf %123, %126 : vector<96x96xf32>
    %128 = math.exp %127 : vector<96x96xf32>
    %cst_58 = arith.constant dense<0.000000e+00> : vector<96xf32>
    %129 = vector.multi_reduction <add>, %128, %cst_58 [1] : vector<96x96xf32> to vector<96xf32>
    %130 = vector.shape_cast %129 : vector<96xf32> to vector<96x1xf32>
    %131 = tpu.reciprocal %130 : vector<96x1xf32> -> vector<96x1xf32>
    %132 = vector.broadcast %131 : vector<96x1xf32> to vector<96x96xf32>
    %133 = arith.mulf %128, %132 : vector<96x96xf32>
    %c3 = arith.constant 3 : index
    %c0_59 = arith.constant 0 : index
    %c0_60 = arith.constant 0 : index
    %134 = vector.load %arg12[%c3, %c0_59, %c0_60] : memref<4x32x32xf32, #tpu.memory_space<vmem>>, vector<1x32x32xf32>
    %135 = vector.shape_cast %134 : vector<1x32x32xf32> to vector<32x32xf32>
    %cst_61 = arith.constant dense<0.000000e+00> : vector<96x32xf32>
    %136 = tpu.matmul %19, %135, %cst_61 {dimension_numbers = #tpu.dot_dimension_numbers<[1], [0], [0], [1], [0, 0, 1, 1], [], []>} : vector<96x32xf32>, vector<32x32xf32>, vector<96x32xf32> -> vector<96x32xf32>
    %137 = arith.truncf %133 : vector<96x96xf32> to vector<96x96xbf16>
    %138 = arith.truncf %136 : vector<96x32xf32> to vector<96x32xbf16>
    %cst_62 = arith.constant dense<0.000000e+00> : vector<96x32xf32>
    %139 = tpu.matmul %137, %138, %cst_62 {dimension_numbers = #tpu.dot_dimension_numbers<[1], [0], [0], [1], [0, 0, 1, 1], [], []>} : vector<96x96xbf16>, vector<96x32xbf16>, vector<96x32xf32> -> vector<96x32xf32>
    %140 = arith.addf %112, %139 : vector<96x32xf32>
    %cst_63 = arith.constant 0.000000e+00 : f32
    %141 = vector.broadcast %cst_63 : f32 to vector<8x128xf32>
    %142 = vector.extract_strided_slice %140 {offsets = [0, 0], sizes = [8, 32], strides = [1, 1]} : vector<96x32xf32> to vector<8x32xf32>
    %c0_64 = arith.constant 0 : index
    %c0_65 = arith.constant 0 : index
    %c0_66 = arith.constant 0 : index
    %143 = vector.load %arg14[%c0_64, %c0_65, %c0_66] : memref<12x32x128xf32, #tpu.memory_space<vmem>>, vector<1x32x128xf32>
    %144 = vector.shape_cast %143 : vector<1x32x128xf32> to vector<32x128xf32>
    %cst_67 = arith.constant dense<0.000000e+00> : vector<8x128xf32>
    %145 = tpu.matmul %142, %144, %cst_67 {dimension_numbers = #tpu.dot_dimension_numbers<[1], [0], [0], [1], [0, 0, 1, 1], [], []>} : vector<8x32xf32>, vector<32x128xf32>, vector<8x128xf32> -> vector<8x128xf32>
    %146 = arith.addf %141, %145 : vector<8x128xf32>
    %147 = vector.extract_strided_slice %140 {offsets = [8, 0], sizes = [8, 32], strides = [1, 1]} : vector<96x32xf32> to vector<8x32xf32>
    %c1_68 = arith.constant 1 : index
    %c0_69 = arith.constant 0 : index
    %c0_70 = arith.constant 0 : index
    %148 = vector.load %arg14[%c1_68, %c0_69, %c0_70] : memref<12x32x128xf32, #tpu.memory_space<vmem>>, vector<1x32x128xf32>
    %149 = vector.shape_cast %148 : vector<1x32x128xf32> to vector<32x128xf32>
    %cst_71 = arith.constant dense<0.000000e+00> : vector<8x128xf32>
    %150 = tpu.matmul %147, %149, %cst_71 {dimension_numbers = #tpu.dot_dimension_numbers<[1], [0], [0], [1], [0, 0, 1, 1], [], []>} : vector<8x32xf32>, vector<32x128xf32>, vector<8x128xf32> -> vector<8x128xf32>
    %151 = arith.addf %146, %150 : vector<8x128xf32>
    %152 = vector.extract_strided_slice %140 {offsets = [16, 0], sizes = [8, 32], strides = [1, 1]} : vector<96x32xf32> to vector<8x32xf32>
    %c2_72 = arith.constant 2 : index
    %c0_73 = arith.constant 0 : index
    %c0_74 = arith.constant 0 : index
    %153 = vector.load %arg14[%c2_72, %c0_73, %c0_74] : memref<12x32x128xf32, #tpu.memory_space<vmem>>, vector<1x32x128xf32>
    %154 = vector.shape_cast %153 : vector<1x32x128xf32> to vector<32x128xf32>
    %cst_75 = arith.constant dense<0.000000e+00> : vector<8x128xf32>
    %155 = tpu.matmul %152, %154, %cst_75 {dimension_numbers = #tpu.dot_dimension_numbers<[1], [0], [0], [1], [0, 0, 1, 1], [], []>} : vector<8x32xf32>, vector<32x128xf32>, vector<8x128xf32> -> vector<8x128xf32>
    %156 = arith.addf %151, %155 : vector<8x128xf32>
    %157 = vector.extract_strided_slice %140 {offsets = [24, 0], sizes = [8, 32], strides = [1, 1]} : vector<96x32xf32> to vector<8x32xf32>
    %c3_76 = arith.constant 3 : index
    %c0_77 = arith.constant 0 : index
    %c0_78 = arith.constant 0 : index
    %158 = vector.load %arg14[%c3_76, %c0_77, %c0_78] : memref<12x32x128xf32, #tpu.memory_space<vmem>>, vector<1x32x128xf32>
    %159 = vector.shape_cast %158 : vector<1x32x128xf32> to vector<32x128xf32>
    %cst_79 = arith.constant dense<0.000000e+00> : vector<8x128xf32>
    %160 = tpu.matmul %157, %159, %cst_79 {dimension_numbers = #tpu.dot_dimension_numbers<[1], [0], [0], [1], [0, 0, 1, 1], [], []>} : vector<8x32xf32>, vector<32x128xf32>, vector<8x128xf32> -> vector<8x128xf32>
    %161 = arith.addf %156, %160 : vector<8x128xf32>
    %162 = vector.extract_strided_slice %140 {offsets = [32, 0], sizes = [8, 32], strides = [1, 1]} : vector<96x32xf32> to vector<8x32xf32>
    %c4 = arith.constant 4 : index
    %c0_80 = arith.constant 0 : index
    %c0_81 = arith.constant 0 : index
    %163 = vector.load %arg14[%c4, %c0_80, %c0_81] : memref<12x32x128xf32, #tpu.memory_space<vmem>>, vector<1x32x128xf32>
    %164 = vector.shape_cast %163 : vector<1x32x128xf32> to vector<32x128xf32>
    %cst_82 = arith.constant dense<0.000000e+00> : vector<8x128xf32>
    %165 = tpu.matmul %162, %164, %cst_82 {dimension_numbers = #tpu.dot_dimension_numbers<[1], [0], [0], [1], [0, 0, 1, 1], [], []>} : vector<8x32xf32>, vector<32x128xf32>, vector<8x128xf32> -> vector<8x128xf32>
    %166 = arith.addf %161, %165 : vector<8x128xf32>
    %167 = vector.extract_strided_slice %140 {offsets = [40, 0], sizes = [8, 32], strides = [1, 1]} : vector<96x32xf32> to vector<8x32xf32>
    %c5 = arith.constant 5 : index
    %c0_83 = arith.constant 0 : index
    %c0_84 = arith.constant 0 : index
    %168 = vector.load %arg14[%c5, %c0_83, %c0_84] : memref<12x32x128xf32, #tpu.memory_space<vmem>>, vector<1x32x128xf32>
    %169 = vector.shape_cast %168 : vector<1x32x128xf32> to vector<32x128xf32>
    %cst_85 = arith.constant dense<0.000000e+00> : vector<8x128xf32>
    %170 = tpu.matmul %167, %169, %cst_85 {dimension_numbers = #tpu.dot_dimension_numbers<[1], [0], [0], [1], [0, 0, 1, 1], [], []>} : vector<8x32xf32>, vector<32x128xf32>, vector<8x128xf32> -> vector<8x128xf32>
    %171 = arith.addf %166, %170 : vector<8x128xf32>
    %172 = vector.extract_strided_slice %140 {offsets = [48, 0], sizes = [8, 32], strides = [1, 1]} : vector<96x32xf32> to vector<8x32xf32>
    %c6 = arith.constant 6 : index
    %c0_86 = arith.constant 0 : index
    %c0_87 = arith.constant 0 : index
    %173 = vector.load %arg14[%c6, %c0_86, %c0_87] : memref<12x32x128xf32, #tpu.memory_space<vmem>>, vector<1x32x128xf32>
    %174 = vector.shape_cast %173 : vector<1x32x128xf32> to vector<32x128xf32>
    %cst_88 = arith.constant dense<0.000000e+00> : vector<8x128xf32>
    %175 = tpu.matmul %172, %174, %cst_88 {dimension_numbers = #tpu.dot_dimension_numbers<[1], [0], [0], [1], [0, 0, 1, 1], [], []>} : vector<8x32xf32>, vector<32x128xf32>, vector<8x128xf32> -> vector<8x128xf32>
    %176 = arith.addf %171, %175 : vector<8x128xf32>
    %177 = vector.extract_strided_slice %140 {offsets = [56, 0], sizes = [8, 32], strides = [1, 1]} : vector<96x32xf32> to vector<8x32xf32>
    %c7 = arith.constant 7 : index
    %c0_89 = arith.constant 0 : index
    %c0_90 = arith.constant 0 : index
    %178 = vector.load %arg14[%c7, %c0_89, %c0_90] : memref<12x32x128xf32, #tpu.memory_space<vmem>>, vector<1x32x128xf32>
    %179 = vector.shape_cast %178 : vector<1x32x128xf32> to vector<32x128xf32>
    %cst_91 = arith.constant dense<0.000000e+00> : vector<8x128xf32>
    %180 = tpu.matmul %177, %179, %cst_91 {dimension_numbers = #tpu.dot_dimension_numbers<[1], [0], [0], [1], [0, 0, 1, 1], [], []>} : vector<8x32xf32>, vector<32x128xf32>, vector<8x128xf32> -> vector<8x128xf32>
    %181 = arith.addf %176, %180 : vector<8x128xf32>
    %182 = vector.extract_strided_slice %140 {offsets = [64, 0], sizes = [8, 32], strides = [1, 1]} : vector<96x32xf32> to vector<8x32xf32>
    %c8 = arith.constant 8 : index
    %c0_92 = arith.constant 0 : index
    %c0_93 = arith.constant 0 : index
    %183 = vector.load %arg14[%c8, %c0_92, %c0_93] : memref<12x32x128xf32, #tpu.memory_space<vmem>>, vector<1x32x128xf32>
    %184 = vector.shape_cast %183 : vector<1x32x128xf32> to vector<32x128xf32>
    %cst_94 = arith.constant dense<0.000000e+00> : vector<8x128xf32>
    %185 = tpu.matmul %182, %184, %cst_94 {dimension_numbers = #tpu.dot_dimension_numbers<[1], [0], [0], [1], [0, 0, 1, 1], [], []>} : vector<8x32xf32>, vector<32x128xf32>, vector<8x128xf32> -> vector<8x128xf32>
    %186 = arith.addf %181, %185 : vector<8x128xf32>
    %187 = vector.extract_strided_slice %140 {offsets = [72, 0], sizes = [8, 32], strides = [1, 1]} : vector<96x32xf32> to vector<8x32xf32>
    %c9 = arith.constant 9 : index
    %c0_95 = arith.constant 0 : index
    %c0_96 = arith.constant 0 : index
    %188 = vector.load %arg14[%c9, %c0_95, %c0_96] : memref<12x32x128xf32, #tpu.memory_space<vmem>>, vector<1x32x128xf32>
    %189 = vector.shape_cast %188 : vector<1x32x128xf32> to vector<32x128xf32>
    %cst_97 = arith.constant dense<0.000000e+00> : vector<8x128xf32>
    %190 = tpu.matmul %187, %189, %cst_97 {dimension_numbers = #tpu.dot_dimension_numbers<[1], [0], [0], [1], [0, 0, 1, 1], [], []>} : vector<8x32xf32>, vector<32x128xf32>, vector<8x128xf32> -> vector<8x128xf32>
    %191 = arith.addf %186, %190 : vector<8x128xf32>
    %192 = vector.extract_strided_slice %140 {offsets = [80, 0], sizes = [8, 32], strides = [1, 1]} : vector<96x32xf32> to vector<8x32xf32>
    %c10 = arith.constant 10 : index
    %c0_98 = arith.constant 0 : index
    %c0_99 = arith.constant 0 : index
    %193 = vector.load %arg14[%c10, %c0_98, %c0_99] : memref<12x32x128xf32, #tpu.memory_space<vmem>>, vector<1x32x128xf32>
    %194 = vector.shape_cast %193 : vector<1x32x128xf32> to vector<32x128xf32>
    %cst_100 = arith.constant dense<0.000000e+00> : vector<8x128xf32>
    %195 = tpu.matmul %192, %194, %cst_100 {dimension_numbers = #tpu.dot_dimension_numbers<[1], [0], [0], [1], [0, 0, 1, 1], [], []>} : vector<8x32xf32>, vector<32x128xf32>, vector<8x128xf32> -> vector<8x128xf32>
    %196 = arith.addf %191, %195 : vector<8x128xf32>
    %197 = vector.extract_strided_slice %140 {offsets = [88, 0], sizes = [8, 32], strides = [1, 1]} : vector<96x32xf32> to vector<8x32xf32>
    %c11 = arith.constant 11 : index
    %c0_101 = arith.constant 0 : index
    %c0_102 = arith.constant 0 : index
    %198 = vector.load %arg14[%c11, %c0_101, %c0_102] : memref<12x32x128xf32, #tpu.memory_space<vmem>>, vector<1x32x128xf32>
    %199 = vector.shape_cast %198 : vector<1x32x128xf32> to vector<32x128xf32>
    %cst_103 = arith.constant dense<0.000000e+00> : vector<8x128xf32>
    %200 = tpu.matmul %197, %199, %cst_103 {dimension_numbers = #tpu.dot_dimension_numbers<[1], [0], [0], [1], [0, 0, 1, 1], [], []>} : vector<8x32xf32>, vector<32x128xf32>, vector<8x128xf32> -> vector<8x128xf32>
    %201 = arith.addf %196, %200 : vector<8x128xf32>
    %c0_104 = arith.constant 0 : index
    %c0_105 = arith.constant 0 : index
    %202 = vector.load %arg15[%c0_104, %c0_105] : memref<1x128xf32, #tpu.memory_space<vmem>>, vector<1x128xf32>
    %203 = vector.broadcast %202 : vector<1x128xf32> to vector<8x128xf32>
    %204 = arith.mulf %201, %203 : vector<8x128xf32>
    %c0_106 = arith.constant 0 : index
    %c0_107 = arith.constant 0 : index
    %205 = vector.load %arg16[%c0_106, %c0_107] : memref<1x128xf32, #tpu.memory_space<vmem>>, vector<1x128xf32>
    %206 = vector.broadcast %205 : vector<1x128xf32> to vector<8x128xf32>
    %207 = arith.addf %204, %206 : vector<8x128xf32>
    %cst_108 = arith.constant 0.000000e+00 : f32
    %208 = vector.broadcast %cst_108 : f32 to vector<8x128xf32>
    %209 = arith.maximumf %207, %208 : vector<8x128xf32>
    %c0_109 = arith.constant 0 : index
    %c0_110 = arith.constant 0 : index
    %210 = vector.load %arg17[%c0_109, %c0_110] : memref<8x128xf32, #tpu.memory_space<vmem>>, vector<8x128xf32>
    tpu.vector_store %arg17[%c0_109, %c0_110], %209 {strides = array<i32>} : memref<8x128xf32, #tpu.memory_space<vmem>>, vector<8x128xf32>,
    return
  }
  func.func @transform_0(%arg0: i32) -> (i32, i32) {
    %c0_i32 = arith.constant 0 : i32
    %c0_i32_0 = arith.constant 0 : i32
    return %arg0, %c0_i32 : i32, i32
  }
  func.func @transform_1(%arg0: i32) -> (i32, i32) {
    %c0_i32 = arith.constant 0 : i32
    %c0_i32_0 = arith.constant 0 : i32
    return %arg0, %c0_i32 : i32, i32
  }
  func.func @transform_2(%arg0: i32) -> (i32, i32) {
    %c0_i32 = arith.constant 0 : i32
    %c0_i32_0 = arith.constant 0 : i32
    %c0_i32_1 = arith.constant 0 : i32
    return %c0_i32, %c0_i32_0 : i32, i32
  }
  func.func @transform_3(%arg0: i32) -> (i32, i32) {
    %c0_i32 = arith.constant 0 : i32
    %c0_i32_0 = arith.constant 0 : i32
    %c0_i32_1 = arith.constant 0 : i32
    return %c0_i32, %c0_i32_0 : i32, i32
  }
  func.func @transform_4(%arg0: i32) -> (i32, i32) {
    %c0_i32 = arith.constant 0 : i32
    %c0_i32_0 = arith.constant 0 : i32
    %c0_i32_1 = arith.constant 0 : i32
    return %c0_i32, %c0_i32_0 : i32, i32
  }
  func.func @transform_5(%arg0: i32) -> (i32, i32) {
    %c0_i32 = arith.constant 0 : i32
    %c0_i32_0 = arith.constant 0 : i32
    %c0_i32_1 = arith.constant 0 : i32
    return %c0_i32, %c0_i32_0 : i32, i32
  }
  func.func @transform_6(%arg0: i32) -> (i32, i32) {
    %c0_i32 = arith.constant 0 : i32
    %c0_i32_0 = arith.constant 0 : i32
    %c0_i32_1 = arith.constant 0 : i32
    return %c0_i32, %c0_i32_0 : i32, i32
  }
  func.func @transform_7(%arg0: i32) -> (i32, i32) {
    %c0_i32 = arith.constant 0 : i32
    %c0_i32_0 = arith.constant 0 : i32
    %c0_i32_1 = arith.constant 0 : i32
    return %c0_i32, %c0_i32_0 : i32, i32
  }
  func.func @transform_8(%arg0: i32) -> (i32, i32) {
    %c0_i32 = arith.constant 0 : i32
    %c0_i32_0 = arith.constant 0 : i32
    %c0_i32_1 = arith.constant 0 : i32
    return %c0_i32, %c0_i32_0 : i32, i32
  }
  func.func @transform_9(%arg0: i32) -> (i32, i32) {
    %c0_i32 = arith.constant 0 : i32
    %c0_i32_0 = arith.constant 0 : i32
    %c0_i32_1 = arith.constant 0 : i32
    return %c0_i32, %c0_i32_0 : i32, i32
  }
  func.func @transform_10(%arg0: i32) -> (i32, i32) {
    %c0_i32 = arith.constant 0 : i32
    %c0_i32_0 = arith.constant 0 : i32
    %c0_i32_1 = arith.constant 0 : i32
    return %c0_i32, %c0_i32_0 : i32, i32
  }
  func.func @transform_11(%arg0: i32) -> (i32, i32, i32) {
    %c0_i32 = arith.constant 0 : i32
    %c0_i32_0 = arith.constant 0 : i32
    %c0_i32_1 = arith.constant 0 : i32
    %c0_i32_2 = arith.constant 0 : i32
    return %c0_i32, %c0_i32_0, %c0_i32_1 : i32, i32, i32
  }
  func.func @transform_12(%arg0: i32) -> (i32, i32) {
    %c0_i32 = arith.constant 0 : i32
    %c0_i32_0 = arith.constant 0 : i32
    %c0_i32_1 = arith.constant 0 : i32
    return %c0_i32, %c0_i32_0 : i32, i32
  }
  func.func @transform_13(%arg0: i32) -> (i32, i32, i32) {
    %c0_i32 = arith.constant 0 : i32
    %c0_i32_0 = arith.constant 0 : i32
    %c0_i32_1 = arith.constant 0 : i32
    %c0_i32_2 = arith.constant 0 : i32
    return %c0_i32, %c0_i32_0, %c0_i32_1 : i32, i32, i32
  }
  func.func @transform_14(%arg0: i32) -> (i32, i32) {
    %c0_i32 = arith.constant 0 : i32
    %c0_i32_0 = arith.constant 0 : i32
    %c0_i32_1 = arith.constant 0 : i32
    return %c0_i32, %c0_i32_0 : i32, i32
  }
  func.func @transform_15(%arg0: i32) -> (i32, i32) {
    %c0_i32 = arith.constant 0 : i32
    %c0_i32_0 = arith.constant 0 : i32
    %c0_i32_1 = arith.constant 0 : i32
    return %c0_i32, %c0_i32_0 : i32, i32
  }
  func.func @transform_16(%arg0: i32) -> (i32, i32) {
    %c0_i32 = arith.constant 0 : i32
    %c0_i32_0 = arith.constant 0 : i32
    return %arg0, %c0_i32 : i32, i32
  }
}

</mosaic_0001>

<bundles_post_ra>
// kernel: auwgcn_forward.1
= control target key start
LH: loop header
LB: loop body
LE: loop exit
PB: predicated region body
PF: predicated region fallthrough
CT: control target
= control target key end

     0   :  { %s6240_s21 = smov 0   ;;  %s7862_s0 = inlined_call_operand.vmem [shape: bf16[192,32], index: 0, kind: input, shape index: {}]   ;;  %s7863_s1 = inlined_call_operand.vmem [shape: f32[192,32], index: 1, kind: input, shape index: {}]   ;;  %s7864_s2 = inlined_call_operand.vmem [shape: bf16[96,96], index: 2, kind: input, shape index: {}]   ;;  %s7865_s3 = inlined_call_operand.vmem [shape: f32[96,96], index: 3, kind: input, shape index: {}]   ;;  %s7866_s4 = inlined_call_operand.vmem [shape: f32[32,32], index: 4, kind: input, shape index: {}]   ;;  %s7867_s5 = inlined_call_operand.vmem [shape: f32[1,32], index: 5, kind: input, shape index: {}]   ;;  %s7868_s6 = inlined_call_operand.vmem [shape: f32[1,32], index: 6, kind: input, shape index: {}]   ;;  %s7869_s7 = inlined_call_operand.vmem [shape: f32[1,32], index: 7, kind: input, shape index: {}]   ;;  %s7870_s8 = inlined_call_operand.vmem [shape: f32[32,128], index: 8, kind: input, shape index: {}]   ;;  %s7871_s9 = inlined_call_operand.vmem [shape: f32[128,4], index: 9, kind: input, shape index: {}]   ;;  %s7872_s10 = inlined_call_operand.vmem [shape: f32[4,128], index: 10, kind: input, shape index: {}]   ;;  %s7873_s11 = inlined_call_operand.vmem [shape: f32[4,32,32], index: 11, kind: input, shape index: {}]   ;;  %s7874_s12 = inlined_call_operand.vmem [shape: f32[32,32], index: 12, kind: input, shape index: {}]   ;;  %s7875_s13 = inlined_call_operand.vmem [shape: f32[12,32,128], index: 13, kind: input, shape index: {}]   ;;  %s7876_s14 = inlined_call_operand.vmem [shape: f32[1,128], index: 14, kind: input, shape index: {}]   ;;  %s7877_s15 = inlined_call_operand.vmem [shape: f32[1,128], index: 15, kind: input, shape index: {}]   ;;  %s7878_s16 = inlined_call_operand.vmem [shape: f32[16,128], index: 16, kind: output, shape index: {}]  }
   0x1   :  { %7912 = sst [smem:[#allocation45_spill]] %s7862_s0 }
   0x2 LB: > { %s6246_s22 = sadd.s32 4294967295, %s6146_s21   ;;  %p4606_p0 = scmp.ge.s32.totalorder %s6146_s21, 1  ;;  %s6146_s21 = sphi %s6240_s21, %s26_s21  }
   0x3   : > { %p474_p1 = scmp.lt.s32.totalorder %s6146_s21, 3 }
   0x5   : > { %p475_p2 = pnand %p4606_p0, %p474_p1 }
   0x7   : > { %478 = sbr.rel (%p475_p2) target bundleno = 2357 (0x935), region = 84 }
   0xe   : > { %s528_s23 = smul.u32 12, %s6246_s22  ;;  %v6254_v0 = vld [vmem:[%s7864_s2] sm:$0xff]   ;;  %vm635_vm0 = vcmask 785408   ;;  %s7913_s29 = sld [smem:[#allocation45_spill]]  ;;  %v786_v8 = vld [vmem:[%s7866_s4 + $0x8] sm:$0xff]  ;;  %v787_v10 = vld [vmem:[%s7866_s4 + $0x10] sm:$0xff] }
   0xf   : > { %5114 = vmatprep.mubr.msk.bf16.mxu1 %vm635_vm0, %v6254_v0  ;;  %v785_v7 = vld [vmem:[%s7866_s4] sm:$0xff]  ;;  %v788_v11 = vld [vmem:[%s7866_s4 + $0x18] sm:$0xff]  ;;  %v6279_v12 = vld [vmem:[%s7864_s2 + $0x8] sm:$0xff]   ;;  %vm789_vm1 = vcmask 261120   ;;  %vm6149_vm2 = vmmov 0   ;;  %p540_p4 = scmp.lt.s32.totalorder %s6246_s22, 1 }
  0x10   : > { %p529_p3 = scmp.lt.s32.totalorder %s528_s23, 23  ;;  %v5637_v9 = vpack.c.bf16 %v786_v8, %v785_v7  ;;  %v6284_v13 = vld [vmem:[%s7864_s2 + $0x10] sm:$0xff]   ;;  %v5641_v14 = vpack.c.bf16 %v788_v11, %v787_v10  ;;  %v6293_v15 = vld [vmem:[%s7864_s2 + $0x18] sm:$0xff]   ;;  %v6298_v16 = vld [vmem:[%s7864_s2 + $0x20] sm:$0xff]  }
  0x11   : > { %v6307_v17 = vld [vmem:[%s7864_s2 + $0x28] sm:$0xff]   ;;  %v4628_v18 = vld [vmem:[%s7867_s5] ss:$0 sm:$0xff]  ;;  %s8005_s22 = smov (!%p540_p4, %s6246_s22), 1 }
  0x12   : > { %s8003_s23 = smov (!%p529_p3, %s528_s23), 23  ;;  %v4629_v21 = vld [vmem:[%s7868_s6] ss:$0 sm:$0xff] }
  0x13   : > { %s4607_s26 = sshll.u32 %s8003_s23, 2  ;;  %s4608_s18 = sshll.u32 %s8003_s23, 3 }
  0x14   : > { %s532_s30 = scalar_lea.vmem %s7913_s29, %s4607_s26  ;;  %s6405_s24 = scalar_lea.vmem %s7863_s1, %s4608_s18 }
  0x15   : > { %v5936_v1 = vld [vmem:[%s532_s30] sm:$0xff]   ;;  %v5937_v2 = vld [vmem:[%s532_s30 + $0x8] sm:$0xff]   ;;  %v5938_v3 = vld [vmem:[%s532_s30 + $0x10] sm:$0xff]  }
  0x16   : > { %5102 = vmatprep.subr.bf16.mxu1 %v5936_v1  ;;  %v5939_v4 = vld [vmem:[%s532_s30 + $0x18] sm:$0xff]   ;;  %v5940_v5 = vld [vmem:[%s532_s30 + $0x20] sm:$0xff]   ;;  %v5941_v6 = vld [vmem:[%s532_s30 + $0x28] sm:$0xff]  }
  0x17   : > { %5103 = vmatpush3.bf16.msra.mxu1 %v5936_v1 }
  0x18   : > { %5104 = vmatprep.subr.bf16.mxu1 %v5937_v2 }
  0x1b   : > { %5105 = vmatpush3.bf16.msra.mxu1 %v5937_v2 }
  0x1c   : > { %5106 = vmatprep.subr.bf16.mxu1 %v5938_v3 }
  0x1f   : > { %5107 = vmatpush3.bf16.msra.mxu1 %v5938_v3 }
  0x20   : > { %5108 = vmatprep.subr.bf16.mxu1 %v5939_v4 }
  0x23   : > { %5109 = vmatpush3.bf16.msra.mxu1 %v5939_v4 }
  0x24   : > { %5110 = vmatprep.subr.bf16.mxu1 %v5940_v5 }
  0x27   : > { %5111 = vmatpush3.bf16.msra.mxu1 %v5940_v5 }
  0x28   : > { %5112 = vmatprep.subr.bf16.mxu1 %v5941_v6 }
  0x2b   : > { %5113 = vmatpush3.bf16.msra.mxu1 %v5941_v6 }
  0x2c   : > { %5638 = vmatprep.subr.bf16.mxu1 %v5637_v9 }
  0x2e   : > { %5115 = vmatmul.mubr.msk.bf16.vlgmr.msra.gmra.mrb[0].mxu1 %vm635_vm0, %v6279_v12 }
  0x2f   : > { %5118 = vmatprep.mubr.msk.bf16.mxu1 %vm635_vm0, %v6284_v13  ;;  %5640 = vmatpush3.bf16.msra.mxu1 %v5637_v9 }
  0x30   : > { %5642 = vmatprep.subr.bf16.mxu1 %v5641_v14 }
  0x33   : > { %5644 = vmatpush3.bf16.msra.mxu1 %v5641_v14 }
  0x36   : > { %5119 = vmatmul.mubr.msk.bf16.gmra.mrb[4].mxu1 %vm635_vm0, %v6293_v15 }
  0x37   : > { %5122 = vmatprep.mubr.msk.bf16.mxu1 %vm635_vm0, %v6298_v16 }
  0x3e   : > { %5123 = vmatmul.mubr.msk.bf16.gmra.mrb[8].mxu1 %vm635_vm0, %v6307_v17 }
 0x101   : > { %v5116_v19 = vpop.f32.mrb[0].mxu1 }
 0x102   : > { %v744_v20 = vmul.f32 %v5116_v19, %v4628_v18  ;;  %v688_v22 = vpop.f32.mrb[1].mxu1 }
 0x103   : > { %v742_v23 = vmul.f32 %v4628_v18, %v688_v22  ;;  %v5117_v24 = vpop.f32.mrb[2].mxu1 }
 0x104   : > { %v691_v25 = vpop.f32.mrb[3].mxu1  ;;  %v745_v27 = vmul.f32 %v5117_v24, %v4628_v18  ;;  %v763_v29 = vadd.f32 %v4629_v21, %v744_v20 }
 0x105   : > { %v761_v26 = vadd.f32 %v4629_v21, %v742_v23  ;;  %v743_v28 = vmul.f32 %v4628_v18, %v691_v25 }
 0x106   : > { %v764_v32 = vadd.f32 %v4629_v21, %v745_v27  ;;  %v775_v35 = vmax.f32 %v763_v29, 0.0  ;;  %v1069_v27 = vld [vmem:[%s7870_s8] sm:$0xff]  ;;  %v1235_v29 = vld [vmem:[%s7871_s9 + $0x8] sm:$0xff] }
 0x107   : > { %v773_v30 = vmax.f32 %v761_v26, 0.0  ;;  %v762_v31 = vadd.f32 %v4629_v21, %v743_v28 }
 0x108   : > { %v776_v41 = vmax.f32 %v764_v32, 0.0  ;;  %v1237_v32 = vld [vmem:[%s7871_s9 + $0x18] sm:$0xff] }
 0x109   : > { %v774_v33 = vmax.f32 %v762_v31, 0.0  ;;  %v5120_v34 = vpop.f32.mrb[4].mxu1  ;;  %5134 = vmatprep.mubr.msk.f32.mxu1 %vm789_vm1, %v773_v30  ;;  %v1236_v30 = vld [vmem:[%s7871_s9 + $0x10] sm:$0xff] }
 0x10a   : > { %v748_v36 = vmul.f32 %v5120_v34, %v4628_v18  ;;  %v704_v37 = vpop.f32.mrb[5].mxu1  ;;  %v1238_v34 = vld [vmem:[%s7871_s9 + $0x20] sm:$0xff] }
 0x10b   : > { %v746_v38 = vmul.f32 %v4628_v18, %v704_v37  ;;  %v5121_v39 = vpop.f32.mrb[6].mxu1  ;;  %5135 = vmatmul.mubr.msk.f32.vlgmr.msra.gmra.mrb[12].mxu1 %vm789_vm1, %v774_v33  ;;  %v5657_v33 = vpack.c.bf16 %v1237_v32, %v1236_v30  ;;  %v1240_v37 = vld [vmem:[%s7871_s9 + $0x30] sm:$0xff] }
 0x10c   : > { %v707_v40 = vpop.f32.mrb[7].mxu1  ;;  %5137 = vmatprep.mubr.msk.f32.mxu1 %vm789_vm1, %v775_v35  ;;  %v749_v43 = vmul.f32 %v5121_v39, %v4628_v18  ;;  %v767_v45 = vadd.f32 %v4629_v21, %v748_v36  ;;  %v1239_v35 = vld [vmem:[%s7871_s9 + $0x28] sm:$0xff] }
 0x10d   : > { %v765_v42 = vadd.f32 %v4629_v21, %v746_v38  ;;  %v747_v44 = vmul.f32 %v4628_v18, %v707_v40  ;;  %v5661_v36 = vpack.c.bf16 %v1239_v35, %v1238_v34  ;;  %v1241_v38 = vld [vmem:[%s7871_s9 + $0x38] sm:$0xff]  ;;  %v1242_v40 = vld [vmem:[%s7871_s9 + $0x40] sm:$0xff] }
 0x10e   : > { %v768_v48 = vadd.f32 %v4629_v21, %v749_v43  ;;  %v779_v51 = vmax.f32 %v767_v45, 0.0  ;;  %v5665_v39 = vpack.c.bf16 %v1241_v38, %v1240_v37  ;;  %v1244_v43 = vld [vmem:[%s7871_s9 + $0x50] sm:$0xff]  ;;  %v7881_v37 = vmov 0.0|0.0   ;;  %v1718_v38 = vld [vmem:[%s7873_s11] sm:$0xff] }
 0x10f   : > { %v777_v46 = vmax.f32 %v765_v42, 0.0  ;;  %v766_v47 = vadd.f32 %v4629_v21, %v747_v44  ;;  %5138 = vmatmul.mubr.msk.f32.gmra.mrb[14].mxu1 %vm789_vm1, %v776_v41  ;;  %v1243_v41 = vld [vmem:[%s7871_s9 + $0x48] sm:$0xff]  ;;  %v1245_v44 = vld [vmem:[%s7871_s9 + $0x58] sm:$0xff] }
 0x110   : > { %v780_v57 = vmax.f32 %v768_v48, 0.0  ;;  %v5669_v42 = vpack.c.bf16 %v1243_v41, %v1242_v40  ;;  %v5673_v45 = vpack.c.bf16 %v1245_v44, %v1244_v43  ;;  %v7879_v41 = vmov 0.0   ;;  %v1721_v43 = vld [vmem:[%s7873_s11 + $0x18] sm:$0xff] }
 0x111   : > { %v778_v49 = vmax.f32 %v766_v47, 0.0  ;;  %v5124_v50 = vpop.f32.mrb[8].mxu1  ;;  %5140 = vmatprep.mubr.msk.f32.mxu1 %vm789_vm1, %v777_v46  ;;  %v1246_v46 = vld [vmem:[%s7871_s9 + $0x60] sm:$0xff]  ;;  %v1247_v47 = vld [vmem:[%s7871_s9 + $0x68] sm:$0xff] }
 0x112   : > { %v752_v52 = vmul.f32 %v5124_v50, %v4628_v18  ;;  %v720_v53 = vpop.f32.mrb[9].mxu1  ;;  %v5677_v48 = vpack.c.bf16 %v1247_v47, %v1246_v46  ;;  %v1249_v50 = vld [vmem:[%s7871_s9 + $0x78] sm:$0xff] }
 0x113   : > { %v750_v54 = vmul.f32 %v4628_v18, %v720_v53  ;;  %v5125_v55 = vpop.f32.mrb[10].mxu1  ;;  %5141 = vmatmul.mubr.msk.f32.gmra.mrb[16].mxu1 %vm789_vm1, %v778_v49  ;;  %v1248_v49 = vld [vmem:[%s7871_s9 + $0x70] sm:$0xff] }
 0x114   : > { %v723_v56 = vpop.f32.mrb[11].mxu1  ;;  %5143 = vmatprep.mubr.msk.f32.mxu1 %vm789_vm1, %v779_v51  ;;  %v753_v59 = vmul.f32 %v5125_v55, %v4628_v18  ;;  %v771_v61 = vadd.f32 %v4629_v21, %v752_v52  ;;  %v5681_v51 = vpack.c.bf16 %v1249_v50, %v1248_v49  ;;  %v957_v52 = vld [vmem:[%s6405_s24] sm:$0xff]  ;;  %v959_v53 = vld [vmem:[%s6405_s24 + $0x10] sm:$0xff] }
 0x115   : > { %v769_v58 = vadd.f32 %v4629_v21, %v750_v54  ;;  %v751_v60 = vmul.f32 %v4628_v18, %v723_v56  ;;  %v4648_v55 = vld [vmem:[%s7869_s7] ss:$0 sm:$0xff] }
 0x116   : > { %v772_v1 = vadd.f32 %v4629_v21, %v753_v59  ;;  %v783_v3 = vmax.f32 %v771_v61, 0.0  ;;  %v960_v61 = vld [vmem:[%s6405_s24 + $0x18] sm:$0xff] }
 0x117   : > { %v781_v62 = vmax.f32 %v769_v58, 0.0  ;;  %v770_v63 = vadd.f32 %v4629_v21, %v751_v60  ;;  %5144 = vmatmul.mubr.msk.f32.gmra.mrb[18].mxu1 %vm789_vm1, %v780_v57  ;;  %v958_v57 = vld [vmem:[%s6405_s24 + $0x8] sm:$0xff] }
 0x118   : > { %v784_v4 = vmax.f32 %v772_v1, 0.0 }
 0x119   : > { %v782_v2 = vmax.f32 %v770_v63, 0.0  ;;  %5146 = vmatprep.mubr.msk.f32.mxu1 %vm789_vm1, %v781_v62 }
 0x11b   : > { %5147 = vmatmul.mubr.msk.f32.gmra.mrb[20].mxu1 %vm789_vm1, %v782_v2 }
 0x11c   : > { %5149 = vmatprep.mubr.msk.f32.mxu1 %vm789_vm1, %v783_v3 }
 0x11f   : > { %5150 = vmatmul.mubr.msk.f32.gmra.mrb[22].mxu1 %vm789_vm1, %v784_v4  ;;  %v963_v4 = vld [vmem:[%s6405_s24 + $0x30] sm:$0xff] }
 0x120   : > { %5164 = vmatprep.mubr.msk.bf16.mxu1 %vm635_vm0, %v6254_v0 }
 0x1de   : > { %v5136_v5 = vpop.f32.mrb[12].mxu1 }
 0x1df   : > { %v892_v6 = vpop.f32.mrb[13].mxu1 }
 0x1e0   : > { %v951_v7 = vpack.c.bf16 %v5136_v5, %v892_v6  ;;  %v961_v6 = vld [vmem:[%s6405_s24 + $0x20] sm:$0xff] }
 0x1e2   : > { %v5139_v8 = vpop.f32.mrb[14].mxu1  ;;  %5152 = vmatprep.subr.bf16.mxu1 %v951_v7 }
 0x1e3   : > { %v902_v9 = vpop.f32.mrb[15].mxu1  ;;  %5153 = vmatpush3.bf16.msra.mxu1 %v951_v7 }
 0x1e4   : > { %v952_v10 = vpack.c.bf16 %v5139_v8, %v902_v9 }
 0x1e6   : > { %v5142_v11 = vpop.f32.mrb[16].mxu1  ;;  %5154 = vmatprep.subr.bf16.mxu1 %v952_v10 }
 0x1e7   : > { %v912_v14 = vpop.f32.mrb[17].mxu1  ;;  %5155 = vmatpush3.bf16.msra.mxu1 %v952_v10  ;;  %v964_v10 = vld [vmem:[%s6405_s24 + $0x38] sm:$0xff] }
 0x1e8   : > { %v953_v18 = vpack.c.bf16 %v5142_v11, %v912_v14  ;;  %v962_v11 = vld [vmem:[%s6405_s24 + $0x28] sm:$0xff] }
 0x1ea   : > { %v5145_v19 = vpop.f32.mrb[18].mxu1  ;;  %5156 = vmatprep.subr.bf16.mxu1 %v953_v18 }
 0x1eb   : > { %v922_v20 = vpop.f32.mrb[19].mxu1  ;;  %5157 = vmatpush3.bf16.msra.mxu1 %v953_v18 }
 0x1ec   : > { %v954_v21 = vpack.c.bf16 %v5145_v19, %v922_v20 }
 0x1ee   : > { %v5148_v22 = vpop.f32.mrb[20].mxu1  ;;  %5158 = vmatprep.subr.bf16.mxu1 %v954_v21 }
 0x1ef   : > { %v932_v0 = vpop.f32.mrb[21].mxu1  ;;  %5159 = vmatpush3.bf16.msra.mxu1 %v954_v21 }
 0x1f0   : > { %v955_v23 = vpack.c.bf16 %v5148_v22, %v932_v0 }
 0x1f2   : > { %v5151_v24 = vpop.f32.mrb[22].mxu1  ;;  %5160 = vmatprep.subr.bf16.mxu1 %v955_v23 }
 0x1f3   : > { %v942_v25 = vpop.f32.mrb[23].mxu1  ;;  %5161 = vmatpush3.bf16.msra.mxu1 %v955_v23 }
 0x1f4   : > { %v956_v26 = vpack.c.bf16 %v5151_v24, %v942_v25  ;;  %v967_v25 = vld [vmem:[%s6405_s24 + $0x50] sm:$0xff] }
 0x1f6   : > { %5162 = vmatprep.subr.bf16.mxu1 %v956_v26 }
 0x1f7   : > { %5163 = vmatpush3.bf16.msra.mxu1 %v956_v26  ;;  %v965_v26 = vld [vmem:[%s6405_s24 + $0x40] sm:$0xff] }
 0x1fa   : > { %5165 = vmatmul.mubr.msk.bf16.vlgmr.msra.gmra.mrb[24].mxu1 %vm635_vm0, %v6279_v12  ;;  %v1070_v12 = vld [vmem:[%s7870_s8 + $0x8] sm:$0xff] }
 0x1fb   : > { %5168 = vmatprep.mubr.msk.bf16.mxu1 %vm635_vm0, %v6284_v13  ;;  %v5645_v28 = vpack.c.bf16 %v1070_v12, %v1069_v27  ;;  %v1071_v13 = vld [vmem:[%s7870_s8 + $0x10] sm:$0xff] }
 0x1fd   : > { %5646 = vmatprep.subr.bf16.mxu0 %v5645_v28 }
 0x1fe   : > { %5648 = vmatpush3.bf16.msra.mxu0 %v5645_v28 }
 0x202   : > { %5169 = vmatmul.mubr.msk.bf16.gmra.mrb[28].mxu1 %vm635_vm0, %v6293_v15  ;;  %v1072_v15 = vld [vmem:[%s7870_s8 + $0x18] sm:$0xff] }
 0x203   : > { %5172 = vmatprep.mubr.msk.bf16.mxu1 %vm635_vm0, %v6298_v16  ;;  %v5649_v16 = vpack.c.bf16 %v1072_v15, %v1071_v13  ;;  %v968_v15 = vld [vmem:[%s6405_s24 + $0x58] sm:$0xff] }
 0x205   : > { %5650 = vmatprep.subr.bf16.mxu0 %v5649_v16 }
 0x206   : > { %5652 = vmatpush3.bf16.msra.mxu0 %v5649_v16  ;;  %v966_v16 = vld [vmem:[%s6405_s24 + $0x48] sm:$0xff]  ;;  %s4609_s24 = sshll.u32 %s8005_s22, 3 }
 0x207   : > { %5685 = vmatprep.subr.bf16.mxu0 %v7881_v37  ;;  %s543_s23 = scalar_lea.vmem %s7878_s16, %s4609_s24 }
 0x20a   : > { %5173 = vmatmul.mubr.msk.bf16.gmra.mrb[32].mxu1 %vm635_vm0, %v6307_v17  ;;  %v1234_v17 = vld [vmem:[%s7871_s9] sm:$0xff] }
 0x20b   : > { %v5653_v31 = vpack.c.bf16 %v1235_v29, %v1234_v17 }
 0x20d   : > { %5654 = vmatprep.subr.bf16.mxu1 %v5653_v31 }
 0x20e   : > { %5656 = vmatpush3.bf16.msra.mxu1 %v5653_v31 }
 0x20f   : > { %5658 = vmatprep.subr.bf16.mxu1 %v5657_v33 }
 0x212   : > { %5660 = vmatpush3.bf16.msra.mxu1 %v5657_v33 }
 0x213   : > { %5662 = vmatprep.subr.bf16.mxu1 %v5661_v36 }
 0x216   : > { %5664 = vmatpush3.bf16.msra.mxu1 %v5661_v36 }
 0x217   : > { %5666 = vmatprep.subr.bf16.mxu1 %v5665_v39 }
 0x21a   : > { %5668 = vmatpush3.bf16.msra.mxu1 %v5665_v39  ;;  %v1719_v39 = vld [vmem:[%s7873_s11 + $0x8] sm:$0xff] }
 0x21b   : > { %5670 = vmatprep.subr.bf16.mxu1 %v5669_v42  ;;  %v5703_v40 = vpack.c.bf16 %v1719_v39, %v1718_v38 }
 0x21e   : > { %5672 = vmatpush3.bf16.msra.mxu1 %v5669_v42  ;;  %v1720_v42 = vld [vmem:[%s7873_s11 + $0x10] sm:$0xff] }
 0x21f   : > { %5674 = vmatprep.subr.bf16.mxu1 %v5673_v45  ;;  %v5707_v46 = vpack.c.bf16 %v1721_v43, %v1720_v42 }
 0x222   : > { %5676 = vmatpush3.bf16.msra.mxu1 %v5673_v45 }
 0x223   : > { %5678 = vmatprep.subr.bf16.mxu1 %v5677_v48 }
 0x226   : > { %5680 = vmatpush3.bf16.msra.mxu1 %v5677_v48 }
 0x227   : > { %5682 = vmatprep.subr.bf16.mxu1 %v5681_v51 }
 0x22a   : > { %5684 = vmatpush3.bf16.msra.mxu1 %v5681_v51 }
 0x22b   : > { %5704 = vmatprep.subr.bf16.mxu1 %v5703_v40 }
 0x2cd   : > { %v5166_v54 = vpop.f32.mrb[24].mxu1 }
 0x2ce   : > { %v1003_v56 = vpop.f32.mrb[25].mxu1  ;;  %v1012_v60 = vadd.f32 %v5166_v54, %v959_v53 }
 0x2cf   : > { %v1004_v58 = vadd.f32 %v1003_v56, %v957_v52  ;;  %v5167_v59 = vpop.f32.mrb[26].mxu1 }
 0x2d0   : > { %v1006_v62 = vpop.f32.mrb[27].mxu1  ;;  %v1015_v2 = vadd.f32 %v5167_v59, %v960_v61  ;;  %v6421_v5 = vadd.f32 %v4648_v55, %v1012_v60 }
 0x2d1   : > { %v6414_v63 = vadd.f32 %v4648_v55, %v1004_v58  ;;  %v1007_v1 = vadd.f32 %v1006_v62, %v958_v57 }
 0x2d2   : > { %v6430_v14 = vadd.f32 %v4648_v55, %v1015_v2  ;;  %v6152_v2 = vmov 0  }
 0x2d3   : > { %v6416_v3 = vadd.f32 %v4648_v55, %v1007_v1  ;;  %5184 = vmatprep.mubr.msk.f32.mxu0 %vm789_vm1, %v6414_v63  ;;  %v6151_v1 = vmov 1   ;;  %5888 = vset.pattern.permute.xlu0 %v6152_v2 }
 0x2d4   : > { %5889 = vset.pattern.permute.xlu1 %v6151_v1 }
 0x2d5   : > { %v5170_v7 = vpop.f32.mrb[28].mxu1  ;;  %5185 = vmatmul.mubr.msk.f32.vlgmr.msra.gmra.mrb[0].mxu0 %vm789_vm1, %v6416_v3 }
 0x2d6   : > { %v1028_v8 = vadd.f32 %v5170_v7, %v963_v4  ;;  %v1019_v9 = vpop.f32.mrb[29].mxu1  ;;  %5187 = vmatprep.mubr.msk.f32.mxu0 %vm789_vm1, %v6421_v5  ;;  %v1458_v4 = vld [vmem:[%s7874_s12] sm:$0xff] }
 0x2d7   : > { %v1020_v18 = vadd.f32 %v1019_v9, %v961_v6  ;;  %v5171_v19 = vpop.f32.mrb[30].mxu1  ;;  %v1459_v6 = vld [vmem:[%s7874_s12 + $0x8] sm:$0xff]  ;;  %v1461_v9 = vld [vmem:[%s7874_s12 + $0x18] sm:$0xff] }
 0x2d8   : > { %v1022_v20 = vpop.f32.mrb[31].mxu1  ;;  %v1031_v22 = vadd.f32 %v5171_v19, %v964_v10  ;;  %v6436_v23 = vadd.f32 %v4648_v55, %v1028_v8  ;;  %v5711_v7 = vpack.c.bf16 %v1459_v6, %v1458_v4  ;;  %v1460_v8 = vld [vmem:[%s7874_s12 + $0x10] sm:$0xff]  ;;  %v1375_v10 = vld [vmem:[%s7872_s10] sm:$0xf]  ;;  %v4692_v19 = vld [vmem:[%s7873_s11 + $0x28] sm:$0xff] }
 0x2d9   : > { %v6432_v21 = vadd.f32 %v4648_v55, %v1020_v18  ;;  %v1023_v0 = vadd.f32 %v1022_v20, %v962_v11  ;;  %5188 = vmatmul.mubr.msk.f32.gmra.mrb[2].mxu0 %vm789_vm1, %v6430_v14  ;;  %v5715_v11 = vpack.c.bf16 %v1461_v9, %v1460_v8  ;;  %v4691_v18 = vld [vmem:[%s7873_s11 + $0x20] sm:$0xff] }
 0x2da   : > { %v6444_v27 = vadd.f32 %v4648_v55, %v1031_v22  ;;  %v5719_v20 = vpack.c.bf16 %v4692_v19, %v4691_v18  ;;  %v4693_v22 = vld [vmem:[%s7873_s11 + $0x30] sm:$0xff] }
 0x2db   : > { %v6438_v24 = vadd.f32 %v4648_v55, %v1023_v0  ;;  %5190 = vmatprep.mubr.msk.f32.mxu0 %vm789_vm1, %v6432_v21  ;;  %v4694_v0 = vld [vmem:[%s7873_s11 + $0x38] sm:$0xff] }
 0x2dd   : > { %v5174_v12 = vpop.f32.mrb[32].mxu1  ;;  %5191 = vmatmul.mubr.msk.f32.gmra.mrb[4].mxu0 %vm789_vm1, %v6438_v24 }
 0x2de   : > { %v1044_v28 = vadd.f32 %v5174_v12, %v967_v25  ;;  %v1035_v13 = vpop.f32.mrb[33].mxu1  ;;  %5193 = vmatprep.mubr.msk.f32.mxu0 %vm789_vm1, %v6436_v23  ;;  %v5723_v25 = vpack.c.bf16 %v4694_v0, %v4693_v22  ;;  %v4714_v12 = vld [vmem:[%s7873_s11 + $0x48] sm:$0xff] }
 0x2df   : > { %v1036_v17 = vadd.f32 %v1035_v13, %v965_v26  ;;  %v5175_v29 = vpop.f32.mrb[34].mxu1  ;;  %v4713_v26 = vld [vmem:[%s7873_s11 + $0x40] sm:$0xff]  ;;  %v4715_v13 = vld [vmem:[%s7873_s11 + $0x50] sm:$0xff] }
 0x2e0   : > { %v1038_v30 = vpop.f32.mrb[35].mxu1  ;;  %v1047_v32 = vadd.f32 %v5175_v29, %v968_v15  ;;  %v6456_v34 = vadd.f32 %v4648_v55, %v1044_v28  ;;  %v5727_v28 = vpack.c.bf16 %v4714_v12, %v4713_v26  ;;  %v4716_v15 = vld [vmem:[%s7873_s11 + $0x58] sm:$0xff]  ;;  %v4736_v29 = vld [vmem:[%s7873_s11 + $0x68] sm:$0xff] }
 0x2e1   : > { %v6452_v31 = vadd.f32 %v4648_v55, %v1036_v17  ;;  %v1039_v33 = vadd.f32 %v1038_v30, %v966_v16  ;;  %5194 = vmatmul.mubr.msk.f32.gmra.mrb[6].mxu0 %vm789_vm1, %v6444_v27  ;;  %v5731_v16 = vpack.c.bf16 %v4716_v15, %v4715_v13  ;;  %v4735_v17 = vld [vmem:[%s7873_s11 + $0x60] sm:$0xff] }
 0x2e2   : > { %v6462_v36 = vadd.f32 %v4648_v55, %v1047_v32  ;;  %v5735_v30 = vpack.c.bf16 %v4736_v29, %v4735_v17  ;;  %v4737_v32 = vld [vmem:[%s7873_s11 + $0x70] sm:$0xff] }
 0x2e3   : > { %v6458_v35 = vadd.f32 %v4648_v55, %v1039_v33  ;;  %5196 = vmatprep.mubr.msk.f32.mxu0 %vm789_vm1, %v6452_v31  ;;  %v4738_v33 = vld [vmem:[%s7873_s11 + $0x78] sm:$0xff] }
 0x2e4   : > { %v5739_v38 = vpack.c.bf16 %v4738_v33, %v4737_v32 }
 0x2e5   : > { %5197 = vmatmul.mubr.msk.f32.gmra.mrb[8].mxu0 %vm789_vm1, %v6458_v35 }
 0x2e6   : > { %5199 = vmatprep.mubr.msk.f32.mxu0 %vm789_vm1, %v6456_v34 }
 0x2e9   : > { %5200 = vmatmul.mubr.msk.f32.gmra.mrb[10].mxu0 %vm789_vm1, %v6462_v36 }
 0x2ea   : > { %5276 = vmatprep.mubr.msk.f32.mxu0 %vm6149_vm2, %v7879_v41 }
 0x3a8   : > { %v5186_v44 = vpop.f32.mrb[0].mxu0 }
 0x3a9   : > { %v1175_v45 = vpop.f32.mrb[1].mxu0 }
 0x3aa   : > { %v5686_v47 = vpack.c.bf16 %v5186_v44, %v1175_v45  ;;  %5234 = vmatprep.mubr.f32.mxu1 %v1175_v45 }
 0x3ab   : > { %5235 = vmatmul.mubr.f32.vlgmr.msra.gmra.mrb[36].mxu1 %v5186_v44 }
 0x3ac   : > { %v5189_v48 = vpop.f32.mrb[2].mxu0  ;;  %5687 = vmatpush3.bf16.xpose.msra.mxu0 %v5686_v47  ;;  %5706 = vmatpush3.bf16.msra.mxu1 %v5703_v40 }
 0x3ad   : > { %v1185_v49 = vpop.f32.mrb[3].mxu0  ;;  %5688 = vmatprep.subr.bf16.mxu0 %v7881_v37  ;;  %5708 = vmatprep.subr.bf16.mxu1 %v5707_v46 }
 0x3ae   : > { %v5689_v50 = vpack.c.bf16 %v5189_v48, %v1185_v49  ;;  %5237 = vmatprep.mubr.f32.mxu1 %v1185_v49 }
 0x3af   : > { %5238 = vmatmul.mubr.f32.gmra.mrb[38].mxu1 %v5189_v48 }
 0x3b0   : > { %v5192_v51 = vpop.f32.mrb[4].mxu0  ;;  %5710 = vmatpush3.bf16.msra.mxu1 %v5707_v46 }
 0x3b1   : > { %v1195_v52 = vpop.f32.mrb[5].mxu0 }
 0x3b2   : > { %v5692_v53 = vpack.c.bf16 %v5192_v51, %v1195_v52  ;;  %5240 = vmatprep.mubr.f32.mxu1 %v1195_v52 }
 0x3b3   : > { %5241 = vmatmul.mubr.f32.gmra.mrb[40].mxu1 %v5192_v51 }
 0x3b4   : > { %v5195_v54 = vpop.f32.mrb[6].mxu0  ;;  %5690 = vmatpush3.bf16.xpose.msra.mxu0 %v5689_v50 }
 0x3b5   : > { %v1205_v55 = vpop.f32.mrb[7].mxu0  ;;  %5691 = vmatprep.subr.bf16.mxu0 %v7881_v37 }
 0x3b6   : > { %v5695_v56 = vpack.c.bf16 %v5195_v54, %v1205_v55  ;;  %5243 = vmatprep.mubr.f32.mxu1 %v1205_v55 }
 0x3b7   : > { %5244 = vmatmul.mubr.f32.gmra.mrb[42].mxu1 %v5195_v54  ;;  %v1522_v54 = vlaneseq }
 0x3b8   : > { %v5198_v57 = vpop.f32.mrb[8].mxu0 }
 0x3b9   : > { %v1215_v58 = vpop.f32.mrb[9].mxu0 }
 0x3ba   : > { %v5698_v59 = vpack.c.bf16 %v5198_v57, %v1215_v58  ;;  %5246 = vmatprep.mubr.f32.mxu1 %v1215_v58  ;;  %v6700_v58 = vshrl.u32 %v1522_v54, 7 }
 0x3bb   : > { %5247 = vmatmul.mubr.f32.gmra.mrb[44].mxu1 %v5198_v57 }
 0x3bc   : > { %v5201_v60 = vpop.f32.mrb[10].mxu0  ;;  %5693 = vmatpush3.bf16.xpose.msra.mxu0 %v5692_v53 }
 0x3bd   : > { %v1225_v61 = vpop.f32.mrb[11].mxu0  ;;  %5694 = vmatprep.subr.bf16.mxu0 %v7881_v37 }
 0x3be   : > { %v5701_v62 = vpack.c.bf16 %v5201_v60, %v1225_v61  ;;  %5249 = vmatprep.mubr.f32.mxu1 %v1225_v61  ;;  %v3127_v61 = vsub.s32 3, %v6700_v58 }
 0x3bf   : > { %5250 = vmatmul.mubr.f32.gmra.mrb[46].mxu1 %v5201_v60 }
 0x3c0   : > { %5287 = vmatprep.mubr.msk.f32.mxu1 %vm789_vm1, %v6414_v63 }
 0x3c3   : > { %5288 = vmatmul.mubr.msk.f32.vlgmr.msra.gmra.mrb[48].mxu1 %vm789_vm1, %v6416_v3 }
 0x3c4   : > { %5696 = vmatpush3.bf16.xpose.msra.mxu0 %v5695_v56  ;;  %5290 = vmatprep.mubr.msk.f32.mxu1 %vm789_vm1, %v6421_v5 }
 0x3c5   : > { %5697 = vmatprep.subr.bf16.mxu0 %v7881_v37 }
 0x3c7   : > { %5291 = vmatmul.mubr.msk.f32.gmra.mrb[50].mxu1 %vm789_vm1, %v6430_v14 }
 0x3c8   : > { %5293 = vmatprep.mubr.msk.f32.mxu1 %vm789_vm1, %v6432_v21 }
 0x3cb   : > { %5294 = vmatmul.mubr.msk.f32.gmra.mrb[52].mxu1 %vm789_vm1, %v6438_v24 }
 0x3cc   : > { %5699 = vmatpush3.bf16.xpose.msra.mxu0 %v5698_v59  ;;  %5296 = vmatprep.mubr.msk.f32.mxu1 %vm789_vm1, %v6436_v23 }
 0x3cd   : > { %5700 = vmatprep.subr.bf16.mxu0 %v7881_v37 }
 0x3cf   : > { %5297 = vmatmul.mubr.msk.f32.gmra.mrb[54].mxu1 %vm789_vm1, %v6444_v27 }
 0x3d0   : > { %5299 = vmatprep.mubr.msk.f32.mxu1 %vm789_vm1, %v6452_v31 }
 0x3d3   : > { %5300 = vmatmul.mubr.msk.f32.gmra.mrb[56].mxu1 %vm789_vm1, %v6458_v35 }
 0x3d4   : > { %5702 = vmatpush3.bf16.xpose.msra.mxu0 %v5701_v62  ;;  %5302 = vmatprep.mubr.msk.f32.mxu1 %vm789_vm1, %v6456_v34 }
 0x3d5   : > { %5712 = vmatprep.subr.bf16.mxu0 %v5711_v7 }
 0x3d7   : > { %5303 = vmatmul.mubr.msk.f32.gmra.mrb[58].mxu1 %vm789_vm1, %v6462_v36 }
 0x3db   : > { %5277 = vmatmul.mubr.f32.vlgmr.msra.gmra.mrb[12].mxu0 %v1375_v10 }
 0x3dc   : > { %5714 = vmatpush3.bf16.msra.mxu0 %v5711_v7  ;;  %5337 = vmatprep.mubr.msk.f32.mxu0 %vm789_vm1, %v6414_v63 }
 0x3dd   : > { %5716 = vmatprep.subr.bf16.mxu0 %v5715_v11 }
 0x3e0   : > { %5718 = vmatpush3.bf16.msra.mxu0 %v5715_v11 }
 0x3e1   : > { %5720 = vmatprep.subr.bf16.mxu0 %v5719_v20 }
 0x3e3   : > { %5338 = vmatmul.mubr.msk.f32.vlgmr.msra.gmra.mrb[14].mxu0 %vm789_vm1, %v6416_v3 }
 0x3e4   : > { %5340 = vmatprep.mubr.msk.f32.mxu0 %vm789_vm1, %v6421_v5  ;;  %5722 = vmatpush3.bf16.msra.mxu0 %v5719_v20 }
 0x3e5   : > { %5724 = vmatprep.subr.bf16.mxu0 %v5723_v25 }
 0x3e7   : > { %5341 = vmatmul.mubr.msk.f32.gmra.mrb[16].mxu0 %vm789_vm1, %v6430_v14 }
 0x3e8   : > { %5343 = vmatprep.mubr.msk.f32.mxu0 %vm789_vm1, %v6432_v21  ;;  %5726 = vmatpush3.bf16.msra.mxu0 %v5723_v25 }
 0x3e9   : > { %5728 = vmatprep.subr.bf16.mxu0 %v5727_v28 }
 0x3eb   : > { %5344 = vmatmul.mubr.msk.f32.gmra.mrb[18].mxu0 %vm789_vm1, %v6438_v24 }
 0x3ec   : > { %5346 = vmatprep.mubr.msk.f32.mxu0 %vm789_vm1, %v6436_v23 }
 0x3ef   : > { %5347 = vmatmul.mubr.msk.f32.gmra.mrb[20].mxu0 %vm789_vm1, %v6444_v27 }
 0x3f0   : > { %5349 = vmatprep.mubr.msk.f32.mxu0 %vm789_vm1, %v6452_v31 }
 0x3f3   : > { %5350 = vmatmul.mubr.msk.f32.gmra.mrb[22].mxu0 %vm789_vm1, %v6458_v35 }
 0x3f4   : > { %5352 = vmatprep.mubr.msk.f32.mxu0 %vm789_vm1, %v6456_v34 }
 0x3f7   : > { %5353 = vmatmul.mubr.msk.f32.gmra.mrb[24].mxu0 %vm789_vm1, %v6462_v36 }
 0x3f8   : > { %5363 = vmatprep.mubr.msk.f32.mxu0 %vm789_vm1, %v6414_v63 }
 0x3fb   : > { %5364 = vmatmul.mubr.msk.f32.vlgmr.msra.gmra.mrb[26].mxu0 %vm789_vm1, %v6416_v3 }
 0x3fc   : > { %5366 = vmatprep.mubr.msk.f32.mxu0 %vm789_vm1, %v6421_v5  ;;  %5730 = vmatpush3.bf16.msra.mxu0 %v5727_v28 }
 0x3fd   : > { %5732 = vmatprep.subr.bf16.mxu0 %v5731_v16 }
 0x3ff   : > { %5367 = vmatmul.mubr.msk.f32.gmra.mrb[28].mxu0 %vm789_vm1, %v6430_v14 }
 0x400   : > { %5369 = vmatprep.mubr.msk.f32.mxu0 %vm789_vm1, %v6432_v21  ;;  %5734 = vmatpush3.bf16.msra.mxu0 %v5731_v16 }
 0x401   : > { %5736 = vmatprep.subr.bf16.mxu0 %v5735_v30 }
 0x403   : > { %5370 = vmatmul.mubr.msk.f32.gmra.mrb[30].mxu0 %vm789_vm1, %v6438_v24 }
 0x404   : > { %5372 = vmatprep.mubr.msk.f32.mxu0 %vm789_vm1, %v6436_v23 }
 0x407   : > { %5373 = vmatmul.mubr.msk.f32.gmra.mrb[32].mxu0 %vm789_vm1, %v6444_v27 }
 0x408   : > { %5375 = vmatprep.mubr.msk.f32.mxu0 %vm789_vm1, %v6452_v31 }
 0x40b   : > { %5376 = vmatmul.mubr.msk.f32.gmra.mrb[34].mxu0 %vm789_vm1, %v6458_v35 }
 0x40c   : > { %5378 = vmatprep.mubr.msk.f32.mxu0 %vm789_vm1, %v6456_v34 }
 0x40f   : > { %5379 = vmatmul.mubr.msk.f32.gmra.mrb[36].mxu0 %vm789_vm1, %v6462_v36 }
 0x410   : > { %5413 = vmatprep.mubr.msk.f32.mxu0 %vm789_vm1, %v6414_v63 }
 0x413   : > { %5414 = vmatmul.mubr.msk.f32.vlgmr.msra.gmra.mrb[38].mxu0 %vm789_vm1, %v6416_v3 }
 0x414   : > { %5416 = vmatprep.mubr.msk.f32.mxu0 %vm789_vm1, %v6421_v5  ;;  %5738 = vmatpush3.bf16.msra.mxu0 %v5735_v30 }
 0x415   : > { %5740 = vmatprep.subr.bf16.mxu0 %v5739_v38 }
 0x417   : > { %5417 = vmatmul.mubr.msk.f32.gmra.mrb[40].mxu0 %vm789_vm1, %v6430_v14 }
 0x418   : > { %5419 = vmatprep.mubr.msk.f32.mxu0 %vm789_vm1, %v6432_v21  ;;  %5742 = vmatpush3.bf16.msra.mxu0 %v5739_v38 }
 0x419   : > { %5743 = vmatprep.subr.bf16.mxu0 %v7881_v37 }
 0x41b   : > { %5420 = vmatmul.mubr.msk.f32.gmra.mrb[42].mxu0 %vm789_vm1, %v6438_v24 }
 0x41c   : > { %5422 = vmatprep.mubr.msk.f32.mxu0 %vm789_vm1, %v6436_v23 }
 0x41f   : > { %5423 = vmatmul.mubr.msk.f32.gmra.mrb[44].mxu0 %vm789_vm1, %v6444_v27 }
 0x420   : > { %5425 = vmatprep.mubr.msk.f32.mxu0 %vm789_vm1, %v6452_v31 }
 0x423   : > { %5426 = vmatmul.mubr.msk.f32.gmra.mrb[46].mxu0 %vm789_vm1, %v6458_v35 }
 0x424   : > { %5428 = vmatprep.mubr.msk.f32.mxu0 %vm789_vm1, %v6456_v34 }
 0x427   : > { %5429 = vmatmul.mubr.msk.f32.gmra.mrb[48].mxu0 %vm789_vm1, %v6462_v36 }
 0x428   : > { %5463 = vmatprep.mubr.msk.f32.mxu0 %vm789_vm1, %v6414_v63 }
 0x42b   : > { %5464 = vmatmul.mubr.msk.f32.vlgmr.msra.gmra.mrb[50].mxu0 %vm789_vm1, %v6416_v3 }
 0x42c   : > { %5466 = vmatprep.mubr.msk.f32.mxu0 %vm789_vm1, %v6421_v5 }
 0x42f   : > { %5467 = vmatmul.mubr.msk.f32.gmra.mrb[52].mxu0 %vm789_vm1, %v6430_v14  ;;  %v6153_v14 = vmov 3  }
 0x430   : > { %5469 = vmatprep.mubr.msk.f32.mxu0 %vm789_vm1, %v6432_v21  ;;  %v6154_v21 = vmov 2  }
 0x433   : > { %5470 = vmatmul.mubr.msk.f32.gmra.mrb[54].mxu0 %vm789_vm1, %v6438_v24 }
 0x434   : > { %5472 = vmatprep.mubr.msk.f32.mxu0 %vm789_vm1, %v6436_v23 }
 0x437   : > { %5473 = vmatmul.mubr.msk.f32.gmra.mrb[56].mxu0 %vm789_vm1, %v6444_v27 }
 0x438   : > { %5475 = vmatprep.mubr.msk.f32.mxu0 %vm789_vm1, %v6452_v31 }
 0x43b   : > { %5476 = vmatmul.mubr.msk.f32.gmra.mrb[58].mxu0 %vm789_vm1, %v6458_v35 }
 0x43c   : > { %5478 = vmatprep.mubr.msk.f32.mxu0 %vm789_vm1, %v6456_v34 }
 0x43f   : > { %5479 = vmatmul.mubr.msk.f32.gmra.mrb[60].mxu0 %vm789_vm1, %v6462_v36 }
 0x440   : > { %5513 = vmatprep.mubr.msk.f32.mxu0 %vm6149_vm2, %v7879_v41 }
 0x47e   : > { %v5236_v63 = vpop.f32.mrb[36].mxu1 }
 0x47f   : > { %2088 = vperm.xlu1 %5889, %v5236_v63   ;;  %1469 = vperm.xlu0 %5888, %v5236_v63   ;;  %v1316_v3 = vpop.f32.mrb[37].mxu1 }
 0x482   : > { %v5239_v5 = vpop.f32.mrb[38].mxu1 }
 0x483   : > { %5891 = vset.pattern.permute.xlu1 %v6153_v14  ;;  %5890 = vset.pattern.permute.xlu0 %v6154_v21  ;;  %v1326_v23 = vpop.f32.mrb[39].mxu1 }
 0x484   : > { %3082 = vperm.xlu1 %5891, %v5236_v63   ;;  %2585 = vperm.xlu0 %5890, %v5236_v63  }
 0x486   : > { %v6668_v24 = vpop.f32.mrb[40].mxu1 }
 0x487   : > { %v6670_v27 = vpop.f32.mrb[41].mxu1 }
 0x488   : > { %5894 = vset.pattern.permute.xlu1 %v6154_v21  ;;  %5892 = vset.pattern.permute.xlu0 %v6152_v2 }
 0x489   : > { %2581 = vperm.xlu1 %5894, %v1316_v3   ;;  %1464 = vperm.xlu0 %5892, %v1316_v3  }
 0x48a   : > { %v6674_v31 = vpop.f32.mrb[42].mxu1 }
 0x48b   : > { %v6676_v34 = vpop.f32.mrb[43].mxu1 }
 0x48d   : > { %5896 = vset.pattern.permute.xlu1 %v6152_v2  ;;  %5893 = vset.pattern.permute.xlu0 %v6151_v1 }
 0x48e   : > { %2084 = vperm.xlu0 %5893, %v1316_v3   ;;  %1479 = vperm.xlu1 %5896, %v5239_v5   ;;  %v6680_v35 = vpop.f32.mrb[44].mxu1 }
 0x48f   : > { %v6682_v36 = vpop.f32.mrb[45].mxu1 }
 0x492   : > { %5895 = vset.pattern.permute.xlu0 %v6153_v14  ;;  %5898 = vset.pattern.permute.xlu1 %v6154_v21  ;;  %v6686_v39 = vpop.f32.mrb[46].mxu1 }
 0x493   : > { %3078 = vperm.xlu0 %5895, %v1316_v3   ;;  %2593 = vperm.xlu1 %5898, %v5239_v5   ;;  %v6688_v40 = vpop.f32.mrb[47].mxu1 }
 0x496   : > { %v5289_v42 = vpop.f32.mrb[48].mxu1 }
 0x497   : > { %5897 = vset.pattern.permute.xlu0 %v6151_v1  ;;  %5899 = vset.pattern.permute.xlu1 %v6153_v14  ;;  %v1788_v43 = vpop.f32.mrb[49].mxu1 }
 0x498   : > { %v1853_v44 = vpack.c.bf16 %v5289_v42, %v1788_v43  ;;  %2096 = vperm.xlu0 %5897, %v5239_v5   ;;  %3090 = vperm.xlu1 %5899, %v5239_v5  }
 0x49a   : > { %v5292_v45 = vpop.f32.mrb[50].mxu1  ;;  %5305 = vmatprep.subr.bf16.mxu1 %v1853_v44 }
 0x49b   : > { %v1798_v46 = vpop.f32.mrb[51].mxu1  ;;  %5306 = vmatpush3.bf16.msra.mxu1 %v1853_v44 }
 0x49c   : > { %v1854_v47 = vpack.c.bf16 %v5292_v45, %v1798_v46  ;;  %5903 = vset.pattern.permute.xlu0 %v6153_v14  ;;  %5900 = vset.pattern.permute.xlu1 %v6152_v2 }
 0x49d   : > { %3086 = vperm.xlu0 %5903, %v1326_v23   ;;  %1474 = vperm.xlu1 %5900, %v1326_v23  }
 0x49e   : > { %v5295_v48 = vpop.f32.mrb[52].mxu1  ;;  %5307 = vmatprep.subr.bf16.mxu1 %v1854_v47 }
 0x49f   : > { %v1808_v49 = vpop.f32.mrb[53].mxu1  ;;  %5308 = vmatpush3.bf16.msra.mxu1 %v1854_v47 }
 0x4a0   : > { %v1855_v50 = vpack.c.bf16 %v5295_v48, %v1808_v49 }
 0x4a1   : > { %5905 = vset.pattern.permute.xlu0 %v6151_v1  ;;  %5901 = vset.pattern.permute.xlu1 %v6151_v1 }
 0x4a2   : > { %2092 = vperm.xlu1 %5901, %v1326_v23   ;;  %2104 = vperm.xlu0 %5905, %v6668_v24   ;;  %v5298_v51 = vpop.f32.mrb[54].mxu1 }
 0x4a3   : > { %5309 = vmatprep.subr.bf16.mxu1 %v1855_v50  ;;  %v1818_v52 = vpop.f32.mrb[55].mxu1 }
 0x4a4   : > { %v1856_v53 = vpack.c.bf16 %v5298_v51, %v1818_v52  ;;  %5310 = vmatpush3.bf16.msra.mxu1 %v1855_v50  ;;  %v1524_v52 = vsub.s32 0, %v6700_v58 }
 0x4a6   : > { %5902 = vset.pattern.permute.xlu1 %v6154_v21  ;;  %5908 = vset.pattern.permute.xlu0 %v6152_v2  ;;  %v5301_v55 = vpop.f32.mrb[56].mxu1 }
 0x4a7   : > { %5311 = vmatprep.subr.bf16.mxu1 %v1856_v53  ;;  %2589 = vperm.xlu1 %5902, %v1326_v23   ;;  %v1828_v56 = vpop.f32.mrb[57].mxu1 }
 0x4a8   : > { %1484 = vperm.xlu0 %5908, %v6670_v27   ;;  %v1857_v57 = vpack.c.bf16 %v5301_v55, %v1828_v56  ;;  %5312 = vmatpush3.bf16.msra.mxu1 %v1856_v53 }
 0x4aa   : > { %v5304_v59 = vpop.f32.mrb[58].mxu1  ;;  %5313 = vmatprep.subr.bf16.mxu1 %v1857_v57 }
 0x4ab   : > { %5904 = vset.pattern.permute.xlu1 %v6152_v2  ;;  %v1838_v60 = vpop.f32.mrb[59].mxu1 }
 0x4ac   : > { %5910 = vset.pattern.permute.xlu0 %v6154_v21  ;;  %v1858_v62 = vpack.c.bf16 %v5304_v59, %v1838_v60  ;;  %5314 = vmatpush3.bf16.msra.mxu1 %v1857_v57  ;;  %v2133_v60 = vsub.s32 1, %v6700_v58 }
 0x4ad   : > { %1489 = vperm.xlu1 %5904, %v6668_v24   ;;  %2597 = vperm.xlu0 %5910, %v6670_v27  }
 0x4ae   : > { %5315 = vmatprep.subr.bf16.mxu1 %v1858_v62  ;;  %v6707_v4 = vpop.f32.mrb[12].mxu0 }
 0x4af   : > { %v6710_v6 = vrot.slane %v6707_v4, %v3127_v61  ;;  %v5278_v7 = vpop.f32.mrb[13].mxu0  ;;  %v6815_v55 = vrot.slane %v6707_v4, %v1524_v52 }
 0x4b0   : > { %5316 = vmatpush3.bf16.msra.mxu1 %v1858_v62 }
 0x4b1   : > { %5906 = vset.pattern.permute.xlu1 %v6154_v21  ;;  %5911 = vset.pattern.permute.xlu0 %v6153_v14 }
 0x4b2   : > { %2601 = vperm.xlu1 %5906, %v6668_v24   ;;  %3094 = vperm.xlu0 %5911, %v6670_v27  }
 0x4b6   : > { %5907 = vset.pattern.permute.xlu1 %v6153_v14  ;;  %5913 = vset.pattern.permute.xlu0 %v6151_v1  ;;  %v6718_v8 = vpop.f32.mrb[14].mxu0 }
 0x4b7   : > { %7914 = vst [vmem:[#allocation2_spill] sm:$0xff] %v6718_v8  ;;  %3098 = vperm.xlu1 %5907, %v6668_v24   ;;  %2112 = vperm.xlu0 %5913, %v6674_v31   ;;  %v6722_v9 = vpop.f32.mrb[15].mxu0 }
 0x4b8   : > { %7915 = vst [vmem:[#allocation3_spill] sm:$0xff] %v6722_v9 }
 0x4ba   : > { %v6724_v10 = vpop.f32.mrb[16].mxu0 }
 0x4bb   : > { %7916 = vst [vmem:[#allocation4_spill] sm:$0xff] %v6724_v10  ;;  %5909 = vset.pattern.permute.xlu1 %v6151_v1  ;;  %5915 = vset.pattern.permute.xlu0 %v6153_v14  ;;  %v6728_v11 = vpop.f32.mrb[17].mxu0 }
 0x4bc   : > { %7917 = vst [vmem:[#allocation5_spill] sm:$0xff] %v6728_v11  ;;  %2100 = vperm.xlu1 %5909, %v6670_v27   ;;  %3106 = vperm.xlu0 %5915, %v6674_v31  }
 0x4be   : > { %v6732_v18 = vpop.f32.mrb[18].mxu0 }
 0x4bf   : > { %7918 = vst [vmem:[#allocation6_spill] sm:$0xff] %v6732_v18  ;;  %v6734_v19 = vpop.f32.mrb[19].mxu0 }
 0x4c0   : > { %7919 = vst [vmem:[#allocation7_spill] sm:$0xff] %v6734_v19  ;;  %5912 = vset.pattern.permute.xlu1 %v6152_v2  ;;  %5916 = vset.pattern.permute.xlu0 %v6152_v2 }
 0x4c1   : > { %1499 = vperm.xlu1 %5912, %v6674_v31   ;;  %1494 = vperm.xlu0 %5916, %v6676_v34  }
 0x4c2   : > { %v6740_v20 = vpop.f32.mrb[20].mxu0 }
 0x4c3   : > { %7920 = vst [vmem:[#allocation8_spill] sm:$0xff] %v6740_v20  ;;  %v6742_v22 = vpop.f32.mrb[21].mxu0 }
 0x4c4   : > { %7921 = vst [vmem:[#allocation9_spill] sm:$0xff] %v6742_v22 }
 0x4c5   : > { %5914 = vset.pattern.permute.xlu1 %v6154_v21  ;;  %5918 = vset.pattern.permute.xlu0 %v6154_v21 }
 0x4c6   : > { %2609 = vperm.xlu1 %5914, %v6674_v31   ;;  %2605 = vperm.xlu0 %5918, %v6676_v34   ;;  %v6748_v0 = vpop.f32.mrb[22].mxu0 }
 0x4c7   : > { %7922 = vst [vmem:[#allocation10_spill] sm:$0xff] %v6748_v0  ;;  %v6750_v25 = vpop.f32.mrb[23].mxu0 }
 0x4c8   : > { %7923 = vst [vmem:[#allocation11_spill] sm:$0xff] %v6750_v25 }
 0x4ca   : > { %5917 = vset.pattern.permute.xlu1 %v6151_v1  ;;  %5921 = vset.pattern.permute.xlu0 %v6151_v1  ;;  %v6754_v26 = vpop.f32.mrb[24].mxu0 }
 0x4cb   : > { %7924 = vst [vmem:[#allocation12_spill] sm:$0xff] %v6754_v26  ;;  %2108 = vperm.xlu1 %5917, %v6676_v34   ;;  %2120 = vperm.xlu0 %5921, %v6680_v35   ;;  %v6758_v12 = vpop.f32.mrb[25].mxu0 }
 0x4cc   : > { %7925 = vst [vmem:[#allocation13_spill] sm:$0xff] %v6758_v12 }
 0x4ce   : > { %v5365_v28 = vpop.f32.mrb[26].mxu0 }
 0x4cf   : > { %5919 = vset.pattern.permute.xlu1 %v6153_v14  ;;  %5924 = vset.pattern.permute.xlu0 %v6152_v2  ;;  %v2398_v13 = vpop.f32.mrb[27].mxu0 }
 0x4d0   : > { %3102 = vperm.xlu1 %5919, %v6676_v34   ;;  %1504 = vperm.xlu0 %5924, %v6682_v36   ;;  %v6764_v15 = vpack.c.bf16 %v5365_v28, %v2398_v13 }
 0x4d2   : > { %7926 = vst [vmem:[#allocation14_spill] sm:$0xff] %v6764_v15  ;;  %v5368_v16 = vpop.f32.mrb[28].mxu0  ;;  %5381 = vmatprep.subr.bf16.mxu1 %v6764_v15 }
 0x4d3   : > { %v2408_v17 = vpop.f32.mrb[29].mxu0 }
 0x4d4   : > { %5920 = vset.pattern.permute.xlu1 %v6152_v2  ;;  %5926 = vset.pattern.permute.xlu0 %v6154_v21  ;;  %v6769_v29 = vpack.c.bf16 %v5368_v16, %v2408_v17  ;;  %v6829_v17 = vrot.slane %v6707_v4, %v2133_v60 }
 0x4d5   : > { %1509 = vperm.xlu1 %5920, %v6680_v35   ;;  %2613 = vperm.xlu0 %5926, %v6682_v36  }
 0x4d6   : > { %7927 = vst [vmem:[#allocation15_spill] sm:$0xff] %v6769_v29  ;;  %v5371_v30 = vpop.f32.mrb[30].mxu0 }
 0x4d7   : > { %v2418_v32 = vpop.f32.mrb[31].mxu0 }
 0x4d8   : > { %v6773_v33 = vpack.c.bf16 %v5371_v30, %v2418_v32  ;;  %v2630_v30 = vsub.s32 2, %v6700_v58 }
 0x4d9   : > { %5922 = vset.pattern.permute.xlu1 %v6154_v21  ;;  %5927 = vset.pattern.permute.xlu0 %v6153_v14 }
 0x4da   : > { %7928 = vst [vmem:[#allocation16_spill] sm:$0xff] %v6773_v33  ;;  %2617 = vperm.xlu1 %5922, %v6680_v35   ;;  %3110 = vperm.xlu0 %5927, %v6682_v36   ;;  %v5374_v38 = vpop.f32.mrb[32].mxu0 }
 0x4db   : > { %v2428_v63 = vpop.f32.mrb[33].mxu0 }
 0x4dc   : > { %v6779_v3 = vpack.c.bf16 %v5374_v38, %v2428_v63 }
 0x4de   : > { %7929 = vst [vmem:[#allocation17_spill] sm:$0xff] %v6779_v3  ;;  %5923 = vset.pattern.permute.xlu1 %v6153_v14  ;;  %5929 = vset.pattern.permute.xlu0 %v6151_v1  ;;  %v5377_v5 = vpop.f32.mrb[34].mxu0 }
 0x4df   : > { %3114 = vperm.xlu1 %5923, %v6680_v35   ;;  %2128 = vperm.xlu0 %5929, %v6686_v39   ;;  %v2438_v23 = vpop.f32.mrb[35].mxu0 }
 0x4e0   : > { %v6785_v24 = vpack.c.bf16 %v5377_v5, %v2438_v23 }
 0x4e2   : > { %7930 = vst [vmem:[#allocation18_spill] sm:$0xff] %v6785_v24  ;;  %v5380_v27 = vpop.f32.mrb[36].mxu0 }
 0x4e3   : > { %5925 = vset.pattern.permute.xlu1 %v6151_v1  ;;  %5931 = vset.pattern.permute.xlu0 %v6152_v2  ;;  %v2448_v31 = vpop.f32.mrb[37].mxu0 }
 0x4e4   : > { %2116 = vperm.xlu1 %5925, %v6682_v36   ;;  %v6790_v34 = vpack.c.bf16 %v5380_v27, %v2448_v31  ;;  %1514 = vperm.xlu0 %5931, %v6688_v40  }
 0x4e6   : > { %7931 = vst [vmem:[#allocation19_spill] sm:$0xff] %v6790_v34  ;;  %v5415_v42 = vpop.f32.mrb[38].mxu0 }
 0x4e7   : > { %v2895_v43 = vpop.f32.mrb[39].mxu0 }
 0x4e8   : > { %5928 = vset.pattern.permute.xlu1 %v6152_v2  ;;  %v6794_v35 = vpack.c.bf16 %v5415_v42, %v2895_v43  ;;  %5933 = vset.pattern.permute.xlu0 %v6154_v21  ;;  %v6842_v43 = vrot.slane %v6707_v4, %v2630_v30 }
 0x4e9   : > { %1519 = vperm.xlu1 %5928, %v6686_v39   ;;  %2621 = vperm.xlu0 %5933, %v6688_v40  }
 0x4ea   : > { %7932 = vst [vmem:[#allocation20_spill] sm:$0xff] %v6794_v35  ;;  %v5418_v44 = vpop.f32.mrb[40].mxu0 }
 0x4eb   : > { %v2905_v45 = vpop.f32.mrb[41].mxu0 }
 0x4ec   : > { %v6799_v46 = vpack.c.bf16 %v5418_v44, %v2905_v45 }
 0x4ed   : > { %5930 = vset.pattern.permute.xlu1 %v6154_v21  ;;  %5935 = vset.pattern.permute.xlu0 %v6153_v14 }
 0x4ee   : > { %7933 = vst [vmem:[#allocation21_spill] sm:$0xff] %v6799_v46  ;;  %2625 = vperm.xlu1 %5930, %v6686_v39   ;;  %v5421_v36 = vpop.f32.mrb[42].mxu0 }
 0x4ef   : > { %v2915_v2 = vpop.f32.mrb[43].mxu0 }
 0x4f0   : > { %v6804_v47 = vpack.c.bf16 %v5421_v36, %v2915_v2 }
 0x4f2   : > { %7934 = vst [vmem:[#allocation22_spill] sm:$0xff] %v6804_v47  ;;  %5932 = vset.pattern.permute.xlu1 %v6151_v1  ;;  %v5424_v48 = vpop.f32.mrb[44].mxu0 }
 0x4f3   : > { %2124 = vperm.xlu1 %5932, %v6688_v40   ;;  %v2925_v49 = vpop.f32.mrb[45].mxu0 }
 0x4f4   : > { %v6808_v50 = vpack.c.bf16 %v5424_v48, %v2925_v49 }
 0x4f6   : > { %7935 = vst [vmem:[#allocation23_spill] sm:$0xff] %v6808_v50  ;;  %v5427_v51 = vpop.f32.mrb[46].mxu0 }
 0x4f7   : > { %v2935_v21 = vpop.f32.mrb[47].mxu0  ;;  %5934 = vset.pattern.permute.xlu1 %v6153_v14  ;;  %v6826_v14 = vld [vmem:[%s7865_s3 + $0x8] sm:$0xff] }
 0x4f8   : > { %v6812_v53 = vpack.c.bf16 %v5427_v51, %v2935_v21 }
 0x4fa   : > { %7936 = vst [vmem:[#allocation24_spill] sm:$0xff] %v6812_v53  ;;  %v5430_v54 = vpop.f32.mrb[48].mxu0 }
 0x4fb   : > { %v2945_v56 = vpop.f32.mrb[49].mxu0 }
 0x4fc   : > { %v6817_v1 = vpack.c.bf16 %v5430_v54, %v2945_v56 }
 0x4fe   : > { %7937 = vst [vmem:[#allocation25_spill] sm:$0xff] %v6817_v1  ;;  %v2089_v57 = vpop.permute.xlu1 %2088  ;;  %v1470_v59 = vpop.permute.xlu0 %1469 }
 0x4ff   : > { %v1527_v61 = vadd.f32 %v6815_v55, %v1470_v59  ;;  %v5465_v62 = vpop.f32.mrb[50].mxu0  ;;  %v2136_v44 = vadd.f32 %v6829_v17, %v2089_v57 }
 0x500   : > { %v3392_v7 = vpop.f32.mrb[51].mxu0 }
 0x501   : > { %v1551_v28 = vmul.f32 0.01, %v1527_v61  ;;  %v6821_v13 = vpack.c.bf16 %v5465_v62, %v3392_v7  ;;  %vm1539_vm3 = vcmp.gt.f32.partialorder %v1527_v61, 0.0  ;;  %v2160_v51 = vmul.f32 0.01, %v2136_v44 }
 0x502   : > { %v5468_v16 = vpop.f32.mrb[52].mxu0  ;;  %vm2148_vm4 = vcmp.gt.f32.partialorder %v2136_v44, 0.0 }
 0x503   : > { %7938 = vst [vmem:[#allocation26_spill] sm:$0xff] %v6821_v13  ;;  %v6832_v32 = vpop.permute.xlu1 %3082  ;;  %v2586_v38 = vpop.permute.xlu0 %2585  ;;  %v1563_v63 = vsel %vm1539_vm3, %v1527_v61, %v1551_v28 }
 0x504   : > { %v3402_v5 = vpop.f32.mrb[53].mxu0  ;;  %v6835_v23 = vadd.f32 %v1563_v63, %v6826_v14  ;;  %v2633_v52 = vadd.f32 %v6842_v43, %v2586_v38 }
 0x505   : > { %v6837_v27 = vpack.c.bf16 %v5468_v16, %v3402_v5  ;;  %v2172_v16 = vsel %vm2148_vm4, %v2136_v44, %v2160_v51 }
 0x506   : > { %v5471_v31 = vpop.f32.mrb[54].mxu0  ;;  %v1589_v42 = vsel %vm635_vm0, %v6835_v23, -inf  ;;  %v2657_v62 = vmul.f32 0.01, %v2633_v52  ;;  %vm2645_vm7 = vcmp.gt.f32.partialorder %v2633_v52, 0.0 }
 0x507   : > { %7939 = vst [vmem:[#allocation27_spill] sm:$0xff] %v6837_v27  ;;  %v3412_v58 = vpop.f32.mrb[55].mxu0 }
 0x508   : > { %v6845_v45 = vpack.c.bf16 %v5471_v31, %v3412_v58  ;;  %1590 = vmax.xlane.f32.xlu0 %v1589_v42  ;;  %v2582_v36 = vpop.permute.xlu1 %2581  ;;  %v1465_v2 = vpop.permute.xlu0 %1464  ;;  %v6859_v42 = vadd.f32 %v2172_v16, %v6826_v14  ;;  %v6864_v58 = vld [vmem:[%s7865_s3] sm:$0xff] }
 0x509   : > { %v2632_v48 = vadd.f32 %v6842_v43, %v2582_v36  ;;  %v1526_v7 = vadd.f32 %v6815_v55, %v1465_v2 }
 0x50a   : > { %7940 = vst [vmem:[#allocation28_spill] sm:$0xff] %v6845_v45  ;;  %v5474_v49 = vpop.f32.mrb[56].mxu0 }
 0x50b   : > { %v3422_v21 = vpop.f32.mrb[57].mxu0  ;;  %v2656_v59 = vmul.f32 0.01, %v2632_v48  ;;  %vm2644_vm5 = vcmp.gt.f32.partialorder %v2632_v48, 0.0  ;;  %v1550_v2 = vmul.f32 0.01, %v1526_v7 }
 0x50c   : > { %v6849_v54 = vpack.c.bf16 %v5474_v49, %v3422_v21  ;;  %v2669_v21 = vsel %vm2645_vm7, %v2633_v52, %v2657_v62  ;;  %vm1538_vm9 = vcmp.gt.f32.partialorder %v1526_v7, 0.0  ;;  %v6884_v52 = vld [vmem:[%s7865_s3 + $0x18] sm:$0xff] }
 0x50d   : > { %v2085_v4 = vpop.permute.xlu0 %2084  ;;  %v1480_v56 = vpop.permute.xlu1 %1479  ;;  %v2668_v44 = vsel %vm2644_vm5, %v2632_v48, %v2656_v59  ;;  %v2198_v48 = vsel %vm635_vm0, %v6859_v42, -inf  ;;  %v6879_v59 = vadd.f32 %v2669_v21, %v6826_v14 }
 0x50e   : > { %7941 = vst [vmem:[#allocation29_spill] sm:$0xff] %v6849_v54  ;;  %v2135_v57 = vadd.f32 %v6829_v17, %v2085_v4  ;;  %v1529_v60 = vadd.f32 %v6815_v55, %v1480_v56  ;;  %v5477_v61 = vpop.f32.mrb[58].mxu0 }
 0x50f   : > { %v3432_v28 = vpop.f32.mrb[59].mxu0 }
 0x510   : > { %v2159_v30 = vmul.f32 0.01, %v2135_v57  ;;  %v6854_v38 = vpack.c.bf16 %v5477_v61, %v3432_v28  ;;  %vm2147_vm6 = vcmp.gt.f32.partialorder %v2135_v57, 0.0  ;;  %v1553_v63 = vmul.f32 0.01, %v1529_v60 }
 0x511   : > { %vm1541_vm8 = vcmp.gt.f32.partialorder %v1529_v60, 0.0  ;;  %v6874_v28 = vadd.f32 %v2668_v44, %v6864_v58 }
 0x512   : > { %7942 = vst [vmem:[#allocation30_spill] sm:$0xff] %v6854_v38  ;;  %v6856_v5 = vpop.permute.xlu0 %3078  ;;  %v2594_v31 = vpop.permute.xlu1 %2593  ;;  %v2171_v36 = vsel %vm2147_vm6, %v2135_v57, %v2159_v30  ;;  %v1565_v57 = vsel %vm1541_vm8, %v1529_v60, %v1553_v63 }
 0x513   : > { %v5480_v49 = vpop.f32.mrb[60].mxu0  ;;  %v6867_v51 = vadd.f32 %v2171_v36, %v6864_v58  ;;  %v2635_v62 = vadd.f32 %v6842_v43, %v2594_v31  ;;  %v1562_v36 = vsel %vm1538_vm9, %v1526_v7, %v1550_v2  ;;  %v6893_v21 = vadd.f32 %v1565_v57, %v6884_v52 }
 0x514   : > { %v3442_v4 = vpop.f32.mrb[61].mxu0  ;;  %v6898_v60 = vadd.f32 %v1562_v36, %v6864_v58 }
 0x515   : > { %v6869_v56 = vpack.c.bf16 %v5480_v49, %v3442_v4  ;;  %v2195_v61 = vsel %vm635_vm0, %v6867_v51, -inf  ;;  %v2692_v49 = vsel %vm635_vm0, %v6874_v28, -inf  ;;  %v2659_v63 = vmul.f32 0.01, %v2635_v62 }
 0x516   : > { %2196 = vmax.xlane.f32.xlu0 %v2195_v61  ;;  %v2695_v61 = vsel %vm635_vm0, %v6879_v59, -inf  ;;  %vm2647_vm11 = vcmp.gt.f32.partialorder %v2635_v62, 0.0  ;;  %v1595_v57 = vsel %vm635_vm0, %v6893_v21, -inf }
 0x517   : > { %7943 = vst [vmem:[#allocation31_spill] sm:$0xff] %v6869_v56  ;;  %2199 = vmax.xlane.f32.xlu1 %v2198_v48  ;;  %v2097_v16 = vpop.permute.xlu0 %2096  ;;  %v6887_v30 = vpop.permute.xlu1 %3090 }
 0x518   : > { %v2138_v44 = vadd.f32 %v6829_v17, %v2097_v16  ;;  %v1586_v16 = vsel %vm635_vm0, %v6898_v60, -inf }
 0x51a   : > { %v2162_v4 = vmul.f32 0.01, %v2138_v44  ;;  %2693 = vmax.xlane.f32.xlu0 %v2692_v49  ;;  %vm2150_vm10 = vcmp.gt.f32.partialorder %v2138_v44, 0.0 }
 0x51b   : > { %2696 = vmax.xlane.f32.xlu1 %v2695_v61  ;;  %v2671_v61 = vsel %vm2647_vm11, %v2635_v62, %v2659_v63 }
 0x51c   : > { %v6900_v7 = vpop.permute.xlu0 %3086  ;;  %v1475_v31 = vpop.permute.xlu1 %1474  ;;  %v2174_v2 = vsel %vm2150_vm10, %v2138_v44, %v2162_v4 }
 0x51d   : > { %v1528_v48 = vadd.f32 %v6815_v55, %v1475_v31  ;;  %v6908_v36 = vadd.f32 %v2174_v2, %v6884_v52  ;;  %v6914_v31 = vadd.f32 %v2671_v61, %v6884_v52  ;;  %v6919_v2 = vld [vmem:[%s7865_s3 + $0x10] sm:$0xff] }
 0x51e   : > { %1596 = vmax.xlane.f32.xlu0 %v1595_v57 }
 0x51f   : > { %v1552_v49 = vmul.f32 0.01, %v1528_v48  ;;  %1587 = vmax.xlane.f32.xlu1 %v1586_v16  ;;  %vm1540_vm12 = vcmp.gt.f32.partialorder %v1528_v48, 0.0  ;;  %v2204_v4 = vsel %vm635_vm0, %v6908_v36, -inf  ;;  %7944 = vst [vmem:[#allocation32_spill] sm:$0xff] %v6914_v31  ;;  %v2701_v63 = vsel %vm635_vm0, %v6914_v31, -inf }
 0x521   : > { %v2093_v41 = vpop.permute.xlu1 %2092  ;;  %v2105_v37 = vpop.permute.xlu0 %2104  ;;  %v1564_v57 = vsel %vm1540_vm12, %v1528_v48, %v1552_v49 }
 0x522   : > { %v2137_v44 = vadd.f32 %v6829_v17, %v2093_v41  ;;  %v6924_v41 = vadd.f32 %v1564_v57, %v6919_v2  ;;  %v2140_v48 = vadd.f32 %v6829_v17, %v2105_v37 }
 0x523   : > { %2205 = vmax.xlane.f32.xlu1 %v2204_v4 }
 0x524   : > { %v2161_v16 = vmul.f32 0.01, %v2137_v44  ;;  %vm2149_vm13 = vcmp.gt.f32.partialorder %v2137_v44, 0.0  ;;  %vm2152_vm3 = vcmp.gt.f32.partialorder %v2140_v48, 0.0 }
 0x526   : > { %v2590_v62 = vpop.permute.xlu1 %2589  ;;  %v2173_v0 = vsel %vm2149_vm13, %v2137_v44, %v2161_v16  ;;  %v1592_v44 = vsel %vm635_vm0, %v6924_v41, -inf }
 0x527   : > { %v2634_v61 = vadd.f32 %v6842_v43, %v2590_v62  ;;  %v1485_v26 = vpop.permute.xlu0 %1484  ;;  %2702 = vmax.xlane.f32.xlu1 %v2701_v63  ;;  %v6928_v4 = vadd.f32 %v2173_v0, %v6919_v2  ;;  %v6939_v0 = vld [vmem:[%s7865_s3 + $0x20] sm:$0xff]  ;;  %v2164_v63 = vmul.f32 0.01, %v2140_v48 }
 0x528   : > { %v1530_v25 = vadd.f32 %v6815_v55, %v1485_v26 }
 0x529   : > { %v2658_v49 = vmul.f32 0.01, %v2634_v61  ;;  %v2201_v12 = vsel %vm635_vm0, %v6928_v4, -inf  ;;  %vm2646_vm14 = vcmp.gt.f32.partialorder %v2634_v61, 0.0 }
 0x52a   : > { %v1554_v18 = vmul.f32 0.01, %v1530_v25  ;;  %2202 = vmax.xlane.f32.xlu0 %v2201_v12  ;;  %vm1542_vm15 = vcmp.gt.f32.partialorder %v1530_v25, 0.0 }
 0x52b   : > { %1593 = vmax.xlane.f32.xlu1 %v1592_v44  ;;  %v2670_v57 = vsel %vm2646_vm14, %v2634_v61, %v2658_v49 }
 0x52c   : > { %v1490_v26 = vpop.permute.xlu1 %1489  ;;  %v2598_v37 = vpop.permute.xlu0 %2597  ;;  %v6942_v16 = vadd.f32 %v2670_v57, %v6919_v2  ;;  %v1566_v62 = vsel %vm1542_vm15, %v1530_v25, %v1554_v18  ;;  %v6955_v18 = vld [vmem:[%s7865_s3 + $0x28] sm:$0xff]  ;;  %v2176_v57 = vsel %vm2152_vm3, %v2140_v48, %v2164_v63 }
 0x52d   : > { %v1531_v20 = vadd.f32 %v6815_v55, %v1490_v26  ;;  %v6948_v44 = vadd.f32 %v1566_v62, %v6939_v0  ;;  %v6966_v10 = vadd.f32 %v2176_v57, %v6955_v18 }
 0x52e   : > { %v2698_v12 = vsel %vm635_vm0, %v6942_v16, -inf }
 0x52f   : > { %v1555_v61 = vmul.f32 0.01, %v1531_v20  ;;  %2699 = vmax.xlane.f32.xlu0 %v2698_v12  ;;  %vm1543_vm4 = vcmp.gt.f32.partialorder %v1531_v20, 0.0  ;;  %v1598_v62 = vsel %vm635_vm0, %v6948_v44, -inf }
 0x531   : > { %v2602_v49 = vpop.permute.xlu1 %2601  ;;  %v6950_v19 = vpop.permute.xlu0 %3094  ;;  %v1567_v25 = vsel %vm1543_vm4, %v1531_v20, %v1555_v61  ;;  %v2636_v61 = vadd.f32 %v6842_v43, %v2598_v37 }
 0x532   : > { %v2637_v26 = vadd.f32 %v6842_v43, %v2602_v49  ;;  %v6961_v22 = vadd.f32 %v1567_v25, %v6955_v18  ;;  %v2210_v49 = vsel %vm635_vm0, %v6966_v10, -inf }
 0x533   : > { %1599 = vmax.xlane.f32.xlu0 %v1598_v62  ;;  %v2660_v62 = vmul.f32 0.01, %v2636_v61  ;;  %vm2648_vm6 = vcmp.gt.f32.partialorder %v2636_v61, 0.0 }
 0x534   : > { %v2661_v12 = vmul.f32 0.01, %v2637_v26  ;;  %v1601_v8 = vsel %vm635_vm0, %v6961_v22, -inf  ;;  %vm2649_vm5 = vcmp.gt.f32.partialorder %v2637_v26, 0.0 }
 0x535   : > { %1602 = vmax.xlane.f32.xlu1 %v1601_v8 }
 0x536   : > { %v6968_v20 = vpop.permute.xlu1 %3098  ;;  %v2113_v48 = vpop.permute.xlu0 %2112  ;;  %v2673_v63 = vsel %vm2649_vm5, %v2637_v26, %v2661_v12  ;;  %v2672_v12 = vsel %vm2648_vm6, %v2636_v61, %v2660_v62 }
 0x537   : > { %v6974_v25 = vadd.f32 %v2673_v63, %v6955_v18  ;;  %v2142_v26 = vadd.f32 %v6829_v17, %v2113_v48  ;;  %v6988_v27 = vadd.f32 %v2672_v12, %v6939_v0 }
 0x539   : > { %7945 = vst [vmem:[#allocation33_spill] sm:$0xff] %v6974_v25  ;;  %2211 = vmax.xlane.f32.xlu1 %v2210_v49  ;;  %v2707_v8 = vsel %vm635_vm0, %v6974_v25, -inf  ;;  %v2166_v49 = vmul.f32 0.01, %v2142_v26  ;;  %7946 = vst [vmem:[#allocation34_spill] sm:$0xff] %v6988_v27  ;;  %vm2154_vm8 = vcmp.gt.f32.partialorder %v2142_v26, 0.0 }
 0x53a   : > { %v2704_v53 = vsel %vm635_vm0, %v6988_v27, -inf }
 0x53b   : > { %v2101_v9 = vpop.permute.xlu1 %2100  ;;  %v6976_v11 = vpop.permute.xlu0 %3106 }
 0x53c   : > { %v2139_v57 = vadd.f32 %v6829_v17, %v2101_v9 }
 0x53d   : > { %2708 = vmax.xlane.f32.xlu1 %v2707_v8 }
 0x53e   : > { %v2163_v37 = vmul.f32 0.01, %v2139_v57  ;;  %vm2151_vm7 = vcmp.gt.f32.partialorder %v2139_v57, 0.0 }
 0x540   : > { %v1500_v56 = vpop.permute.xlu1 %1499  ;;  %v1495_v63 = vpop.permute.xlu0 %1494  ;;  %v2175_v38 = vsel %vm2151_vm7, %v2139_v57, %v2163_v37  ;;  %v7000_v57 = vld [vmem:[%s7865_s3 + $0x38] sm:$0xff] }
 0x541   : > { %v1533_v54 = vadd.f32 %v6815_v55, %v1500_v56  ;;  %v1532_v45 = vadd.f32 %v6815_v55, %v1495_v63  ;;  %v6985_v9 = vadd.f32 %v2175_v38, %v6939_v0  ;;  %v6995_v56 = vld [vmem:[%s7865_s3 + $0x30] sm:$0xff]  ;;  %v2178_v63 = vsel %vm2154_vm8, %v2142_v26, %v2166_v49 }
 0x543   : > { %v1557_v48 = vmul.f32 0.01, %v1533_v54  ;;  %v1556_v8 = vmul.f32 0.01, %v1532_v45  ;;  %v2207_v61 = vsel %vm635_vm0, %v6985_v9, -inf  ;;  %vm1545_vm9 = vcmp.gt.f32.partialorder %v1533_v54, 0.0 }
 0x544   : > { %2208 = vmax.xlane.f32.xlu0 %v2207_v61  ;;  %vm1544_vm10 = vcmp.gt.f32.partialorder %v1532_v45, 0.0 }
 0x545   : > { %v2610_v62 = vpop.permute.xlu1 %2609  ;;  %v2606_v38 = vpop.permute.xlu0 %2605  ;;  %v1569_v37 = vsel %vm1545_vm9, %v1533_v54, %v1557_v48  ;;  %v1568_v12 = vsel %vm1544_vm10, %v1532_v45, %v1556_v8  ;;  %v7015_v45 = vadd.f32 %v2178_v63, %v7000_v57 }
 0x546   : > { %v2639_v13 = vadd.f32 %v6842_v43, %v2610_v62  ;;  %v7004_v61 = vadd.f32 %v1569_v37, %v7000_v57  ;;  %v2638_v1 = vadd.f32 %v6842_v43, %v2606_v38  ;;  %v7010_v50 = vadd.f32 %v1568_v12, %v6995_v56 }
 0x548   : > { %v2663_v47 = vmul.f32 0.01, %v2639_v13  ;;  %2705 = vmax.xlane.f32.xlu0 %v2704_v53  ;;  %v1607_v54 = vsel %vm635_vm0, %v7004_v61, -inf  ;;  %vm2651_vm11 = vcmp.gt.f32.partialorder %v2639_v13, 0.0  ;;  %v2662_v8 = vmul.f32 0.01, %v2638_v1 }
 0x549   : > { %1608 = vmax.xlane.f32.xlu1 %v1607_v54  ;;  %v1604_v37 = vsel %vm635_vm0, %v7010_v50, -inf  ;;  %v2216_v53 = vsel %vm635_vm0, %v7015_v45, -inf  ;;  %vm2650_vm12 = vcmp.gt.f32.partialorder %v2638_v1, 0.0 }
 0x54a   : > { %v2109_v26 = vpop.permute.xlu1 %2108  ;;  %v2121_v49 = vpop.permute.xlu0 %2120  ;;  %v2675_v48 = vsel %vm2651_vm11, %v2639_v13, %v2663_v47 }
 0x54b   : > { %v2141_v62 = vadd.f32 %v6829_v17, %v2109_v26  ;;  %v2144_v38 = vadd.f32 %v6829_v17, %v2121_v49  ;;  %v7024_v12 = vadd.f32 %v2675_v48, %v7000_v57  ;;  %v2674_v49 = vsel %vm2650_vm12, %v2638_v1, %v2662_v8  ;;  %v7042_v1 = vld [vmem:[%s7865_s3 + $0x48] sm:$0xff] }
 0x54c   : > { %1605 = vmax.xlane.f32.xlu0 %v1604_v37  ;;  %7949 = vst [vmem:[#allocation37_spill] sm:$0xff] %v7042_v1 }
 0x54d   : > { %7947 = vst [vmem:[#allocation35_spill] sm:$0xff] %v7024_v12  ;;  %v2165_v63 = vmul.f32 0.01, %v2141_v62  ;;  %2217 = vmax.xlane.f32.xlu1 %v2216_v53  ;;  %vm2153_vm13 = vcmp.gt.f32.partialorder %v2141_v62, 0.0  ;;  %v2168_v47 = vmul.f32 0.01, %v2144_v38  ;;  %v7037_v53 = vadd.f32 %v2674_v49, %v6995_v56 }
 0x54e   : > { %v2713_v37 = vsel %vm635_vm0, %v7024_v12, -inf  ;;  %vm2156_vm14 = vcmp.gt.f32.partialorder %v2144_v38, 0.0 }
 0x54f   : > { %v7026_v13 = vpop.permute.xlu1 %3102  ;;  %v1505_v54 = vpop.permute.xlu0 %1504  ;;  %v2177_v26 = vsel %vm2153_vm13, %v2141_v62, %v2165_v63  ;;  %7948 = vst [vmem:[#allocation36_spill] sm:$0xff] %v7037_v53  ;;  %v2180_v8 = vsel %vm2156_vm14, %v2144_v38, %v2168_v47  ;;  %v7054_v38 = vld [vmem:[%s7865_s3 + $0x40] sm:$0xff] }
 0x550   : > { %v1534_v46 = vadd.f32 %v6815_v55, %v1505_v54  ;;  %v7032_v35 = vadd.f32 %v2177_v26, %v6995_v56  ;;  %v7049_v49 = vadd.f32 %v2180_v8, %v7042_v1  ;;  %7950 = vst [vmem:[#allocation38_spill] sm:$0xff] %v7054_v38 }
 0x551   : > { %2714 = vmax.xlane.f32.xlu1 %v2713_v37  ;;  %v2710_v37 = vsel %vm635_vm0, %v7037_v53, -inf }
 0x552   : > { %v2213_v48 = vsel %vm635_vm0, %v7032_v35, -inf  ;;  %v1558_v34 = vmul.f32 0.01, %v1534_v46  ;;  %vm1546_vm15 = vcmp.gt.f32.partialorder %v1534_v46, 0.0  ;;  %v2222_v8 = vsel %vm635_vm0, %v7049_v49, -inf }
 0x553   : > { %2214 = vmax.xlane.f32.xlu0 %v2213_v48 }
 0x554   : > { %v1510_v62 = vpop.permute.xlu1 %1509  ;;  %v2614_v63 = vpop.permute.xlu0 %2613  ;;  %v1570_v47 = vsel %vm1546_vm15, %v1534_v46, %v1558_v34 }
 0x555   : > { %v1535_v54 = vadd.f32 %v6815_v55, %v1510_v62  ;;  %v2640_v26 = vadd.f32 %v6842_v43, %v2614_v63 }
 0x557   : > { %v1559_v48 = vmul.f32 0.01, %v1535_v54  ;;  %v2664_v24 = vmul.f32 0.01, %v2640_v26  ;;  %2711 = vmax.xlane.f32.xlu0 %v2710_v37  ;;  %vm1547_vm3 = vcmp.gt.f32.partialorder %v1535_v54, 0.0  ;;  %vm2652_vm4 = vcmp.gt.f32.partialorder %v2640_v26, 0.0 }
 0x558   : > { %v7065_v37 = vadd.f32 %v1570_v47, %v7054_v38 }
 0x559   : > { %v2618_v62 = vpop.permute.xlu1 %2617  ;;  %v7056_v3 = vpop.permute.xlu0 %3110  ;;  %v1571_v63 = vsel %vm1547_vm3, %v1535_v54, %v1559_v48  ;;  %v2676_v15 = vsel %vm2652_vm4, %v2640_v26, %v2664_v24 }
 0x55a   : > { %7951 = vst [vmem:[#allocation39_spill] sm:$0xff] %v7056_v3  ;;  %v2641_v33 = vadd.f32 %v6842_v43, %v2618_v62  ;;  %v7062_v29 = vadd.f32 %v1571_v63, %v7042_v1  ;;  %v1610_v48 = vsel %vm635_vm0, %v7065_v37, -inf  ;;  %v7074_v63 = vadd.f32 %v2676_v15, %v7054_v38 }
 0x55b   : > { %2223 = vmax.xlane.f32.xlu0 %v2222_v8 }
 0x55c   : > { %v2665_v12 = vmul.f32 0.01, %v2641_v33  ;;  %v1613_v34 = vsel %vm635_vm0, %v7062_v29, -inf  ;;  %vm2653_vm5 = vcmp.gt.f32.partialorder %v2641_v33, 0.0  ;;  %7953 = vst [vmem:[#allocation41_spill] sm:$0xff] %v7074_v63  ;;  %v2716_v26 = vsel %vm635_vm0, %v7074_v63, -inf }
 0x55d   : > { %1614 = vmax.xlane.f32.xlu1 %v1613_v34 }
 0x55e   : > { %v7069_v46 = vpop.permute.xlu1 %3114  ;;  %v2129_v54 = vpop.permute.xlu0 %2128  ;;  %v2677_v62 = vsel %vm2653_vm5, %v2641_v33, %v2665_v12  ;;  %v7089_v12 = vld [vmem:[%s7865_s3 + $0x50] sm:$0xff] }
 0x55f   : > { %7952 = vst [vmem:[#allocation40_spill] sm:$0xff] %v7069_v46  ;;  %1611 = vmax.xlane.f32.xlu0 %v1610_v48  ;;  %v7077_v47 = vadd.f32 %v2677_v62, %v7042_v1  ;;  %v2146_v15 = vadd.f32 %v6829_v17, %v2129_v54 }
 0x561   : > { %7954 = vst [vmem:[#allocation42_spill] sm:$0xff] %v7077_v47  ;;  %v2719_v24 = vsel %vm635_vm0, %v7077_v47, -inf  ;;  %vm2158_vm8 = vcmp.gt.f32.partialorder %v2146_v15, 0.0 }
 0x562   : > { %2720 = vmax.xlane.f32.xlu1 %v2719_v24 }
 0x563   : > { %v2117_v8 = vpop.permute.xlu1 %2116  ;;  %2717 = vmax.xlane.f32.xlu0 %v2716_v26  ;;  %v1515_v34 = vpop.permute.xlu0 %1514  ;;  %v2170_v26 = vmul.f32 0.01, %v2146_v15 }
 0x564   : > { %v2143_v53 = vadd.f32 %v6829_v17, %v2117_v8  ;;  %v1536_v33 = vadd.f32 %v6815_v55, %v1515_v34 }
 0x566   : > { %v2167_v48 = vmul.f32 0.01, %v2143_v53  ;;  %v1560_v62 = vmul.f32 0.01, %v1536_v33  ;;  %vm2155_vm6 = vcmp.gt.f32.partialorder %v2143_v53, 0.0  ;;  %vm1548_vm7 = vcmp.gt.f32.partialorder %v1536_v33, 0.0 }
 0x568   : > { %v1520_v24 = vpop.permute.xlu1 %1519  ;;  %v2179_v1 = vsel %vm2155_vm6, %v2143_v53, %v2167_v48  ;;  %v1572_v47 = vsel %vm1548_vm7, %v1536_v33, %v1560_v62 }
 0x569   : > { %v1537_v63 = vadd.f32 %v6815_v55, %v1520_v24  ;;  %v7093_v8 = vadd.f32 %v2179_v1, %v7054_v38  ;;  %v7096_v54 = vadd.f32 %v1572_v47, %v7089_v12  ;;  %v7105_v55 = vld [vmem:[%s7865_s3 + $0x58] sm:$0xff]  ;;  %v2182_v47 = vsel %vm2158_vm8, %v2146_v15, %v2170_v26 }
 0x56a   : > { %7955 = vst [vmem:[#allocation43_spill] sm:$0xff] %v7105_v55  ;;  %v7113_v62 = vadd.f32 %v2182_v47, %v7105_v55 }
 0x56b   : > { %v1561_v34 = vmul.f32 0.01, %v1537_v63  ;;  %v2219_v25 = vsel %vm635_vm0, %v7093_v8, -inf  ;;  %v1616_v46 = vsel %vm635_vm0, %v7096_v54, -inf  ;;  %vm1549_vm9 = vcmp.gt.f32.partialorder %v1537_v63, 0.0 }
 0x56c   : > { %2220 = vmax.xlane.f32.xlu1 %v2219_v25  ;;  %1617 = vmax.xlane.f32.xlu0 %v1616_v46  ;;  %v2228_v24 = vsel %vm635_vm0, %v7113_v62, -inf }
 0x56d   : > { %v2626_v53 = vpop.permute.xlu1 %2625  ;;  %v1573_v1 = vsel %vm1549_vm9, %v1537_v63, %v1561_v34  ;;  %v2622_v34 = vpop.permute.xlu0 %2621 }
 0x56e   : > { %v7108_v33 = vadd.f32 %v1573_v1, %v7105_v55  ;;  %v3130_v1 = vadd.f32 %v6710_v6, %v6832_v32 }
 0x570   : > { %v1619_v48 = vsel %vm635_vm0, %v7108_v33, -inf  ;;  %vm3142_vm13 = vcmp.gt.f32.partialorder %v3130_v1, 0.0 }
 0x571   : > { %1620 = vmax.xlane.f32.xlu1 %v1619_v48 }
 0x572   : > { %v2125_v25 = vpop.permute.xlu1 %2124 }
 0x573   : > { %v2145_v46 = vadd.f32 %v6829_v17, %v2125_v25  ;;  %v2643_v17 = vadd.f32 %v6842_v43, %v2626_v53  ;;  %v3154_v25 = vmul.f32 0.01, %v3130_v1 }
 0x575   : > { %v2169_v38 = vmul.f32 0.01, %v2145_v46  ;;  %2229 = vmax.xlane.f32.xlu1 %v2228_v24  ;;  %vm2157_vm10 = vcmp.gt.f32.partialorder %v2145_v46, 0.0  ;;  %v2667_v47 = vmul.f32 0.01, %v2643_v17  ;;  %vm2655_vm11 = vcmp.gt.f32.partialorder %v2643_v17, 0.0 }
 0x576   : > { %v3132_v24 = vadd.f32 %v6710_v6, %v6887_v30  ;;  %v3166_v3 = vsel %vm3142_vm13, %v3130_v1, %v3154_v25 }
 0x577   : > { %v2181_v63 = vsel %vm2157_vm10, %v2145_v46, %v2169_v38  ;;  %v3129_v38 = vadd.f32 %v6710_v6, %v6856_v5 }
 0x578   : > { %v7119_v15 = vadd.f32 %v2181_v63, %v7089_v12  ;;  %v3156_v5 = vmul.f32 0.01, %v3132_v24  ;;  %vm3144_vm14 = vcmp.gt.f32.partialorder %v3132_v24, 0.0 }
 0x579   : > { %v3153_v46 = vmul.f32 0.01, %v3129_v38  ;;  %vm3141_vm12 = vcmp.gt.f32.partialorder %v3129_v38, 0.0 }
 0x57a   : > { %v2225_v26 = vsel %vm635_vm0, %v7119_v15, -inf }
 0x57b   : > { %2226 = vmax.xlane.f32.xlu0 %v2225_v26  ;;  %v3134_v26 = vadd.f32 %v6710_v6, %v6968_v20  ;;  %v3165_v27 = vsel %vm3141_vm12, %v3129_v38, %v3153_v46  ;;  %v7153_v20 = vadd.f32 %v3166_v3, %v6826_v14  ;;  %v3136_v38 = vadd.f32 %v6710_v6, %v6976_v11 }
 0x57d   : > { %v3158_v1 = vmul.f32 0.01, %v3134_v26  ;;  %vm3146_vm3 = vcmp.gt.f32.partialorder %v3134_v26, 0.0  ;;  %v3192_v14 = vsel %vm635_vm0, %v7153_v20, -inf  ;;  %vm3148_vm5 = vcmp.gt.f32.partialorder %v3136_v38, 0.0 }
 0x586   : > { %3118 = vperm.xlu1 %5934, %v6688_v40   ;;  %v2679_v40 = vsel %vm2655_vm11, %v2643_v17, %v2667_v47 }
 0x587   : > { %v7137_v63 = vadd.f32 %v2679_v40, %v7105_v55  ;;  %v7150_v55 = vadd.f32 %v3165_v27, %v6864_v58 }
 0x589   : > { %v2725_v40 = vsel %vm635_vm0, %v7137_v63, -inf  ;;  %v3189_v3 = vsel %vm635_vm0, %v7150_v55, -inf }
 0x591   : > { %3122 = vperm.xlu0 %5935, %v6686_v39   ;;  %v3131_v39 = vadd.f32 %v6710_v6, %v6900_v7  ;;  %v2642_v7 = vadd.f32 %v6842_v43, %v2622_v34  ;;  %v3168_v43 = vsel %vm3144_vm14, %v3132_v24, %v3156_v5  ;;  %v3160_v24 = vmul.f32 0.01, %v3136_v38 }
 0x592   : > { %v7165_v11 = vadd.f32 %v3168_v43, %v6884_v52 }
 0x593   : > { %v3155_v31 = vmul.f32 0.01, %v3131_v39  ;;  %vm3143_vm15 = vcmp.gt.f32.partialorder %v3131_v39, 0.0  ;;  %vm2654_vm4 = vcmp.gt.f32.partialorder %v2642_v7, 0.0 }
 0x595   : > { %v1591_v48 = vpop.xlane.xlu0 %1590  ;;  %v3167_v34 = vsel %vm3143_vm15, %v3131_v39, %v3155_v31 }
 0x596   : > { %v1623_v17 = vsub.f32 %v6835_v23, %v1591_v48  ;;  %v3133_v23 = vadd.f32 %v6710_v6, %v6950_v19  ;;  %v2666_v48 = vmul.f32 0.01, %v2642_v7  ;;  %v7169_v31 = vadd.f32 %v3167_v34, %v6919_v2 }
 0x598   : > { %v1636_v25 = vmul.f32 1.442695, %v1623_v17  ;;  %v3157_v39 = vmul.f32 0.01, %v3133_v23  ;;  %vm3145_vm6 = vcmp.gt.f32.partialorder %v3133_v23, 0.0  ;;  %v3195_v43 = vsel %vm635_vm0, %v7169_v31, -inf }
 0x59a   : > { %5948 = vpow2.f32 %v1636_v25  ;;  %v3169_v34 = vsel %vm3145_vm6, %v3133_v23, %v3157_v39 }
 0x5a3   : > { %v7134_v53 = vpop.xlane.xlu0 %2196 }
 0x5a4   : > { %v2200_v32 = vpop.xlane.xlu1 %2199 }
 0x5a5   : > { %v2232_v46 = vsub.f32 %v6859_v42, %v2200_v32  ;;  %v3170_v42 = vsel %vm3146_vm3, %v3134_v26, %v3158_v1  ;;  %v3135_v32 = vadd.f32 %v6710_v6, %v7026_v13  ;;  %v2231_v26 = vsub.f32 %v6867_v51, %v7134_v53 }
 0x5a6   : > { %v7177_v2 = vadd.f32 %v3170_v42, %v6955_v18  ;;  %v3172_v13 = vsel %vm3148_vm5, %v3136_v38, %v3160_v24  ;;  %v7202_v24 = vpop.eup %5948 }
 0x5a7   : > { %v7141_v30 = vpop.xlane.xlu0 %2693  ;;  %v2245_v5 = vmul.f32 1.442695, %v2232_v46  ;;  %v7192_v53 = vadd.f32 %v3172_v13, %v7000_v57  ;;  %vm3147_vm7 = vcmp.gt.f32.partialorder %v3135_v32, 0.0  ;;  %v2243_v38 = vmul.f32 1.442695, %v2231_v26 }
 0x5a8   : > { %v7145_v47 = vpop.xlane.xlu1 %2696  ;;  %v3204_v51 = vsel %vm635_vm0, %v7177_v2, -inf }
 0x5a9   : > { %5950 = vpow2.f32 %v2245_v5  ;;  %v3210_v57 = vsel %vm635_vm0, %v7192_v53, -inf }
 0x5aa   : > { %2726 = vmax.xlane.f32.xlu1 %v2725_v40  ;;  %v2678_v40 = vsel %vm2654_vm4, %v2642_v7, %v2666_v48  ;;  %v3159_v7 = vmul.f32 0.01, %v3135_v32 }
 0x5ab   : > { %v1597_v58 = vpop.xlane.xlu0 %1596 }
 0x5ac   : > { %v1588_v27 = vpop.xlane.xlu1 %1587  ;;  %v1625_v52 = vsub.f32 %v6893_v21, %v1597_v58  ;;  %v7184_v21 = vadd.f32 %v2678_v40, %v7089_v12 }
 0x5ad   : > { %v1622_v19 = vsub.f32 %v6898_v60, %v1588_v27  ;;  %v3198_v60 = vsel %vm635_vm0, %v7165_v11, -inf  ;;  %v7197_v27 = vadd.f32 %v3169_v34, %v6939_v0 }
 0x5ae   : > { %3190 = vmax.xlane.f32.xlu1 %v3189_v3  ;;  %v1640_v48 = vmul.f32 1.442695, %v1625_v52  ;;  %v2722_v23 = vsel %vm635_vm0, %v7184_v21, -inf  ;;  %v3171_v3 = vsel %vm3147_vm7, %v3135_v32, %v3159_v7 }
 0x5af   : > { %v1634_v1 = vmul.f32 1.442695, %v1622_v19  ;;  %v3201_v0 = vsel %vm635_vm0, %v7197_v27, -inf  ;;  %v7208_v39 = vadd.f32 %v3171_v3, %v6995_v56 }
 0x5b0   : > { %v2206_v17 = vpop.xlane.xlu1 %2205  ;;  %3193 = vmax.xlane.f32.xlu0 %v3192_v14 }
 0x5b1   : > { %v2234_v25 = vsub.f32 %v6908_v36, %v2206_v17  ;;  %5952 = vpow2.f32 %v1634_v1 }
 0x5b2   : > { %3199 = vmax.xlane.f32.xlu1 %v3198_v60  ;;  %5954 = vpow2.f32 %v1640_v48 }
 0x5b3   : > { %v2249_v36 = vmul.f32 1.442695, %v2234_v25  ;;  %5956 = vpow2.f32 %v2243_v38  ;;  %v7214_v5 = vpop.eup %5950 }
 0x5b4   : > { %v7187_v18 = vpop.xlane.xlu1 %2702  ;;  %3196 = vmax.xlane.f32.xlu0 %v3195_v43  ;;  %v2270_v60 = vsel %vm635_vm0, %v7214_v5, 0.0 }
 0x5b5   : > { %5958 = vpow2.f32 %v2249_v36 }
 0x5b6   : > { %3205 = vmax.xlane.f32.xlu1 %v3204_v51 }
 0x5b7   : > { %v2203_v46 = vpop.xlane.xlu0 %2202 }
 0x5b8   : > { %v1594_v58 = vpop.xlane.xlu1 %1593  ;;  %2723 = vmax.xlane.f32.xlu0 %v2722_v23  ;;  %v2233_v19 = vsub.f32 %v6928_v4, %v2203_v46  ;;  %v3207_v4 = vsel %vm635_vm0, %v7208_v39, -inf }
 0x5b9   : > { %v1624_v14 = vsub.f32 %v6924_v41, %v1594_v58  ;;  %v1661_v41 = vsel %vm635_vm0, %v7202_v24, 0.0 }
 0x5ba   : > { %3211 = vmax.xlane.f32.xlu1 %v3210_v57  ;;  %v2247_v52 = vmul.f32 1.442695, %v2233_v19 }
 0x5bb   : > { %v1638_v42 = vmul.f32 1.442695, %v1624_v14  ;;  %v7218_v17 = vpop.eup %5952 }
 0x5bc   : > { %3202 = vmax.xlane.f32.xlu0 %v3201_v0  ;;  %v7210_v32 = vpop.xlane.xlu0 %2699  ;;  %v7223_v26 = vpop.eup %5954  ;;  %v1658_v34 = vsel %vm635_vm0, %v7218_v17, 0.0 }
 0x5bd   : > { %5960 = vpow2.f32 %v1638_v42  ;;  %v7228_v7 = vpop.eup %5956 }
 0x5be   : > { %1662 = vadd.xlane.f32.xlu1 %v1661_v41  ;;  %5962 = vpow2.f32 %v2247_v52  ;;  %v2267_v51 = vsel %vm635_vm0, %v7228_v7, 0.0 }
 0x5bf   : > { %v7232_v25 = vpop.eup %5958 }
 0x5c0   : > { %3208 = vmax.xlane.f32.xlu0 %v3207_v4  ;;  %v1600_v56 = vpop.xlane.xlu0 %1599 }
 0x5c1   : > { %v1626_v40 = vsub.f32 %v6948_v44, %v1600_v56  ;;  %v1667_v44 = vsel %vm635_vm0, %v7223_v26, 0.0 }
 0x5c2   : > { %v1603_v1 = vpop.xlane.xlu1 %1602  ;;  %2271 = vadd.xlane.f32.xlu1 %v2270_v60 }
 0x5c3   : > { %v1642_v13 = vmul.f32 1.442695, %v1626_v40  ;;  %v1627_v43 = vsub.f32 %v6961_v22, %v1603_v1  ;;  %v2276_v22 = vsel %vm635_vm0, %v7232_v25, 0.0 }
 0x5c4   : > { %1659 = vadd.xlane.f32.xlu0 %v1658_v34 }
 0x5c5   : > { %v1644_v48 = vmul.f32 1.442695, %v1627_v43  ;;  %5964 = vpow2.f32 %v1642_v13 }
 0x5c6   : > { %1668 = vadd.xlane.f32.xlu1 %v1667_v44  ;;  %v2212_v36 = vpop.xlane.xlu1 %2211 }
 0x5c7   : > { %5966 = vpow2.f32 %v1644_v48  ;;  %v7236_v38 = vpop.eup %5960 }
 0x5c8   : > { %2268 = vadd.xlane.f32.xlu0 %v2267_v51  ;;  %v1664_v23 = vsel %vm635_vm0, %v7236_v38, 0.0  ;;  %v7242_v46 = vpop.eup %5962 }
 0x5c9   : > { %v2273_v58 = vsel %vm635_vm0, %v7242_v46, 0.0 }
 0x5ca   : > { %2277 = vadd.xlane.f32.xlu1 %v2276_v22  ;;  %v7250_v19 = vpop.xlane.xlu1 %2708 }
 0x5cc   : > { %1665 = vadd.xlane.f32.xlu0 %v1664_v23 }
 0x5cf   : > { %v7246_v3 = vpop.eup %5964 }
 0x5d0   : > { %2274 = vadd.xlane.f32.xlu0 %v2273_v58  ;;  %v1670_v0 = vsel %vm635_vm0, %v7246_v3, 0.0 }
 0x5d1   : > { %v7248_v14 = vpop.eup %5966  ;;  %v2209_v57 = vpop.xlane.xlu0 %2208 }
 0x5d2   : > { %v1673_v42 = vsel %vm635_vm0, %v7248_v14, 0.0 }
 0x5d3   : > { %1674 = vadd.xlane.f32.xlu1 %v1673_v42 }
 0x5d4   : > { %1671 = vadd.xlane.f32.xlu0 %v1670_v0 }
 0x5d5   : > { %v7256_v41 = vpop.xlane.xlu0 %2705 }
 0x5d6   : > { %v1609_v52 = vpop.xlane.xlu1 %1608 }
 0x5d7   : > { %v1629_v4 = vsub.f32 %v7004_v61, %v1609_v52 }
 0x5d9   : > { %v1648_v56 = vmul.f32 1.442695, %v1629_v4  ;;  %v1606_v40 = vpop.xlane.xlu0 %1605 }
 0x5da   : > { %v1628_v60 = vsub.f32 %v7010_v50, %v1606_v40  ;;  %v2218_v13 = vpop.xlane.xlu1 %2217 }
 0x5db   : > { %5968 = vpow2.f32 %v1648_v56 }
 0x5dc   : > { %v1646_v1 = vmul.f32 1.442695, %v1628_v60 }
 0x5de   : > { %5970 = vpow2.f32 %v1646_v1  ;;  %v7264_v44 = vpop.xlane.xlu1 %2714  ;;  %v2235_v1 = vsub.f32 %v6985_v9, %v2209_v57 }
 0x5e0   : > { %v2215_v43 = vpop.xlane.xlu0 %2214 }
 0x5e4   : > { %v7260_v34 = vpop.xlane.xlu0 %2711 }
 0x5e5   : > { %v7262_v48 = vpop.eup %5968 }
 0x5e6   : > { %7956 = vst [vmem:[#allocation44_spill] sm:$0xff] %v7262_v48  ;;  %v1679_v51 = vsel %vm635_vm0, %v7262_v48, 0.0 }
 0x5e7   : > { %1680 = vadd.xlane.f32.xlu1 %v1679_v51 }
 0x5e8   : > { %v7268_v61 = vpop.eup %5970  ;;  %v2224_v22 = vpop.xlane.xlu0 %2223 }
 0x5e9   : > { %v1676_v50 = vsel %vm635_vm0, %v7268_v61, 0.0 }
 0x5ea   : > { %v1615_v23 = vpop.xlane.xlu1 %1614  ;;  %1677 = vadd.xlane.f32.xlu0 %v1676_v50 }
 0x5eb   : > { %v1631_v58 = vsub.f32 %v7062_v29, %v1615_v23 }
 0x5ec   : > { %v1612_v42 = vpop.xlane.xlu0 %1611 }
 0x5ed   : > { %v1652_v0 = vmul.f32 1.442695, %v1631_v58  ;;  %v1630_v52 = vsub.f32 %v7065_v37, %v1612_v42  ;;  %v2236_v37 = vsub.f32 %v6966_v10, %v2212_v36  ;;  %v2728_v36 = vsub.f32 %v6874_v28, %v7141_v30 }
 0x5ef   : > { %5972 = vpow2.f32 %v1652_v0  ;;  %v1650_v4 = vmul.f32 1.442695, %v1630_v52  ;;  %v7274_v56 = vpop.xlane.xlu1 %2720  ;;  %v2251_v0 = vmul.f32 1.442695, %v2235_v1  ;;  %v2237_v52 = vsub.f32 %v7032_v35, %v2215_v43 }
 0x5f0   : > { %v7276_v40 = vpop.xlane.xlu0 %2717  ;;  %v2253_v57 = vmul.f32 1.442695, %v2236_v37  ;;  %v2240_v35 = vsub.f32 %v7049_v49, %v2224_v22  ;;  %v2729_v49 = vsub.f32 %v6879_v59, %v7145_v47  ;;  %v7957_v47 = vld [vmem:[#allocation32_spill] sm:$0xff] }
 0x5f1   : > { %5974 = vpow2.f32 %v1650_v4  ;;  %v2255_v4 = vmul.f32 1.442695, %v2237_v52 }
 0x5f2   : > { %v2742_v59 = vmul.f32 1.442695, %v2729_v49 }
 0x5f9   : > { %v7278_v60 = vpop.eup %5972  ;;  %v2221_v51 = vpop.xlane.xlu1 %2220 }
 0x5fa   : > { %v1618_v48 = vpop.xlane.xlu0 %1617  ;;  %v1685_v29 = vsel %vm635_vm0, %v7278_v60, 0.0 }
 0x5fb   : > { %v1632_v50 = vsub.f32 %v7096_v54, %v1618_v48  ;;  %v7284_v23 = vpop.eup %5974  ;;  %1686 = vadd.xlane.f32.xlu1 %v1685_v29  ;;  %v2238_v48 = vsub.f32 %v7015_v45, %v2218_v13  ;;  %v2239_v29 = vsub.f32 %v7093_v8, %v2221_v51  ;;  %v2730_v45 = vsub.f32 %v6942_v16, %v7210_v32 }
 0x5fc   : > { %v1682_v42 = vsel %vm635_vm0, %v7284_v23, 0.0  ;;  %v2261_v8 = vmul.f32 1.442695, %v2240_v35  ;;  %v7958_v35 = vld [vmem:[#allocation39_spill] sm:$0xff] }
 0x5fd   : > { %v1654_v58 = vmul.f32 1.442695, %v1632_v50  ;;  %1683 = vadd.xlane.f32.xlu0 %v1682_v42  ;;  %v2257_v1 = vmul.f32 1.442695, %v2238_v48  ;;  %v2259_v43 = vmul.f32 1.442695, %v2239_v29 }
 0x5fe   : > { %v1621_v9 = vpop.xlane.xlu1 %1620  ;;  %v2744_v22 = vmul.f32 1.442695, %v2730_v45 }
 0x5ff   : > { %5976 = vpow2.f32 %v1654_v58  ;;  %v1633_v54 = vsub.f32 %v7108_v33, %v1621_v9  ;;  %v2740_v33 = vmul.f32 1.442695, %v2728_v36  ;;  %v2731_v9 = vsub.f32 %v7957_v47, %v7187_v18  ;;  %v7962_v47 = vld [vmem:[#allocation36_spill] sm:$0xff] }
 0x600   : > { %5978 = vpow2.f32 %v2251_v0 }
 0x601   : > { %v1656_v10 = vmul.f32 1.442695, %v1633_v54  ;;  %v2746_v29 = vmul.f32 1.442695, %v2731_v9  ;;  %v2734_v9 = vsub.f32 %v7962_v47, %v7260_v34  ;;  %v7963_v34 = vld [vmem:[#allocation35_spill] sm:$0xff] }
 0x602   : > { %v2230_v50 = vpop.xlane.xlu1 %2229 }
 0x603   : > { %5980 = vpow2.f32 %v1656_v10  ;;  %v2242_v51 = vsub.f32 %v7113_v62, %v2230_v50 }
 0x604   : > { %5982 = vpow2.f32 %v2253_v57 }
 0x605   : > { %5984 = vpow2.f32 %v2255_v4  ;;  %v2265_v32 = vmul.f32 1.442695, %v2242_v51 }
 0x606   : > { %5986 = vpow2.f32 %v2257_v1  ;;  %v3119_v50 = vpop.permute.xlu1 %3118 }
 0x607   : > { %5988 = vpow2.f32 %v2259_v43  ;;  %v3137_v43 = vadd.f32 %v6710_v6, %v7958_v35 }
 0x608   : > { %v2227_v37 = vpop.xlane.xlu0 %2226  ;;  %5990 = vpow2.f32 %v2740_v33  ;;  %v7959_v33 = vld [vmem:[#allocation34_spill] sm:$0xff] }
 0x609   : > { %v7298_v13 = vpop.eup %5976  ;;  %5992 = vpow2.f32 %v2261_v8  ;;  %v2241_v58 = vsub.f32 %v7119_v15, %v2227_v37  ;;  %v2732_v45 = vsub.f32 %v7959_v33, %v7256_v41  ;;  %v3161_v49 = vmul.f32 0.01, %v3137_v43  ;;  %v7961_v41 = vld [vmem:[#allocation33_spill] sm:$0xff] }
 0x60a   : > { %v1688_v28 = vsel %vm635_vm0, %v7298_v13, 0.0  ;;  %v7303_v30 = vpop.eup %5978  ;;  %5994 = vpow2.f32 %v2744_v22  ;;  %v7960_v22 = vld [vmem:[#allocation40_spill] sm:$0xff]  ;;  %vm3149_vm8 = vcmp.gt.f32.partialorder %v3137_v43, 0.0  ;;  %v2735_v33 = vsub.f32 %v7963_v34, %v7264_v44  ;;  %v7967_v34 = vld [vmem:[#allocation37_spill] sm:$0xff] }
 0x60b   : > { %1689 = vadd.xlane.f32.xlu0 %v1688_v28  ;;  %v2279_v62 = vsel %vm635_vm0, %v7303_v30, 0.0  ;;  %5996 = vpow2.f32 %v2265_v32  ;;  %v2263_v54 = vmul.f32 1.442695, %v2241_v58  ;;  %v3138_v32 = vadd.f32 %v6710_v6, %v7960_v22 }
 0x60c   : > { %5998 = vpow2.f32 %v2742_v59  ;;  %v3139_v58 = vadd.f32 %v6710_v6, %v3119_v50  ;;  %v2748_v59 = vmul.f32 1.442695, %v2732_v45  ;;  %v2752_v45 = vmul.f32 1.442695, %v2734_v9 }
 0x60d   : > { %v7307_v16 = vpop.eup %5980  ;;  %6000 = vpow2.f32 %v2263_v54  ;;  %vm3150_vm9 = vcmp.gt.f32.partialorder %v3138_v32, 0.0 }
 0x60e   : > { %v7310_v42 = vpop.eup %5982  ;;  %v1691_v0 = vsel %vm635_vm0, %v7307_v16, 0.0  ;;  %6002 = vpow2.f32 %v2746_v29  ;;  %vm3151_vm10 = vcmp.gt.f32.partialorder %v3139_v58, 0.0 }
 0x60f   : > { %v7316_v52 = vpop.eup %5984  ;;  %2280 = vadd.xlane.f32.xlu0 %v2279_v62  ;;  %1692 = vadd.xlane.f32.xlu1 %v1691_v0  ;;  %v2282_v48 = vsel %vm635_vm0, %v7310_v42, 0.0  ;;  %v2733_v62 = vsub.f32 %v7961_v41, %v7250_v19  ;;  %v3173_v19 = vsel %vm3149_vm8, %v3137_v43, %v3161_v49  ;;  %6004 = vpow2.f32 %v2748_v59  ;;  %v7965_v41 = vld [vmem:[#allocation38_spill] sm:$0xff] }
 0x610   : > { %v7320_v15 = vpop.eup %5986  ;;  %v2285_v57 = vsel %vm635_vm0, %v7316_v52, 0.0  ;;  %v3123_v0 = vpop.permute.xlu0 %3122  ;;  %v2754_v59 = vmul.f32 1.442695, %v2735_v33 }
 0x611   : > { %v7326_v4 = vpop.eup %5988  ;;  %v2288_v36 = vsel %vm635_vm0, %v7320_v15, 0.0  ;;  %v3140_v35 = vadd.f32 %v6710_v6, %v3123_v0  ;;  %v2750_v50 = vmul.f32 1.442695, %v2733_v62  ;;  %v7373_v0 = vadd.f32 %v3173_v19, %v7965_v41 }
 0x612   : > { %v7328_v10 = vpop.eup %5990  ;;  %v2291_v18 = vsel %vm635_vm0, %v7326_v4, 0.0 }
 0x613   : > { %2286 = vadd.xlane.f32.xlu0 %v2285_v57  ;;  %2283 = vadd.xlane.f32.xlu1 %v2282_v48  ;;  %v7334_v1 = vpop.eup %5992  ;;  %v2764_v51 = vsel %vm635_vm0, %v7328_v10, 0.0  ;;  %v3164_v49 = vmul.f32 0.01, %v3140_v35  ;;  %6006 = vpow2.f32 %v2750_v50  ;;  %vm3152_vm11 = vcmp.gt.f32.partialorder %v3140_v35, 0.0  ;;  %v7968_v50 = vld [vmem:[#allocation43_spill] sm:$0xff] }
 0x614   : > { %v7340_v8 = vpop.eup %5994  ;;  %v2294_v37 = vsel %vm635_vm0, %v7334_v1, 0.0  ;;  %6008 = vpow2.f32 %v2752_v45 }
 0x615   : > { %v7346_v28 = vpop.eup %5996  ;;  %v2770_v57 = vsel %vm635_vm0, %v7340_v8, 0.0  ;;  %6010 = vpow2.f32 %v2754_v59 }
 0x616   : > { %v7355_v54 = vpop.eup %5998  ;;  %v2300_v48 = vsel %vm635_vm0, %v7346_v28, 0.0 }
 0x617   : > { %2292 = vadd.xlane.f32.xlu0 %v2291_v18  ;;  %2289 = vadd.xlane.f32.xlu1 %v2288_v36  ;;  %v7361_v29 = vpop.eup %6000  ;;  %v3162_v18 = vmul.f32 0.01, %v3138_v32  ;;  %v3163_v36 = vmul.f32 0.01, %v3139_v58  ;;  %v2767_v6 = vsel %vm635_vm0, %v7355_v54, 0.0 }
 0x618   : > { %v2297_v22 = vsel %vm635_vm0, %v7361_v29, 0.0  ;;  %v7375_v43 = vpop.eup %6002 }
 0x619   : > { %v3175_v44 = vsel %vm3151_vm10, %v3139_v58, %v3163_v36  ;;  %v3174_v62 = vsel %vm3150_vm9, %v3138_v32, %v3162_v18  ;;  %v3176_v32 = vsel %vm3152_vm11, %v3140_v35, %v3164_v49 }
 0x61a   : > { %v7384_v19 = vadd.f32 %v3175_v44, %v7089_v12  ;;  %v7387_v58 = vadd.f32 %v3174_v62, %v7967_v34  ;;  %v7394_v33 = vadd.f32 %v3176_v32, %v7968_v50  ;;  %v7396_v12 = vpop.eup %6004 }
 0x61b   : > { %2765 = vadd.xlane.f32.xlu0 %v2764_v51  ;;  %2295 = vadd.xlane.f32.xlu1 %v2294_v37  ;;  %v7964_v51 = vld [vmem:[#allocation41_spill] sm:$0xff]  ;;  %v2776_v35 = vsel %vm635_vm0, %v7396_v12, 0.0 }
 0x61c   : > { %v2736_v37 = vsub.f32 %v7964_v51, %v7276_v40  ;;  %v7966_v40 = vld [vmem:[#allocation42_spill] sm:$0xff]  ;;  %v3216_v36 = vsel %vm635_vm0, %v7387_v58, -inf  ;;  %v3222_v51 = vsel %vm635_vm0, %v7394_v33, -inf }
 0x61d   : > { %v2737_v47 = vsub.f32 %v7966_v40, %v7274_v56  ;;  %v3219_v56 = vsel %vm635_vm0, %v7384_v19, -inf  ;;  %v7398_v45 = vpop.eup %6006 }
 0x61e   : > { %v2756_v9 = vmul.f32 1.442695, %v2736_v37  ;;  %v7404_v37 = vpop.eup %6008  ;;  %v2779_v41 = vsel %vm635_vm0, %v7398_v45, 0.0 }
 0x61f   : > { %2771 = vadd.xlane.f32.xlu0 %v2770_v57  ;;  %2301 = vadd.xlane.f32.xlu1 %v2300_v48  ;;  %v3213_v57 = vsel %vm635_vm0, %v7373_v0, -inf  ;;  %v2773_v48 = vsel %vm635_vm0, %v7375_v43, 0.0  ;;  %v2758_v18 = vmul.f32 1.442695, %v2737_v47 }
 0x620   : > { %6012 = vpow2.f32 %v2756_v9 }
 0x621   : > { %6014 = vpow2.f32 %v2758_v18 }
 0x623   : > { %2298 = vadd.xlane.f32.xlu0 %v2297_v22  ;;  %2768 = vadd.xlane.f32.xlu1 %v2767_v6  ;;  %v7406_v22 = vpop.eup %6010  ;;  %v2782_v6 = vsel %vm635_vm0, %v7404_v37, 0.0 }
 0x624   : > { %v2785_v62 = vsel %vm635_vm0, %v7406_v22, 0.0 }
 0x627   : > { %3214 = vmax.xlane.f32.xlu0 %v3213_v57  ;;  %2774 = vadd.xlane.f32.xlu1 %v2773_v48 }
 0x62a   : > { %v7412_v49 = vpop.eup %6012 }
 0x62b   : > { %3220 = vmax.xlane.f32.xlu0 %v3219_v56  ;;  %3217 = vmax.xlane.f32.xlu1 %v3216_v36  ;;  %v2788_v44 = vsel %vm635_vm0, %v7412_v49, 0.0  ;;  %v7418_v59 = vpop.eup %6014 }
 0x62c   : > { %v2791_v57 = vsel %vm635_vm0, %v7418_v59, 0.0 }
 0x62f   : > { %2777 = vadd.xlane.f32.xlu0 %v2776_v35  ;;  %3223 = vmax.xlane.f32.xlu1 %v3222_v51 }
 0x633   : > { %2783 = vadd.xlane.f32.xlu0 %v2782_v6  ;;  %2780 = vadd.xlane.f32.xlu1 %v2779_v41 }
 0x637   : > { %2789 = vadd.xlane.f32.xlu0 %v2788_v44  ;;  %v2727_v40 = vpop.xlane.xlu1 %2726  ;;  %2786 = vadd.xlane.f32.xlu1 %v2785_v62 }
 0x638   : > { %v2739_v47 = vsub.f32 %v7137_v63, %v2727_v40 }
 0x63a   : > { %v2762_v9 = vmul.f32 1.442695, %v2739_v47 }
 0x63b   : > { %v3191_v48 = vpop.xlane.xlu1 %3190  ;;  %2792 = vadd.xlane.f32.xlu1 %v2791_v57 }
 0x63c   : > { %6016 = vpow2.f32 %v2762_v9  ;;  %v3225_v51 = vsub.f32 %v7150_v55, %v3191_v48 }
 0x63d   : > { %v3194_v34 = vpop.xlane.xlu0 %3193 }
 0x63e   : > { %v3226_v32 = vsub.f32 %v7153_v20, %v3194_v34  ;;  %v3237_v20 = vmul.f32 1.442695, %v3225_v51 }
 0x63f   : > { %v3200_v18 = vpop.xlane.xlu1 %3199 }
 0x640   : > { %v3239_v56 = vmul.f32 1.442695, %v3226_v32  ;;  %v3228_v36 = vsub.f32 %v7165_v11, %v3200_v18 }
 0x641   : > { %v3197_v50 = vpop.xlane.xlu0 %3196 }
 0x642   : > { %6018 = vpow2.f32 %v3239_v56  ;;  %v3243_v35 = vmul.f32 1.442695, %v3228_v36  ;;  %v3227_v9 = vsub.f32 %v7169_v31, %v3197_v50 }
 0x643   : > { %v3206_v63 = vpop.xlane.xlu1 %3205 }
 0x644   : > { %6020 = vpow2.f32 %v3243_v35  ;;  %v3230_v6 = vsub.f32 %v7177_v2, %v3206_v63  ;;  %v3241_v18 = vmul.f32 1.442695, %v3227_v9 }
 0x645   : > { %v2724_v41 = vpop.xlane.xlu0 %2723 }
 0x646   : > { %v7427_v44 = vpop.eup %6016  ;;  %v3247_v62 = vmul.f32 1.442695, %v3230_v6  ;;  %v2738_v40 = vsub.f32 %v7184_v21, %v2724_v41 }
 0x647   : > { %v3212_v47 = vpop.xlane.xlu1 %3211  ;;  %v2797_v11 = vsel %vm635_vm0, %v7427_v44, 0.0 }
 0x648   : > { %6022 = vpow2.f32 %v3247_v62  ;;  %v2760_v57 = vmul.f32 1.442695, %v2738_v40  ;;  %v3232_v55 = vsub.f32 %v7192_v53, %v3212_v47  ;;  %2798 = vadd.xlane.f32.xlu1 %v2797_v11 }
 0x649   : > { %v3203_v48 = vpop.xlane.xlu0 %3202 }
 0x64a   : > { %6024 = vpow2.f32 %v2760_v57  ;;  %v3251_v2 = vmul.f32 1.442695, %v3232_v55  ;;  %v3229_v34 = vsub.f32 %v7197_v27, %v3203_v48 }
 0x64b   : > { %6026 = vpow2.f32 %v3237_v20  ;;  %v1663_v32 = vpop.xlane.xlu1 %1662 }
 0x64c   : > { %v7435_v21 = vpop.eup %6018  ;;  %6028 = vpow2.f32 %v3251_v2  ;;  %v3245_v50 = vmul.f32 1.442695, %v3229_v34 }
 0x64d   : > { %v3209_v56 = vpop.xlane.xlu0 %3208  ;;  %v3264_v31 = vsel %vm635_vm0, %v7435_v21, 0.0  ;;  %6030 = vpow2.f32 %v3241_v18 }
 0x64e   : > { %v7439_v36 = vpop.eup %6020  ;;  %3265 = vadd.xlane.f32.xlu1 %v3264_v31  ;;  %v3231_v53 = vsub.f32 %v7208_v39, %v3209_v56  ;;  %6032 = vrcp.f32 %v1663_v32 }
 0x64f   : > { %v2272_v35 = vpop.xlane.xlu1 %2271  ;;  %v3270_v51 = vsel %vm635_vm0, %v7439_v36, 0.0  ;;  %6034 = vpow2.f32 %v3245_v50 }
 0x650   : > { %v3249_v6 = vmul.f32 1.442695, %v3231_v53 }
 0x651   : > { %v1660_v27 = vpop.xlane.xlu0 %1659 }
 0x652   : > { %v7444_v63 = vpop.eup %6022  ;;  %3271 = vadd.xlane.f32.xlu1 %v3270_v51  ;;  %6036 = vrcp.f32 %v1660_v27 }
 0x653   : > { %v1669_v41 = vpop.xlane.xlu1 %1668  ;;  %6038 = vrcp.f32 %v2272_v35  ;;  %v3276_v20 = vsel %vm635_vm0, %v7444_v63, 0.0 }
 0x654   : > { %v7446_v62 = vpop.eup %6024 }
 0x655   : > { %v7448_v40 = vpop.eup %6026  ;;  %v2269_v39 = vpop.xlane.xlu0 %2268  ;;  %v2794_v47 = vsel %vm635_vm0, %v7446_v62, 0.0 }
 0x656   : > { %v7454_v11 = vpop.eup %6028  ;;  %6040 = vrcp.f32 %v2269_v39  ;;  %3277 = vadd.xlane.f32.xlu1 %v3276_v20  ;;  %2795 = vadd.xlane.f32.xlu0 %v2794_v47  ;;  %v3261_v48 = vsel %vm635_vm0, %v7448_v40, 0.0 }
 0x657   : > { %6042 = vpow2.f32 %v3249_v6  ;;  %v2278_v9 = vpop.xlane.xlu1 %2277  ;;  %v3282_v55 = vsel %vm635_vm0, %v7454_v11, 0.0  ;;  %v7460_v2 = vpop.eup %6030 }
 0x658   : > { %6044 = vrcp.f32 %v1669_v41  ;;  %v6033_v34 = vpop.eup %6032  ;;  %v3267_v31 = vsel %vm635_vm0, %v7460_v2, 0.0 }
 0x659   : > { %v1666_v57 = vpop.xlane.xlu0 %1665  ;;  %v7462_v32 = vpop.eup %6034  ;;  %v1707_v35 = vmul.f32 %v6033_v34, %v7202_v24 }
 0x65a   : > { %6046 = vrcp.f32 %v1666_v57  ;;  %3283 = vadd.xlane.f32.xlu1 %v3282_v55  ;;  %3262 = vadd.xlane.f32.xlu0 %v3261_v48  ;;  %v3273_v20 = vsel %vm635_vm0, %v7462_v32, 0.0 }
 0x65b   : > { %6048 = vrcp.f32 %v2278_v9 }
 0x65c   : > { %v6037_v18 = vpop.eup %6036 }
 0x65d   : > { %v2275_v56 = vpop.xlane.xlu0 %2274  ;;  %v6039_v50 = vpop.eup %6038  ;;  %v1706_v53 = vmul.f32 %v6037_v18, %v7218_v17 }
 0x65e   : > { %6050 = vrcp.f32 %v2275_v56  ;;  %3268 = vadd.xlane.f32.xlu0 %v3267_v31  ;;  %v7476_v9 = vmul.f32 %v6039_v50, %v7214_v5  ;;  %v7969_v50 = vld [vmem:[#allocation14_spill] sm:$0xff] }
 0x65f   : > { %v1847_v6 = vpack.c.bf16 %v1707_v35, %v1706_v53  ;;  %v7970_v53 = vld [vmem:[#allocation15_spill] sm:$0xff] }
 0x660   : > { %v6041_v27 = vpop.eup %6040  ;;  %v1675_v51 = vpop.xlane.xlu1 %1674 }
 0x661   : > { %v7468_v41 = vpop.eup %6042  ;;  %6052 = vrcp.f32 %v1675_v51  ;;  %v1672_v39 = vpop.xlane.xlu0 %1671  ;;  %v7473_v47 = vmul.f32 %v6041_v27, %v7228_v7  ;;  %5317 = vmatprep.mubr.msk.bf16.mxu1 %vm635_vm0, %v1847_v6  ;;  %v7972_v6 = vld [vmem:[#allocation17_spill] sm:$0xff] }
 0x662   : > { %v6045_v57 = vpop.eup %6044  ;;  %6054 = vrcp.f32 %v1672_v39  ;;  %3274 = vadd.xlane.f32.xlu0 %v3273_v20  ;;  %v3279_v7 = vsel %vm635_vm0, %v7468_v41, 0.0  ;;  %v7973_v20 = vld [vmem:[#allocation18_spill] sm:$0xff] }
 0x663   : > { %v2457_v24 = vpack.c.bf16 %v7476_v9, %v7473_v47  ;;  %v1709_v55 = vmul.f32 %v6045_v57, %v7223_v26  ;;  %v7975_v57 = vld [vmem:[#allocation20_spill] sm:$0xff] }
 0x664   : > { %v6047_v17 = vpop.eup %6046 }
 0x665   : > { %v1708_v48 = vmul.f32 %v6047_v17, %v7236_v38  ;;  %v6049_v34 = vpop.eup %6048 }
 0x666   : > { %3280 = vadd.xlane.f32.xlu0 %v3279_v7  ;;  %v7486_v56 = vmul.f32 %v6049_v34, %v7232_v25  ;;  %v7971_v25 = vld [vmem:[#allocation16_spill] sm:$0xff] }
 0x667   : > { %v1848_v5 = vpack.c.bf16 %v1709_v55, %v1708_v48  ;;  %v7976_v7 = vld [vmem:[#allocation44_spill] sm:$0xff] }
 0x668   : > { %v6051_v18 = vpop.eup %6050 }
 0x669   : > { %v7489_v31 = vmul.f32 %v6051_v18, %v7242_v46  ;;  %5318 = vmatmul.mubr.msk.bf16.vlgmr.msra.gmra.mrb[60].mxu1 %vm635_vm0, %v1848_v5 }
 0x66a   : > { %5382 = vmatpush3.bf16.msra.mxu1 %v7969_v50 }
 0x66b   : > { %v6053_v26 = vpop.eup %6052  ;;  %v2458_v38 = vpack.c.bf16 %v7486_v56, %v7489_v31  ;;  %5383 = vmatprep.subr.bf16.mxu1 %v7970_v53 }
 0x66c   : > { %v6055_v35 = vpop.eup %6054  ;;  %v1711_v27 = vmul.f32 %v6053_v26, %v7248_v14 }
 0x66d   : > { %v1710_v51 = vmul.f32 %v6055_v35, %v7246_v3  ;;  %v7974_v3 = vld [vmem:[#allocation19_spill] sm:$0xff] }
 0x66e   : > { %5384 = vmatpush3.bf16.msra.mxu1 %v7970_v53 }
 0x66f   : > { %5385 = vmatprep.subr.bf16.mxu1 %v7971_v25  ;;  %v1849_v46 = vpack.c.bf16 %v1711_v27, %v1710_v51 }
 0x671   : > { %5321 = vmatprep.mubr.msk.bf16.mxu1 %vm635_vm0, %v1849_v46 }
 0x672   : > { %5386 = vmatpush3.bf16.msra.mxu1 %v7971_v25 }
 0x673   : > { %5387 = vmatprep.subr.bf16.mxu1 %v7972_v6 }
 0x674   : > { %v1681_v39 = vpop.xlane.xlu1 %1680 }
 0x675   : > { %6056 = vrcp.f32 %v1681_v39 }
 0x676   : > { %5388 = vmatpush3.bf16.msra.mxu1 %v7972_v6 }
 0x677   : > { %5389 = vmatprep.subr.bf16.mxu1 %v7973_v20  ;;  %v1678_v14 = vpop.xlane.xlu0 %1677 }
 0x678   : > { %6058 = vrcp.f32 %v1678_v14 }
 0x67a   : > { %5390 = vmatpush3.bf16.msra.mxu1 %v7973_v20 }
 0x67b   : > { %5391 = vmatprep.subr.bf16.mxu1 %v7974_v3 }
 0x67e   : > { %5392 = vmatpush3.bf16.msra.mxu1 %v7974_v3 }
 0x67f   : > { %5431 = vmatprep.subr.bf16.mxu1 %v7975_v57  ;;  %v6057_v17 = vpop.eup %6056 }
 0x680   : > { %v1713_v34 = vmul.f32 %v6057_v17, %v7976_v7 }
 0x682   : > { %v6059_v55 = vpop.eup %6058 }
 0x683   : > { %v1712_v48 = vmul.f32 %v6059_v55, %v7268_v61 }
 0x685   : > { %v1850_v5 = vpack.c.bf16 %v1713_v34, %v1712_v48 }
 0x687   : > { %5322 = vmatmul.mubr.msk.bf16.gmra.mrb[64].mxu1 %vm635_vm0, %v1850_v5 }
 0x688   : > { %v1687_v18 = vpop.xlane.xlu1 %1686 }
 0x689   : > { %6060 = vrcp.f32 %v1687_v18 }
 0x68a   : > { %v1684_v50 = vpop.xlane.xlu0 %1683 }
 0x68b   : > { %6062 = vrcp.f32 %v1684_v50 }
 0x693   : > { %v6061_v26 = vpop.eup %6060 }
 0x694   : > { %v1715_v27 = vmul.f32 %v6061_v26, %v7278_v60 }
 0x695   : > { %v6063_v53 = vpop.eup %6062 }
 0x696   : > { %v1714_v35 = vmul.f32 %v6063_v53, %v7284_v23 }
 0x698   : > { %v1690_v51 = vpop.xlane.xlu0 %1689  ;;  %v1851_v25 = vpack.c.bf16 %v1715_v27, %v1714_v35 }
 0x699   : > { %6064 = vrcp.f32 %v1690_v51 }
 0x69a   : > { %5325 = vmatprep.mubr.msk.bf16.mxu1 %vm635_vm0, %v1851_v25 }
 0x69c   : > { %v2281_v61 = vpop.xlane.xlu0 %2280  ;;  %v1693_v46 = vpop.xlane.xlu1 %1692 }
 0x69d   : > { %6066 = vrcp.f32 %v1693_v46 }
 0x6a0   : > { %v2287_v6 = vpop.xlane.xlu0 %2286  ;;  %v2284_v39 = vpop.xlane.xlu1 %2283 }
 0x6a1   : > { %6068 = vrcp.f32 %v2284_v39 }
 0x6a2   : > { %6070 = vrcp.f32 %v2281_v61 }
 0x6a3   : > { %v6065_v3 = vpop.eup %6064 }
 0x6a4   : > { %v2293_v20 = vpop.xlane.xlu0 %2292  ;;  %v2290_v14 = vpop.xlane.xlu1 %2289  ;;  %v1716_v60 = vmul.f32 %v6065_v3, %v7298_v13  ;;  %v7978_v3 = vld [vmem:[#allocation22_spill] sm:$0xff] }
 0x6a5   : > { %6072 = vrcp.f32 %v2290_v14 }
 0x6a7   : > { %v6067_v17 = vpop.eup %6066 }
 0x6a8   : > { %v2766_v55 = vpop.xlane.xlu0 %2765  ;;  %v2296_v23 = vpop.xlane.xlu1 %2295  ;;  %v1717_v48 = vmul.f32 %v6067_v17, %v7307_v16 }
 0x6a9   : > { %6074 = vrcp.f32 %v2296_v23 }
 0x6aa   : > { %v1852_v7 = vpack.c.bf16 %v1717_v48, %v1716_v60  ;;  %6076 = vrcp.f32 %v2287_v6  ;;  %v7979_v48 = vld [vmem:[#allocation23_spill] sm:$0xff] }
 0x6ab   : > { %v6069_v18 = vpop.eup %6068  ;;  %6078 = vrcp.f32 %v2293_v20 }
 0x6ac   : > { %v2772_v34 = vpop.xlane.xlu0 %2771  ;;  %v2302_v5 = vpop.xlane.xlu1 %2301  ;;  %5326 = vmatmul.mubr.msk.bf16.gmra.mrb[68].mxu1 %vm635_vm0, %v1852_v7  ;;  %v2320_v16 = vmul.f32 %v6069_v18, %v7310_v42 }
 0x6ad   : > { %5393 = vmatprep.mubr.msk.bf16.mxu1 %vm635_vm0, %v2457_v24  ;;  %v6071_v50 = vpop.eup %6070  ;;  %v7977_v24 = vld [vmem:[#allocation21_spill] sm:$0xff] }
 0x6ae   : > { %v2319_v53 = vmul.f32 %v6071_v50, %v7303_v30 }
 0x6af   : > { %v6073_v35 = vpop.eup %6072 }
 0x6b0   : > { %v2299_v26 = vpop.xlane.xlu0 %2298  ;;  %v2769_v13 = vpop.xlane.xlu1 %2768  ;;  %v2459_v25 = vpack.c.bf16 %v2320_v16, %v2319_v53  ;;  %v2322_v46 = vmul.f32 %v6073_v35, %v7320_v15 }
 0x6b1   : > { %6080 = vrcp.f32 %v2299_v26 }
 0x6b2   : > { %6082 = vrcp.f32 %v2769_v13  ;;  %v7980_v13 = vld [vmem:[#allocation24_spill] sm:$0xff] }
 0x6b3   : > { %6084 = vrcp.f32 %v2302_v5  ;;  %v6075_v61 = vpop.eup %6074 }
 0x6b4   : > { %v3215_v27 = vpop.xlane.xlu0 %3214  ;;  %v2775_v51 = vpop.xlane.xlu1 %2774  ;;  %6086 = vrcp.f32 %v2766_v55  ;;  %5394 = vmatmul.mubr.msk.bf16.vlgmr.msra.gmra.mrb[72].mxu1 %vm635_vm0, %v2458_v38 }
 0x6b5   : > { %v3233_v47 = vsub.f32 %v7373_v0, %v3215_v27  ;;  %v6077_v9 = vpop.eup %6076  ;;  %5432 = vmatpush3.bf16.msra.mxu1 %v7975_v57  ;;  %5397 = vmatprep.mubr.msk.bf16.mxu1 %vm635_vm0, %v2459_v25  ;;  %v2324_v0 = vmul.f32 %v6075_v61, %v7334_v1  ;;  %v7981_v25 = vld [vmem:[#allocation25_spill] sm:$0xff] }
 0x6b6   : > { %v6079_v30 = vpop.eup %6078  ;;  %5433 = vmatprep.subr.bf16.mxu1 %v7977_v24  ;;  %v2321_v38 = vmul.f32 %v6077_v9, %v7316_v52 }
 0x6b7   : > { %v3253_v42 = vmul.f32 1.442695, %v3233_v47  ;;  %v2323_v57 = vmul.f32 %v6079_v30, %v7326_v4 }
 0x6b8   : > { %v3221_v6 = vpop.xlane.xlu0 %3220  ;;  %v3218_v39 = vpop.xlane.xlu1 %3217  ;;  %v2460_v15 = vpack.c.bf16 %v2322_v46, %v2321_v38  ;;  %v7983_v38 = vld [vmem:[#allocation27_spill] sm:$0xff] }
 0x6b9   : > { %6088 = vpow2.f32 %v3253_v42  ;;  %v3235_v56 = vsub.f32 %v7384_v19, %v3221_v6  ;;  %v3234_v31 = vsub.f32 %v7387_v58, %v3218_v39  ;;  %5434 = vmatpush3.bf16.msra.mxu1 %v7977_v24  ;;  %v2461_v23 = vpack.c.bf16 %v2324_v0, %v2323_v57  ;;  %v7982_v6 = vld [vmem:[#allocation26_spill] sm:$0xff] }
 0x6ba   : > { %6090 = vrcp.f32 %v2775_v51  ;;  %5435 = vmatprep.subr.bf16.mxu1 %v7978_v3 }
 0x6bb   : > { %v3257_v20 = vmul.f32 1.442695, %v3235_v56  ;;  %v3255_v14 = vmul.f32 1.442695, %v3234_v31  ;;  %v6081_v17 = vpop.eup %6080  ;;  %6092 = vrcp.f32 %v2772_v34 }
 0x6bc   : > { %v2778_v1 = vpop.xlane.xlu0 %2777  ;;  %v3224_v55 = vpop.xlane.xlu1 %3223  ;;  %5398 = vmatmul.mubr.msk.bf16.gmra.mrb[76].mxu1 %vm635_vm0, %v2460_v15  ;;  %v2325_v7 = vmul.f32 %v6081_v17, %v7361_v29 }
 0x6bd   : > { %v6083_v19 = vpop.eup %6082  ;;  %6094 = vpow2.f32 %v3257_v20  ;;  %v3236_v58 = vsub.f32 %v7394_v33, %v3224_v55  ;;  %5436 = vmatpush3.bf16.msra.mxu1 %v7978_v3  ;;  %5401 = vmatprep.mubr.msk.bf16.mxu1 %vm635_vm0, %v2461_v23 }
 0x6be   : > { %v6085_v52 = vpop.eup %6084  ;;  %6096 = vpow2.f32 %v3255_v14  ;;  %5437 = vmatprep.subr.bf16.mxu1 %v7979_v48  ;;  %v2813_v18 = vmul.f32 %v6083_v19, %v7355_v54  ;;  %v7986_v19 = vld [vmem:[#allocation30_spill] sm:$0xff] }
 0x6bf   : > { %v6087_v4 = vpop.eup %6086  ;;  %v3259_v60 = vmul.f32 1.442695, %v3236_v58  ;;  %6098 = vrcp.f32 %v2778_v1  ;;  %v2326_v33 = vmul.f32 %v6085_v52, %v7346_v28  ;;  %v7984_v1 = vld [vmem:[#allocation28_spill] sm:$0xff] }
 0x6c0   : > { %v2784_v34 = vpop.xlane.xlu0 %2783  ;;  %v2781_v5 = vpop.xlane.xlu1 %2780  ;;  %v2812_v50 = vmul.f32 %v6087_v4, %v7328_v10 }
 0x6c1   : > { %6100 = vpow2.f32 %v3259_v60  ;;  %5438 = vmatpush3.bf16.msra.mxu1 %v7979_v48  ;;  %v2462_v16 = vpack.c.bf16 %v2326_v33, %v2325_v7 }
 0x6c2   : > { %6102 = vrcp.f32 %v2781_v5  ;;  %5439 = vmatprep.subr.bf16.mxu1 %v7980_v13  ;;  %v2954_v27 = vpack.c.bf16 %v2813_v18, %v2812_v50 }
 0x6c3   : > { %v7550_v26 = vpop.eup %6088  ;;  %6104 = vrcp.f32 %v2784_v34 }
 0x6c4   : > { %v6091_v53 = vpop.eup %6090  ;;  %v2790_v29 = vpop.xlane.xlu0 %2789  ;;  %v3285_v54 = vsel %vm635_vm0, %v7550_v26, 0.0  ;;  %5402 = vmatmul.mubr.msk.bf16.gmra.mrb[80].mxu1 %vm635_vm0, %v2462_v16 }
 0x6c5   : > { %v2787_v35 = vpop.xlane.xlu1 %2786  ;;  %3286 = vadd.xlane.f32.xlu0 %v3285_v54  ;;  %v6093_v28 = vpop.eup %6092  ;;  %5440 = vmatpush3.bf16.msra.mxu1 %v7980_v13  ;;  %v2815_v51 = vmul.f32 %v6091_v53, %v7375_v43 }
 0x6c6   : > { %6106 = vrcp.f32 %v2787_v35  ;;  %5443 = vmatprep.mubr.msk.bf16.mxu1 %vm635_vm0, %v2954_v27  ;;  %5441 = vmatprep.subr.bf16.mxu1 %v7981_v25  ;;  %v2814_v30 = vmul.f32 %v6093_v28, %v7340_v8 }
 0x6c7   : > { %v7558_v10 = vpop.eup %6094  ;;  %6108 = vrcp.f32 %v2790_v29 }
 0x6c8   : > { %v7562_v61 = vpop.eup %6096  ;;  %v3291_v9 = vsel %vm635_vm0, %v7558_v10, 0.0  ;;  %v2955_v46 = vpack.c.bf16 %v2815_v51, %v2814_v30 }
 0x6c9   : > { %v2793_v47 = vpop.xlane.xlu1 %2792  ;;  %3292 = vadd.xlane.f32.xlu0 %v3291_v9  ;;  %v3288_v42 = vsel %vm635_vm0, %v7562_v61, 0.0  ;;  %v6099_v24 = vpop.eup %6098  ;;  %5442 = vmatpush3.bf16.msra.mxu1 %v7981_v25 }
 0x6ca   : > { %6110 = vrcp.f32 %v2793_v47  ;;  %3289 = vadd.xlane.f32.xlu1 %v3288_v42  ;;  %5481 = vmatprep.subr.bf16.mxu1 %v7982_v6  ;;  %v2816_v56 = vmul.f32 %v6099_v24, %v7396_v12 }
 0x6cb   : > { %v7570_v43 = vpop.eup %6100 }
 0x6cc   : > { %v3294_v39 = vsel %vm635_vm0, %v7570_v43, 0.0  ;;  %v6103_v0 = vpop.eup %6102  ;;  %5444 = vmatmul.mubr.msk.bf16.vlgmr.msra.gmra.mrb[72].mxu1 %vm635_vm0, %v2955_v46 }
 0x6cd   : > { %v6105_v8 = vpop.eup %6104  ;;  %5482 = vmatpush3.bf16.msra.mxu1 %v7982_v6  ;;  %v2817_v31 = vmul.f32 %v6103_v0, %v7398_v45 }
 0x6ce   : > { %3295 = vadd.xlane.f32.xlu1 %v3294_v39  ;;  %5483 = vmatprep.subr.bf16.mxu1 %v7983_v38  ;;  %v2818_v3 = vmul.f32 %v6105_v8, %v7404_v37  ;;  %v7985_v37 = vld [vmem:[#allocation29_spill] sm:$0xff]  ;;  %v7988_v39 = vmov 0.0|0.0  }
 0x6cf   : > { %v2956_v20 = vpack.c.bf16 %v2817_v31, %v2816_v56  ;;  %v7989_v8 = vld [vmem:[#allocation5_spill] sm:$0xff] }
 0x6d0   : > { %v6107_v57 = vpop.eup %6106 }
 0x6d1   : > { %v6109_v14 = vpop.eup %6108  ;;  %v2819_v15 = vmul.f32 %v6107_v57, %v7406_v22  ;;  %5447 = vmatprep.mubr.msk.bf16.mxu1 %vm635_vm0, %v2956_v20  ;;  %5484 = vmatpush3.bf16.msra.mxu1 %v7983_v38  ;;  %v7991_v57 = vld [vmem:[#allocation4_spill] sm:$0xff] }
 0x6d2   : > { %5485 = vmatprep.subr.bf16.mxu1 %v7984_v1  ;;  %v2820_v12 = vmul.f32 %v6109_v14, %v7412_v49  ;;  %v7987_v49 = vld [vmem:[#allocation31_spill] sm:$0xff] }
 0x6d3   : > { %v2957_v55 = vpack.c.bf16 %v2819_v15, %v2818_v3  ;;  %v7992_v3 = vld [vmem:[#allocation2_spill] sm:$0xff] }
 0x6d4   : > { %v6111_v17 = vpop.eup %6110 }
 0x6d5   : > { %v2821_v45 = vmul.f32 %v6111_v17, %v7418_v59  ;;  %5448 = vmatmul.mubr.msk.bf16.gmra.mrb[76].mxu1 %vm635_vm0, %v2957_v55  ;;  %v2799_v22 = vpop.xlane.xlu1 %2798  ;;  %v4759_v17 = vld [vmem:[%s7875_s13 + $0x30] sm:$0xff] }
 0x6d6   : > { %5486 = vmatpush3.bf16.msra.mxu1 %v7984_v1  ;;  %6112 = vrcp.f32 %v2799_v22  ;;  %v4760_v1 = vld [vmem:[%s7875_s13 + $0x38] sm:$0xff] }
 0x6d7   : > { %v2958_v23 = vpack.c.bf16 %v2821_v45, %v2820_v12  ;;  %5487 = vmatprep.subr.bf16.mxu1 %v7985_v37  ;;  %v5747_v12 = vpack.c.bf16 %v4760_v1, %v4759_v17 }
 0x6d9   : > { %5451 = vmatprep.mubr.msk.bf16.mxu1 %vm635_vm0, %v2958_v23 }
 0x6da   : > { %5488 = vmatpush3.bf16.msra.mxu1 %v7985_v37 }
 0x6db   : > { %5489 = vmatprep.subr.bf16.mxu1 %v7986_v19  ;;  %v3266_v58 = vpop.xlane.xlu1 %3265 }
 0x6de   : > { %5490 = vmatpush3.bf16.msra.mxu1 %v7986_v19  ;;  %v7993_v19 = vld [vmem:[#allocation9_spill] sm:$0xff] }
 0x6df   : > { %5491 = vmatprep.subr.bf16.mxu1 %v7987_v49  ;;  %v3272_v59 = vpop.xlane.xlu1 %3271 }
 0x6e0   : > { %v6113_v7 = vpop.eup %6112 }
 0x6e1   : > { %v2823_v50 = vmul.f32 %v6113_v7, %v7427_v44 }
 0x6e2   : > { %5492 = vmatpush3.bf16.msra.mxu1 %v7987_v49 }
 0x6e3   : > { %v2796_v52 = vpop.xlane.xlu0 %2795  ;;  %v3278_v60 = vpop.xlane.xlu1 %3277 }
 0x6e4   : > { %6114 = vrcp.f32 %v2796_v52 }
 0x6e5   : > { %6116 = vrcp.f32 %v3266_v58 }
 0x6e7   : > { %v3263_v4 = vpop.xlane.xlu0 %3262  ;;  %v3284_v5 = vpop.xlane.xlu1 %3283 }
 0x6e8   : > { %6118 = vrcp.f32 %v3263_v4 }
 0x6e9   : > { %6120 = vrcp.f32 %v3272_v59  ;;  %v7994_v59 = vld [vmem:[#allocation7_spill] sm:$0xff] }
 0x6eb   : > { %v3269_v48 = vpop.xlane.xlu0 %3268 }
 0x6ec   : > { %6122 = vrcp.f32 %v3269_v48 }
 0x6ed   : > { %6124 = vrcp.f32 %v3278_v60  ;;  %v7995_v60 = vld [vmem:[#allocation8_spill] sm:$0xff] }
 0x6ee   : > { %v6115_v34 = vpop.eup %6114 }
 0x6ef   : > { %v3275_v18 = vpop.xlane.xlu0 %3274  ;;  %v2822_v33 = vmul.f32 %v6115_v34, %v7446_v62  ;;  %v6117_v13 = vpop.eup %6116  ;;  %v7996_v34 = vld [vmem:[#allocation6_spill] sm:$0xff] }
 0x6f0   : > { %6126 = vrcp.f32 %v3275_v18  ;;  %v3310_v27 = vmul.f32 %v6117_v13, %v7435_v21 }
 0x6f1   : > { %6128 = vrcp.f32 %v3284_v5  ;;  %v2959_v16 = vpack.c.bf16 %v2823_v50, %v2822_v33 }
 0x6f2   : > { %v6119_v53 = vpop.eup %6118 }
 0x6f3   : > { %v3281_v29 = vpop.xlane.xlu0 %3280  ;;  %v6121_v35 = vpop.eup %6120  ;;  %5452 = vmatmul.mubr.msk.bf16.gmra.mrb[80].mxu1 %vm635_vm0, %v2959_v16  ;;  %v3309_v54 = vmul.f32 %v6119_v53, %v7448_v40 }
 0x6f4   : > { %6130 = vrcp.f32 %v3281_v29  ;;  %v3312_v25 = vmul.f32 %v6121_v35, %v7439_v36 }
 0x6f5   : > { %v3451_v51 = vpack.c.bf16 %v3310_v27, %v3309_v54 }
 0x6f6   : > { %v6123_v28 = vpop.eup %6122 }
 0x6f7   : > { %v3311_v62 = vmul.f32 %v6123_v28, %v7460_v2  ;;  %v6125_v44 = vpop.eup %6124  ;;  %5493 = vmatprep.mubr.msk.bf16.mxu1 %vm635_vm0, %v3451_v51  ;;  %v7997_v51 = vld [vmem:[#allocation13_spill] sm:$0xff] }
 0x6f8   : > { %v3314_v42 = vmul.f32 %v6125_v44, %v7444_v63  ;;  %v4758_v63 = vld [vmem:[%s7875_s13 + $0x28] sm:$0xff] }
 0x6f9   : > { %v3452_v47 = vpack.c.bf16 %v3312_v25, %v3311_v62 }
 0x6fa   : > { %v6127_v9 = vpop.eup %6126 }
 0x6fb   : > { %v3313_v30 = vmul.f32 %v6127_v9, %v7462_v32  ;;  %v6129_v24 = vpop.eup %6128  ;;  %5494 = vmatmul.mubr.msk.bf16.vlgmr.msra.gmra.mrb[72].mxu1 %vm635_vm0, %v3452_v47  ;;  %v4757_v32 = vld [vmem:[%s7875_s13 + $0x20] sm:$0xff]  ;;  %v7999_v47 = vld [vmem:[#allocation12_spill] sm:$0xff] }
 0x6fc   : > { %v3316_v2 = vmul.f32 %v6129_v24, %v7454_v11  ;;  %v5744_v6 = vpack.c.bf16 %v4758_v63, %v4757_v32  ;;  %v7990_v11 = vld [vmem:[#allocation3_spill] sm:$0xff]  ;;  %v3574_v24 = vld [vmem:[%s7875_s13] sm:$0xff] }
 0x6fd   : > { %v3453_v40 = vpack.c.bf16 %v3314_v42, %v3313_v30  ;;  %v8000_v42 = vld [vmem:[#allocation10_spill] sm:$0xff] }
 0x6fe   : > { %v6131_v21 = vpop.eup %6130  ;;  %5745 = vmatpush3.bf16.msra.mxu0 %v5744_v6 }
 0x6ff   : > { %5497 = vmatprep.mubr.msk.bf16.mxu1 %vm635_vm0, %v3453_v40  ;;  %v3315_v36 = vmul.f32 %v6131_v21, %v7468_v41  ;;  %5746 = vmatprep.subr.bf16.mxu0 %v7988_v39  ;;  %v3575_v40 = vld [vmem:[%s7875_s13 + $0x8] sm:$0xff] }
 0x700   : > { %v5750_v6 = vpack.c.bf16 %v3575_v40, %v3574_v24  ;;  %v4794_v24 = vld [vmem:[%s7875_s13 + $0x108] sm:$0xff] }
 0x701   : > { %v3454_v46 = vpack.c.bf16 %v3316_v2, %v3315_v36 }
 0x702   : > { %5748 = vmatpush3.bf16.msra.mxu0 %v5747_v12 }
 0x703   : > { %5498 = vmatmul.mubr.msk.bf16.gmra.mrb[76].mxu1 %vm635_vm0, %v3454_v46  ;;  %5749 = vmatprep.subr.bf16.mxu0 %v7988_v39 }
 0x73c   : > { %v5319_v0 = vpop.f32.mrb[60].mxu1 }
 0x73d   : > { %v2035_v41 = vadd.f32 %v5319_v0, %v7989_v8  ;;  %v1911_v56 = vpop.f32.mrb[61].mxu1  ;;  %v3576_v8 = vld [vmem:[%s7875_s13 + $0x10] sm:$0xff] }
 0x73e   : > { %v2025_v31 = vadd.f32 %v7990_v11, %v1911_v56  ;;  %v5320_v38 = vpop.f32.mrb[62].mxu1  ;;  %v3577_v56 = vld [vmem:[%s7875_s13 + $0x18] sm:$0xff] }
 0x73f   : > { %v2040_v20 = vadd.f32 %v7991_v57, %v5320_v38  ;;  %v1914_v14 = vpop.f32.mrb[63].mxu1  ;;  %v5753_v11 = vpack.c.bf16 %v3577_v56, %v3576_v8  ;;  %v4763_v38 = vld [vmem:[%s7875_s13 + $0x40] sm:$0xff]  ;;  %v4764_v57 = vld [vmem:[%s7875_s13 + $0x48] sm:$0xff] }
 0x740   : > { %v2030_v15 = vadd.f32 %v7992_v3, %v1914_v14 }
 0x752   : > { %v3287_v55 = vpop.xlane.xlu0 %3286 }
 0x753   : > { %6132 = vrcp.f32 %v3287_v55  ;;  %v5756_v55 = vpack.c.bf16 %v4764_v57, %v4763_v38  ;;  %v4801_v38 = vld [vmem:[%s7875_s13 + $0x138] sm:$0xff] }
 0x756   : > { %v3293_v45 = vpop.xlane.xlu0 %3292 }
 0x757   : > { %v3290_v23 = vpop.xlane.xlu1 %3289 }
 0x758   : > { %6134 = vrcp.f32 %v3290_v23  ;;  %v4766_v23 = vld [vmem:[%s7875_s13 + $0x58] sm:$0xff] }
 0x759   : > { %6136 = vrcp.f32 %v3293_v45  ;;  %v4765_v45 = vld [vmem:[%s7875_s13 + $0x50] sm:$0xff] }
 0x75a   : > { %v5323_v37 = vpop.f32.mrb[64].mxu1 }
 0x75b   : > { %v3296_v22 = vpop.xlane.xlu1 %3295  ;;  %v2055_v58 = vadd.f32 %v5323_v37, %v7993_v19  ;;  %v1927_v49 = vpop.f32.mrb[65].mxu1  ;;  %v5759_v37 = vpack.c.bf16 %v4766_v23, %v4765_v45  ;;  %v4769_v19 = vld [vmem:[%s7875_s13 + $0x68] sm:$0xff]  ;;  %v4810_v45 = vld [vmem:[%s7875_s13 + $0x170] sm:$0xff]  ;;  %v4811_v23 = vld [vmem:[%s7875_s13 + $0x178] sm:$0xff] }
 0x75c   : > { %6138 = vrcp.f32 %v3296_v22  ;;  %v2045_v52 = vadd.f32 %v7994_v59, %v1927_v49  ;;  %v5324_v4 = vpop.f32.mrb[66].mxu1  ;;  %v4768_v22 = vld [vmem:[%s7875_s13 + $0x60] sm:$0xff]  ;;  %v4770_v49 = vld [vmem:[%s7875_s13 + $0x70] sm:$0xff]  ;;  %v4771_v59 = vld [vmem:[%s7875_s13 + $0x78] sm:$0xff] }
 0x75d   : > { %v2060_v48 = vadd.f32 %v7995_v60, %v5324_v4  ;;  %v1930_v7 = vpop.f32.mrb[67].mxu1  ;;  %v6133_v18 = vpop.eup %6132  ;;  %v4773_v4 = vld [vmem:[%s7875_s13 + $0x80] sm:$0xff]  ;;  %v4774_v60 = vld [vmem:[%s7875_s13 + $0x88] sm:$0xff] }
 0x75e   : > { %v2050_v5 = vadd.f32 %v7996_v34, %v1930_v7  ;;  %v3317_v50 = vmul.f32 %v6133_v18, %v7550_v26  ;;  %v7998_v26 = vld [vmem:[#allocation11_spill] sm:$0xff]  ;;  %v4775_v7 = vld [vmem:[%s7875_s13 + $0x90] sm:$0xff]  ;;  %v4776_v34 = vld [vmem:[%s7875_s13 + $0x98] sm:$0xff] }
 0x75f   : > { %v4778_v18 = vld [vmem:[%s7875_s13 + $0xa0] sm:$0xff] }
 0x762   : > { %v6135_v33 = vpop.eup %6134 }
 0x763   : > { %v3318_v13 = vmul.f32 %v6135_v33, %v7562_v61  ;;  %v6137_v16 = vpop.eup %6136  ;;  %v4779_v33 = vld [vmem:[%s7875_s13 + $0xa8] sm:$0xff] }
 0x764   : > { %v3319_v35 = vmul.f32 %v6137_v16, %v7558_v10  ;;  %v4781_v16 = vld [vmem:[%s7875_s13 + $0xb8] sm:$0xff] }
 0x765   : > { %v3455_v53 = vpack.c.bf16 %v3318_v13, %v3317_v50  ;;  %v5774_v50 = vpack.c.bf16 %v4779_v33, %v4778_v18  ;;  %v4780_v13 = vld [vmem:[%s7875_s13 + $0xb0] sm:$0xff] }
 0x766   : > { %v6139_v29 = vpop.eup %6138 }
 0x767   : > { %5501 = vmatprep.mubr.msk.bf16.mxu1 %vm635_vm0, %v3455_v53  ;;  %v3320_v54 = vmul.f32 %v6139_v29, %v7570_v43  ;;  %v5777_v53 = vpack.c.bf16 %v4781_v16, %v4780_v13  ;;  %v4783_v29 = vld [vmem:[%s7875_s13 + $0xc0] sm:$0xff] }
 0x769   : > { %v3456_v27 = vpack.c.bf16 %v3320_v54, %v3319_v35  ;;  %v4784_v35 = vld [vmem:[%s7875_s13 + $0xc8] sm:$0xff] }
 0x76a   : > { %v5780_v54 = vpack.c.bf16 %v4784_v35, %v4783_v29 }
 0x76b   : > { %5502 = vmatmul.mubr.msk.bf16.gmra.mrb[80].mxu1 %vm635_vm0, %v3456_v27  ;;  %v4785_v27 = vld [vmem:[%s7875_s13 + $0xd0] sm:$0xff] }
 0x77f   : > { %v5327_v28 = vpop.f32.mrb[68].mxu1 }
 0x780   : > { %v7640_v25 = vadd.f32 %v5327_v28, %v7997_v51  ;;  %v1943_v62 = vpop.f32.mrb[69].mxu1  ;;  %v4786_v28 = vld [vmem:[%s7875_s13 + $0xd8] sm:$0xff] }
 0x781   : > { %v7643_v44 = vadd.f32 %v7998_v26, %v1943_v62  ;;  %v5328_v61 = vpop.f32.mrb[70].mxu1  ;;  %v5783_v51 = vpack.c.bf16 %v4786_v28, %v4785_v27  ;;  %v4788_v62 = vld [vmem:[%s7875_s13 + $0xe0] sm:$0xff]  ;;  %v4789_v26 = vld [vmem:[%s7875_s13 + $0xe8] sm:$0xff] }
 0x782   : > { %v7646_v9 = vadd.f32 %v7999_v47, %v5328_v61  ;;  %v1946_v30 = vpop.f32.mrb[71].mxu1  ;;  %v5786_v61 = vpack.c.bf16 %v4789_v26, %v4788_v62  ;;  %v4790_v47 = vld [vmem:[%s7875_s13 + $0xf0] sm:$0xff] }
 0x783   : > { %v7649_v10 = vadd.f32 %v8000_v42, %v1946_v30  ;;  %v4791_v30 = vld [vmem:[%s7875_s13 + $0xf8] sm:$0xff] }
 0x784   : > { %v5789_v42 = vpack.c.bf16 %v4791_v30, %v4790_v47 }
 0x7ce   : > { %v5495_v43 = vpop.f32.mrb[72].mxu1 }
 0x7cf   : > { %v5815_v21 = vadd.f32 %v5495_v43, %v2035_v41  ;;  %v3515_v36 = vpop.f32.mrb[73].mxu1  ;;  %v8001_v41 = vmov 0.0   ;;  %v4793_v43 = vld [vmem:[%s7875_s13 + $0x100] sm:$0xff] }
 0x7d0   : > { %v5816_v2 = vadd.f32 %v3515_v36, %v2025_v31  ;;  %v5496_v46 = vpop.f32.mrb[74].mxu1  ;;  %v5792_v40 = vpack.c.bf16 %v4794_v24, %v4793_v43  ;;  %v4796_v36 = vld [vmem:[%s7875_s13 + $0x118] sm:$0xff] }
 0x7d1   : > { %v5817_v32 = vadd.f32 %v5496_v46, %v2040_v20  ;;  %v3518_v63 = vpop.f32.mrb[75].mxu1  ;;  %v4798_v46 = vld [vmem:[%s7875_s13 + $0x120] sm:$0xff] }
 0x7d2   : > { %v5818_v0 = vadd.f32 %v3518_v63, %v2030_v15 }
 0x7d4   : > { %5514 = vmatmul.mubr.msk.f32.vlgmr.msra.gmra.mrb[62].mxu0 %vm789_vm1, %v5818_v0 }
 0x7d5   : > { %5751 = vmatpush3.bf16.msra.mxu0 %v5750_v6  ;;  %5524 = vmatprep.mubr.msk.f32.mxu0 %vm6149_vm2, %v8001_v41 }
 0x7d6   : > { %v5499_v31 = vpop.f32.mrb[76].mxu1  ;;  %5752 = vmatprep.subr.bf16.mxu0 %v7988_v39 }
 0x7d7   : > { %v7673_v20 = vadd.f32 %v5499_v31, %v2055_v58  ;;  %v3531_v14 = vpop.f32.mrb[77].mxu1  ;;  %v5762_v58 = vpack.c.bf16 %v4769_v19, %v4768_v22  ;;  %v4800_v31 = vld [vmem:[%s7875_s13 + $0x130] sm:$0xff]  ;;  %v4813_v22 = vld [vmem:[%s7876_s14] ss:$0 sm:$0xff] }
 0x7d8   : > { %v5820_v3 = vadd.f32 %v3531_v14, %v2045_v52  ;;  %v5500_v15 = vpop.f32.mrb[78].mxu1  ;;  %v5765_v52 = vpack.c.bf16 %v4771_v59, %v4770_v49 }
 0x7d9   : > { %v7675_v17 = vadd.f32 %v5500_v15, %v2060_v48  ;;  %v3534_v1 = vpop.f32.mrb[79].mxu1  ;;  %5754 = vmatpush3.bf16.msra.mxu0 %v5753_v11  ;;  %v5768_v48 = vpack.c.bf16 %v4774_v60, %v4773_v4  ;;  %v4806_v15 = vld [vmem:[%s7875_s13 + $0x158] sm:$0xff] }
 0x7da   : > { %v5822_v12 = vadd.f32 %v3534_v1, %v2050_v5  ;;  %5755 = vmatprep.subr.bf16.mxu0 %v7988_v39  ;;  %v5771_v5 = vpack.c.bf16 %v4776_v34, %v4775_v7  ;;  %v4808_v1 = vld [vmem:[%s7875_s13 + $0x160] sm:$0xff] }
 0x7dc   : > { %5525 = vmatmul.mubr.msk.f32.vlgmr.msra.gmra.mrb[62].mxu0 %vm789_vm1, %v5816_v2 }
 0x7dd   : > { %5757 = vmatpush3.bf16.msra.mxu0 %v5756_v55  ;;  %5535 = vmatprep.mubr.msk.f32.mxu0 %vm6149_vm2, %v8001_v41  ;;  %v4809_v55 = vld [vmem:[%s7875_s13 + $0x168] sm:$0xff] }
 0x7de   : > { %5758 = vmatprep.subr.bf16.mxu0 %v7988_v39 }
 0x7e1   : > { %5760 = vmatpush3.bf16.msra.mxu0 %v5759_v37  ;;  %v5813_v37 = vpack.c.bf16 %v4811_v23, %v4810_v45 }
 0x7e2   : > { %5761 = vmatprep.subr.bf16.mxu0 %v7988_v39 }
 0x7e4   : > { %5536 = vmatmul.mubr.msk.f32.vlgmr.msra.gmra.mrb[62].mxu0 %vm789_vm1, %v5815_v21  ;;  %v4795_v21 = vld [vmem:[%s7875_s13 + $0x110] sm:$0xff] }
 0x7e5   : > { %5763 = vmatpush3.bf16.msra.mxu0 %v5762_v58  ;;  %5546 = vmatprep.mubr.msk.f32.mxu0 %vm6149_vm2, %v8001_v41  ;;  %v5795_v2 = vpack.c.bf16 %v4796_v36, %v4795_v21  ;;  %v4814_v58 = vld [vmem:[%s7877_s15] ss:$0 sm:$0xff] }
 0x7e6   : > { %5764 = vmatprep.subr.bf16.mxu0 %v7988_v39 }
 0x7e9   : > { %5766 = vmatpush3.bf16.msra.mxu0 %v5765_v52 }
 0x7ea   : > { %5767 = vmatprep.subr.bf16.mxu0 %v7988_v39 }
 0x7ec   : > { %5547 = vmatmul.mubr.msk.f32.vlgmr.msra.gmra.mrb[62].mxu0 %vm789_vm1, %v5817_v32  ;;  %v4799_v32 = vld [vmem:[%s7875_s13 + $0x128] sm:$0xff] }
 0x7ed   : > { %5769 = vmatpush3.bf16.msra.mxu0 %v5768_v48  ;;  %5557 = vmatprep.mubr.msk.f32.mxu0 %vm6149_vm2, %v8001_v41  ;;  %v5798_v8 = vpack.c.bf16 %v4799_v32, %v4798_v46 }
 0x7ee   : > { %5770 = vmatprep.subr.bf16.mxu0 %v7988_v39 }
 0x7f1   : > { %5772 = vmatpush3.bf16.msra.mxu0 %v5771_v5 }
 0x7f2   : > { %5773 = vmatprep.subr.bf16.mxu0 %v7988_v39 }
 0x7f4   : > { %5558 = vmatmul.mubr.msk.f32.vlgmr.msra.gmra.mrb[62].mxu0 %vm789_vm1, %v5820_v3 }
 0x7f5   : > { %5775 = vmatpush3.bf16.msra.mxu0 %v5774_v50  ;;  %5568 = vmatprep.mubr.msk.f32.mxu0 %vm6149_vm2, %v8001_v41 }
 0x7f6   : > { %5776 = vmatprep.subr.bf16.mxu0 %v7988_v39 }
 0x7f9   : > { %5778 = vmatpush3.bf16.msra.mxu0 %v5777_v53 }
 0x7fa   : > { %5779 = vmatprep.subr.bf16.mxu0 %v7988_v39 }
 0x7fc   : > { %5569 = vmatmul.mubr.msk.f32.vlgmr.msra.gmra.mrb[62].mxu0 %vm789_vm1, %v5822_v12  ;;  %v5810_v12 = vpack.c.bf16 %v4809_v55, %v4808_v1 }
 0x7fd   : > { %5781 = vmatpush3.bf16.msra.mxu0 %v5780_v54  ;;  %5579 = vmatprep.mubr.msk.f32.mxu0 %vm6149_vm2, %v8001_v41 }
 0x7fe   : > { %5782 = vmatprep.subr.bf16.mxu0 %v7988_v39 }
 0x801   : > { %5784 = vmatpush3.bf16.msra.mxu0 %v5783_v51 }
 0x802   : > { %5785 = vmatprep.subr.bf16.mxu0 %v7988_v39 }
 0x804   : > { %5580 = vmatmul.mubr.msk.f32.vlgmr.msra.gmra.mrb[62].mxu0 %vm789_vm1, %v7673_v20 }
 0x805   : > { %5787 = vmatpush3.bf16.msra.mxu0 %v5786_v61  ;;  %5590 = vmatprep.mubr.msk.f32.mxu0 %vm6149_vm2, %v8001_v41 }
 0x806   : > { %5788 = vmatprep.subr.bf16.mxu0 %v7988_v39 }
 0x809   : > { %5790 = vmatpush3.bf16.msra.mxu0 %v5789_v42 }
 0x80a   : > { %5791 = vmatprep.subr.bf16.mxu0 %v7988_v39 }
 0x80c   : > { %5591 = vmatmul.mubr.msk.f32.vlgmr.msra.gmra.mrb[62].mxu0 %vm789_vm1, %v7675_v17 }
 0x80d   : > { %5793 = vmatpush3.bf16.msra.mxu0 %v5792_v40  ;;  %5601 = vmatprep.mubr.msk.f32.mxu0 %vm6149_vm2, %v8001_v41 }
 0x80e   : > { %5794 = vmatprep.subr.bf16.mxu0 %v7988_v39 }
 0x811   : > { %5796 = vmatpush3.bf16.msra.mxu0 %v5795_v2 }
 0x812   : > { %5797 = vmatprep.subr.bf16.mxu0 %v7988_v39 }
 0x83e   : > { %v5503_v63 = vpop.f32.mrb[80].mxu1 }
 0x83f   : > { %v5823_v6 = vadd.f32 %v5503_v63, %v7640_v25  ;;  %v3547_v0 = vpop.f32.mrb[81].mxu1  ;;  %v5801_v25 = vpack.c.bf16 %v4801_v38, %v4800_v31 }
 0x840   : > { %v5824_v56 = vadd.f32 %v3547_v0, %v7643_v44  ;;  %v5504_v11 = vpop.f32.mrb[82].mxu1  ;;  %v4803_v44 = vld [vmem:[%s7875_s13 + $0x140] sm:$0xff] }
 0x841   : > { %v5825_v57 = vadd.f32 %v5504_v11, %v7646_v9  ;;  %v3550_v20 = vpop.f32.mrb[83].mxu1  ;;  %v4804_v9 = vld [vmem:[%s7875_s13 + $0x148] sm:$0xff] }
 0x842   : > { %v5826_v14 = vadd.f32 %v3550_v20, %v7649_v10  ;;  %5602 = vmatmul.mubr.msk.f32.vlgmr.msra.gmra.mrb[62].mxu0 %vm789_vm1, %v5824_v56  ;;  %v5804_v3 = vpack.c.bf16 %v4804_v9, %v4803_v44  ;;  %v4805_v10 = vld [vmem:[%s7875_s13 + $0x150] sm:$0xff] }
 0x843   : > { %5799 = vmatpush3.bf16.msra.mxu0 %v5798_v8  ;;  %5612 = vmatprep.mubr.msk.f32.mxu0 %vm6149_vm2, %v8001_v41  ;;  %v5807_v17 = vpack.c.bf16 %v4806_v15, %v4805_v10 }
 0x844   : > { %5800 = vmatprep.subr.bf16.mxu0 %v7988_v39 }
 0x847   : > { %5802 = vmatpush3.bf16.msra.mxu0 %v5801_v25 }
 0x848   : > { %5803 = vmatprep.subr.bf16.mxu0 %v7988_v39 }
 0x84a   : > { %5613 = vmatmul.mubr.msk.f32.vlgmr.msra.gmra.mrb[62].mxu0 %vm789_vm1, %v5826_v14 }
 0x84b   : > { %5805 = vmatpush3.bf16.msra.mxu0 %v5804_v3  ;;  %5623 = vmatprep.mubr.msk.f32.mxu0 %vm6149_vm2, %v8001_v41 }
 0x84c   : > { %5806 = vmatprep.subr.bf16.mxu0 %v7988_v39 }
 0x84f   : > { %5808 = vmatpush3.bf16.msra.mxu0 %v5807_v17 }
 0x850   : > { %5809 = vmatprep.subr.bf16.mxu0 %v7988_v39 }
 0x852   : > { %5624 = vmatmul.mubr.msk.f32.vlgmr.msra.gmra.mrb[62].mxu0 %vm789_vm1, %v5823_v6 }
 0x853   : > { %5811 = vmatpush3.bf16.msra.mxu0 %v5810_v12  ;;  %5634 = vmatprep.mubr.msk.f32.mxu0 %vm6149_vm2, %v8001_v41 }
 0x854   : > { %5812 = vmatprep.subr.bf16.mxu0 %v7988_v39 }
 0x857   : > { %5814 = vmatpush3.bf16.msra.mxu0 %v5813_v37 }
 0x85a   : > { %5635 = vmatmul.mubr.msk.f32.vlgmr.msra.gmra.mrb[62].mxu0 %vm789_vm1, %v5825_v57 }
 0x92d   : > { %v4514_v19 = vpop.f32.mrb[62].mxu0 }
 0x92e   : > { %v4526_v49 = vmul.f32 %v4813_v22, %v4514_v19  ;;  %v5636_v59 = vpop.f32.mrb[63].mxu0 }
 0x930   : > { %v4534_v41 = vadd.f32 %v4814_v58, %v4526_v49 }
 0x932   : > { %v4535_v39 = vmax.f32 %v4534_v41, 0.0 }
 0x934   : > { %4536 = vst [vmem:[%s543_s23] sm:$0xff] %v4535_v39 }
 0x935 PF: > { %s26_s21 = sadd.s32 1, %s6146_s21  }
 0x936   : > { %p23_p5 = scmp.ge.s32.totalorder %s26_s21, 4  }
 0x938   :  { %25 = sbr.rel (!%p23_p5) target bundleno = 2 (0x2), region = 131 }

</bundles_post_ra>
